<compile_context>
chip_gen: v7x
topology: tpu7x:2x2x1
jax: 0.10.0
libtpu: 0.0.40
codegen_flags: <defaults>
</compile_context>

<pallas_src>
import jax
import jax.numpy as jnp
from jax.experimental import pallas as pl
from jax.experimental.pallas import tpu as pltpu

KSIZES = (3, 5, 7, 9, 11)   # conv kernel sizes of the 5 parallel branches
MAXP = 5                    # max padding (for k=11)
NSHIFT = 2 * MAXP + 1       # number of absolute shifts in the im2col slab
NEG_SLOPE = 0.01            # LeakyReLU slope
LN_EPS = 1e-5               # nn.LayerNorm default eps


def _leaky(v):
    # max(v, slope*v): 2 VALU ops/element instead of cmp+mul+select.
    return jnp.maximum(v, NEG_SLOPE * v)


def char_cnn_kernel(x_ref, wcat_ref, bcat_ref, wp_ref, bp_ref, gamma_ref,
                    beta_ref, o_ref, slab_ref, ysum_ref):
    # x_ref:    (TB, L, D)        f32   input block (also the residual)
    # wcat_ref: (11*D, 5*D)       bf16  sep-fused conv taps, shift-major in K
    # bcat_ref: (1, 5*D)          f32   fused conv+sep biases (concatenated)
    # wp_ref:   (5*D, 3*D)        bf16  c3_prime taps concatenated along N
    # bp_ref / gamma_ref / beta_ref: (1, D) f32
    # slab_ref: (TB, L, 11*D)     bf16  VMEM scratch: im2col of the padded input
    # ysum_ref: (TB, L, D)        f32   VMEM scratch: c3_prime shifted-tap sum
    TB, L, D = x_ref.shape
    M = TB * L
    KC = NSHIFT * D

    x = x_ref[...]                                  # (TB, L, D) f32
    xb = x.astype(slab_ref.dtype)

    # --- build the (TB, L, 11*D) im2col slab in VMEM (zero edge rows every
    #     step; never gate this on program_id) -----------------------------
    for s in range(NSHIFT):
        o = s - MAXP                                # sequence offset of shift s
        c0 = s * D
        lo = min(L, max(0, -o))                     # first dst row with data
        hi = max(lo, min(L, L - o))                 # one past last data row
        n = hi - lo
        if n > 0:
            src0 = max(0, o)
            slab_ref[:, lo:lo + n, c0:c0 + D] = xb[:, src0:src0 + n, :]
        if lo > 0:
            slab_ref[:, 0:lo, c0:c0 + D] = jnp.zeros((TB, lo, D),
                                                     slab_ref.dtype)
        if hi < L:
            slab_ref[:, hi:L, c0:c0 + D] = jnp.zeros((TB, L - hi, D),
                                                     slab_ref.dtype)

    # --- stage 1: 5 convs + fused 1x1 sep convs == one long-K matmul ------
    slab = slab_ref[...].reshape(M, KC)             # (M, 11*D) bf16
    cat = jnp.dot(slab, wcat_ref[...], preferred_element_type=jnp.float32)
    cat = _leaky(cat + bcat_ref[...])               # (M, 5*D) f32

    # --- stage 2: c3_prime == one matmul + row-shifted sum of its 3 taps --
    y = jnp.dot(cat.astype(wp_ref.dtype), wp_ref[...],
                preferred_element_type=jnp.float32)  # (M, 3*D) f32
    y = y.reshape(TB, L, 3 * D)
    ysum_ref[...] = y[:, :, D:2 * D]                # center tap (j = 1)
    if L > 1:
        # tap j = 0 contributes Y0[l-1]; tap j = 2 contributes Y2[l+1]
        ysum_ref[:, 1:L, :] = ysum_ref[:, 1:L, :] + y[:, 0:L - 1, 0:D]
        ysum_ref[:, 0:L - 1, :] = (ysum_ref[:, 0:L - 1, :]
                                   + y[:, 1:L, 2 * D:3 * D])
    conv = _leaky(ysum_ref[...].reshape(M, D) + bp_ref[...])   # (M, D) f32

    # --- residual + LayerNorm over the feature dim (all f32) --------------
    z = x.reshape(M, D) + conv
    mean = jnp.mean(z, axis=-1, keepdims=True)
    var = jnp.mean((z - mean) ** 2, axis=-1, keepdims=True)
    zn = (z - mean) * jax.lax.rsqrt(var + LN_EPS)
    out = zn * gamma_ref[...] + beta_ref[...]
    o_ref[...] = out.reshape(TB, L, D).astype(o_ref.dtype)


def _full_spec(a):
    nd = a.ndim
    return pl.BlockSpec(a.shape, lambda b, _nd=nd: (0,) * _nd)


def _pick_tb(B, L, target_rows=1024):
    """Largest divisor of B with TB*L ~ target_rows, keeping >=2 grid steps."""
    tb = max(1, min(B, max(1, target_rows // max(L, 1))))
    if B >= 2:
        tb = min(tb, B // 2)      # grid >= 2 so both v7x TensorCores get work
    tb = max(tb, 1)
    while B % tb:
        tb -= 1
    return tb


def char_cnn_pallas(x, packed):
    B, L, D = x.shape
    x = x.astype(jnp.float32)
    tb = _pick_tb(B, L)

    wcat, bcat = packed["w_cat"], packed["b_cat"]
    wpcat, bp = packed["wp_cat"], packed["bp"]
    gamma, beta = packed["gamma"], packed["beta"]
    mm_dtype = wcat.dtype

    return pl.pallas_call(
        char_cnn_kernel,
        out_shape=jax.ShapeDtypeStruct((B, L, D), jnp.float32),
        grid=(B // tb,),
        in_specs=[
            pl.BlockSpec((tb, L, D), lambda b: (b, 0, 0)),
            _full_spec(wcat), _full_spec(bcat), _full_spec(wpcat),
            _full_spec(bp), _full_spec(gamma), _full_spec(beta),
        ],
        out_specs=pl.BlockSpec((tb, L, D), lambda b: (b, 0, 0)),
        scratch_shapes=[
            pltpu.VMEM((tb, L, NSHIFT * D), mm_dtype),   # im2col slab
            pltpu.VMEM((tb, L, D), jnp.float32),         # c3_prime tap sum
        ],
        compiler_params=pltpu.CompilerParams(
            dimension_semantics=("parallel",),
            vmem_limit_bytes=32 * 1024 * 1024),
    )(x, wcat, bcat, wpcat, bp, gamma, beta)


def init_params(key, D):
    """Deterministic synthetic parameters (tap layout: taps[j] = W[:, :, j].T)."""
    keys = jax.random.split(key, 6)
    std = 0.05
    total_taps = sum(KSIZES)
    return dict(
        wc=jax.random.normal(keys[0], (total_taps, D, D), jnp.float32) * std,
        bc=jax.random.normal(keys[1], (len(KSIZES), 1, D), jnp.float32) * std,
        wsep=jax.random.normal(keys[2], (len(KSIZES), D, D), jnp.float32) * std,
        bsep=jax.random.normal(keys[3], (len(KSIZES), 1, D), jnp.float32) * std,
        wp=jax.random.normal(keys[4], (3, 5 * D, D), jnp.float32) * std,
        bp=jax.random.normal(keys[5], (1, D), jnp.float32) * std,
        gamma=jnp.ones((1, D), jnp.float32),
        beta=jnp.zeros((1, D), jnp.float32),
    )


def pack_params(params, mm_dtype=jnp.bfloat16):
    """Host-side packing: fold the 1x1 'sep' convs into the branch taps and
    lay the fused taps out shift-major in a single (11*D, 5*D) matrix; the
    three c3_prime taps are concatenated along the output (N) axis."""
    wc, bc = params["wc"], params["bc"]
    wsep, bsep = params["wsep"], params["bsep"]
    D = wc.shape[1]
    w_cat = jnp.zeros((NSHIFT * D, 5 * D), jnp.float32)
    b_cat = jnp.zeros((1, 5 * D), jnp.float32)
    off = 0
    for m, K in enumerate(KSIZES):
        p = K // 2
        wf = jnp.einsum('kde,ef->kdf', wc[off:off + K], wsep[m])   # fused taps
        for j in range(K):
            s = MAXP - p + j
            w_cat = w_cat.at[s * D:(s + 1) * D, m * D:(m + 1) * D].set(wf[j])
        b_cat = b_cat.at[:, m * D:(m + 1) * D].set(bc[m] @ wsep[m] + bsep[m])
        off += K
    wp_cat = jnp.concatenate([params["wp"][j] for j in range(3)], axis=1)
    return dict(
        w_cat=w_cat.astype(mm_dtype),
        b_cat=b_cat,
        wp_cat=wp_cat.astype(mm_dtype),
        bp=params["bp"],
        gamma=params["gamma"],
        beta=params["beta"],
    )


def char_cnn_ref(x, params):
    """Pure-JAX f32 reference with the PyTorch module's semantics."""
    B, L, D = x.shape
    x_pad = jnp.pad(x, ((0, 0), (MAXP, MAXP), (0, 0)))
    outs = []
    off = 0
    for m, K in enumerate(KSIZES):
        p = K // 2
        acc = jnp.zeros((B, L, D), jnp.float32)
        for j in range(K):
            s = MAXP - p + j
            acc = acc + jnp.einsum('bld,de->ble', x_pad[:, s:s + L, :],
                                   params["wc"][off + j])
        acc = acc + params["bc"][m]
        y = jnp.einsum('bld,de->ble', acc, params["wsep"][m]) + params["bsep"][m]
        outs.append(_leaky(y))
        off += K
    cat = jnp.concatenate(outs, axis=-1)
    cat_pad = jnp.pad(cat, ((0, 0), (1, 1), (0, 0)))
    out = jnp.zeros((B, L, D), jnp.float32)
    for j in range(3):
        out = out + jnp.einsum('blc,cd->bld', cat_pad[:, j:j + L, :],
                               params["wp"][j])
    out = _leaky(out + params["bp"])
    z = x + out
    mean = jnp.mean(z, axis=-1, keepdims=True)
    var = jnp.mean((z - mean) ** 2, axis=-1, keepdims=True)
    return (z - mean) * jax.lax.rsqrt(var + LN_EPS) * params["gamma"] + params["beta"]


def char_cnn_ref_packed(x, packed):
    """Pure-JAX reference mirroring the kernel's packed-weight / bf16 numerics."""
    B, L, D = x.shape
    mm_dtype = packed["w_cat"].dtype
    xpad = jnp.pad(x.astype(mm_dtype), ((0, 0), (MAXP, MAXP), (0, 0)))
    slab = jnp.concatenate([xpad[:, s:s + L, :] for s in range(NSHIFT)], axis=-1)
    cat = _leaky(jnp.einsum('blk,kf->blf', slab, packed["w_cat"],
                            preferred_element_type=jnp.float32)
                 + packed["b_cat"])
    y = jnp.einsum('blc,cf->blf', cat.astype(mm_dtype), packed["wp_cat"],
                   preferred_element_type=jnp.float32)          # (B, L, 3D)
    out = y[:, :, D:2 * D]
    out = out.at[:, 1:, :].add(y[:, :L - 1, 0:D])
    out = out.at[:, :L - 1, :].add(y[:, 1:, 2 * D:3 * D])
    out = _leaky(out + packed["bp"])
    z = x + out
    mean = jnp.mean(z, axis=-1, keepdims=True)
    var = jnp.mean((z - mean) ** 2, axis=-1, keepdims=True)
    return (z - mean) * jax.lax.rsqrt(var + LN_EPS) * packed["gamma"] + packed["beta"]


if __name__ == "__main__":
    B, L, D = 2, 16, 128   # d_model = 128 (module default)
    key = jax.random.PRNGKey(0)
    kx, kp = jax.random.split(key)
    x = jax.random.normal(kx, (B, L, D), jnp.float32)
    params = init_params(kp, D)
    packed = pack_params(params, mm_dtype=jnp.bfloat16)

    out = char_cnn_pallas(x, packed)
    out = jax.block_until_ready(out)
    assert out.shape == (B, L, D)

    # Tight check: pure-JAX reference with the same packed weights / bf16
    # matmul operands / f32 accumulation as the kernel.
    ref_p = char_cnn_ref_packed(x, packed)
    assert jnp.allclose(out, ref_p, atol=2e-3, rtol=2e-3), (
        f"packed-ref max abs diff {jnp.max(jnp.abs(out - ref_p))}")

    # Loose sanity check against the full-f32 module semantics (difference is
    # purely bf16 matmul rounding; output is LayerNorm'd so ~unit scale).
    ref = char_cnn_ref(x, params)
    assert jnp.allclose(out, ref, atol=8e-2, rtol=5e-2), (
        f"f32-ref max abs diff {jnp.max(jnp.abs(out - ref))}")

    print("KERNEL_OK")
</pallas_src>

<mosaic_0001>
module attributes {stable_mosaic.version = 11 : i64} {
  func.func @char_cnn_kernel(%arg0: i32, %arg1: memref<1x16x128xf32, #tpu.memory_space<vmem>>, %arg2: memref<1408x640xbf16, #tpu.memory_space<vmem>>, %arg3: memref<1x640xf32, #tpu.memory_space<vmem>>, %arg4: memref<640x384xbf16, #tpu.memory_space<vmem>>, %arg5: memref<1x128xf32, #tpu.memory_space<vmem>>, %arg6: memref<1x128xf32, #tpu.memory_space<vmem>>, %arg7: memref<1x128xf32, #tpu.memory_space<vmem>>, %arg8: memref<1x16x128xf32, #tpu.memory_space<vmem>>, %arg9: memref<1x16x1408xbf16, #tpu.memory_space<vmem>>, %arg10: memref<1x16x128xf32, #tpu.memory_space<vmem>>) attributes {dimension_semantics = [#tpu.dimension_semantics<parallel>], iteration_bounds = array<i64: 2>, scalar_prefetch = 0 : i64, scratch_operands = 2 : i64, tpu.core_type = #tpu.core_type<tc>, window_params = [{transform_indices = @transform_0, window_bounds = array<i64: 1, 16, 128>}, {pipeline_mode = #tpu.pipeline_mode<synchronous>, transform_indices = @transform_1, window_bounds = array<i64: 1408, 640>}, {pipeline_mode = #tpu.pipeline_mode<synchronous>, transform_indices = @transform_2, window_bounds = array<i64: 1, 640>}, {pipeline_mode = #tpu.pipeline_mode<synchronous>, transform_indices = @transform_3, window_bounds = array<i64: 640, 384>}, {pipeline_mode = #tpu.pipeline_mode<synchronous>, transform_indices = @transform_4, window_bounds = array<i64: 1, 128>}, {pipeline_mode = #tpu.pipeline_mode<synchronous>, transform_indices = @transform_5, window_bounds = array<i64: 1, 128>}, {pipeline_mode = #tpu.pipeline_mode<synchronous>, transform_indices = @transform_6, window_bounds = array<i64: 1, 128>}, {transform_indices = @transform_7, window_bounds = array<i64: 1, 16, 128>}]} {
    %c0 = arith.constant 0 : index
    %c0_0 = arith.constant 0 : index
    %c0_1 = arith.constant 0 : index
    %0 = vector.load %arg1[%c0, %c0_0, %c0_1] : memref<1x16x128xf32, #tpu.memory_space<vmem>>, vector<1x16x128xf32>
    %1 = arith.truncf %0 : vector<1x16x128xf32> to vector<1x16x128xbf16>
    %2 = vector.extract_strided_slice %1 {offsets = [0, 0, 0], sizes = [1, 11, 128], strides = [1, 1, 1]} : vector<1x16x128xbf16> to vector<1x11x128xbf16>
    %c0_2 = arith.constant 0 : index
    %c5 = arith.constant 5 : index
    %c0_3 = arith.constant 0 : index
    %3 = vector.load %arg9[%c0_2, %c5, %c0_3] : memref<1x16x1408xbf16, #tpu.memory_space<vmem>>, vector<1x11x128xbf16>
    tpu.vector_store %arg9[%c0_2, %c5, %c0_3], %2 {strides = array<i32>} : memref<1x16x1408xbf16, #tpu.memory_space<vmem>>, vector<1x11x128xbf16>,
    %cst = arith.constant 0.000000e+00 : bf16
    %4 = vector.broadcast %cst : bf16 to vector<1x5x128xbf16>
    %c0_4 = arith.constant 0 : index
    %c0_5 = arith.constant 0 : index
    %c0_6 = arith.constant 0 : index
    %5 = vector.load %arg9[%c0_4, %c0_5, %c0_6] : memref<1x16x1408xbf16, #tpu.memory_space<vmem>>, vector<1x5x128xbf16>
    tpu.vector_store %arg9[%c0_4, %c0_5, %c0_6], %4 {strides = array<i32>} : memref<1x16x1408xbf16, #tpu.memory_space<vmem>>, vector<1x5x128xbf16>,
    %6 = vector.extract_strided_slice %1 {offsets = [0, 0, 0], sizes = [1, 12, 128], strides = [1, 1, 1]} : vector<1x16x128xbf16> to vector<1x12x128xbf16>
    %c0_7 = arith.constant 0 : index
    %c4 = arith.constant 4 : index
    %c128 = arith.constant 128 : index
    %7 = vector.load %arg9[%c0_7, %c4, %c128] : memref<1x16x1408xbf16, #tpu.memory_space<vmem>>, vector<1x12x128xbf16>
    tpu.vector_store %arg9[%c0_7, %c4, %c128], %6 {strides = array<i32>} : memref<1x16x1408xbf16, #tpu.memory_space<vmem>>, vector<1x12x128xbf16>,
    %cst_8 = arith.constant 0.000000e+00 : bf16
    %8 = vector.broadcast %cst_8 : bf16 to vector<1x4x128xbf16>
    %c0_9 = arith.constant 0 : index
    %c0_10 = arith.constant 0 : index
    %c128_11 = arith.constant 128 : index
    %9 = vector.load %arg9[%c0_9, %c0_10, %c128_11] : memref<1x16x1408xbf16, #tpu.memory_space<vmem>>, vector<1x4x128xbf16>
    tpu.vector_store %arg9[%c0_9, %c0_10, %c128_11], %8 {strides = array<i32>} : memref<1x16x1408xbf16, #tpu.memory_space<vmem>>, vector<1x4x128xbf16>,
    %10 = vector.extract_strided_slice %1 {offsets = [0, 0, 0], sizes = [1, 13, 128], strides = [1, 1, 1]} : vector<1x16x128xbf16> to vector<1x13x128xbf16>
    %c0_12 = arith.constant 0 : index
    %c3 = arith.constant 3 : index
    %c256 = arith.constant 256 : index
    %11 = vector.load %arg9[%c0_12, %c3, %c256] : memref<1x16x1408xbf16, #tpu.memory_space<vmem>>, vector<1x13x128xbf16>
    tpu.vector_store %arg9[%c0_12, %c3, %c256], %10 {strides = array<i32>} : memref<1x16x1408xbf16, #tpu.memory_space<vmem>>, vector<1x13x128xbf16>,
    %cst_13 = arith.constant 0.000000e+00 : bf16
    %12 = vector.broadcast %cst_13 : bf16 to vector<1x3x128xbf16>
    %c0_14 = arith.constant 0 : index
    %c0_15 = arith.constant 0 : index
    %c256_16 = arith.constant 256 : index
    %13 = vector.load %arg9[%c0_14, %c0_15, %c256_16] : memref<1x16x1408xbf16, #tpu.memory_space<vmem>>, vector<1x3x128xbf16>
    tpu.vector_store %arg9[%c0_14, %c0_15, %c256_16], %12 {strides = array<i32>} : memref<1x16x1408xbf16, #tpu.memory_space<vmem>>, vector<1x3x128xbf16>,
    %14 = vector.extract_strided_slice %1 {offsets = [0, 0, 0], sizes = [1, 14, 128], strides = [1, 1, 1]} : vector<1x16x128xbf16> to vector<1x14x128xbf16>
    %c0_17 = arith.constant 0 : index
    %c2 = arith.constant 2 : index
    %c384 = arith.constant 384 : index
    %15 = vector.load %arg9[%c0_17, %c2, %c384] : memref<1x16x1408xbf16, #tpu.memory_space<vmem>>, vector<1x14x128xbf16>
    tpu.vector_store %arg9[%c0_17, %c2, %c384], %14 {strides = array<i32>} : memref<1x16x1408xbf16, #tpu.memory_space<vmem>>, vector<1x14x128xbf16>,
    %cst_18 = arith.constant 0.000000e+00 : bf16
    %16 = vector.broadcast %cst_18 : bf16 to vector<1x2x128xbf16>
    %c0_19 = arith.constant 0 : index
    %c0_20 = arith.constant 0 : index
    %c384_21 = arith.constant 384 : index
    %17 = vector.load %arg9[%c0_19, %c0_20, %c384_21] : memref<1x16x1408xbf16, #tpu.memory_space<vmem>>, vector<1x2x128xbf16>
    tpu.vector_store %arg9[%c0_19, %c0_20, %c384_21], %16 {strides = array<i32>} : memref<1x16x1408xbf16, #tpu.memory_space<vmem>>, vector<1x2x128xbf16>,
    %18 = vector.extract_strided_slice %1 {offsets = [0, 0, 0], sizes = [1, 15, 128], strides = [1, 1, 1]} : vector<1x16x128xbf16> to vector<1x15x128xbf16>
    %c0_22 = arith.constant 0 : index
    %c1 = arith.constant 1 : index
    %c512 = arith.constant 512 : index
    %19 = vector.load %arg9[%c0_22, %c1, %c512] : memref<1x16x1408xbf16, #tpu.memory_space<vmem>>, vector<1x15x128xbf16>
    tpu.vector_store %arg9[%c0_22, %c1, %c512], %18 {strides = array<i32>} : memref<1x16x1408xbf16, #tpu.memory_space<vmem>>, vector<1x15x128xbf16>,
    %cst_23 = arith.constant 0.000000e+00 : bf16
    %20 = vector.broadcast %cst_23 : bf16 to vector<1x1x128xbf16>
    %c0_24 = arith.constant 0 : index
    %c0_25 = arith.constant 0 : index
    %c512_26 = arith.constant 512 : index
    %21 = vector.load %arg9[%c0_24, %c0_25, %c512_26] : memref<1x16x1408xbf16, #tpu.memory_space<vmem>>, vector<1x1x128xbf16>
    tpu.vector_store %arg9[%c0_24, %c0_25, %c512_26], %20 {strides = array<i32>} : memref<1x16x1408xbf16, #tpu.memory_space<vmem>>, vector<1x1x128xbf16>,
    %c0_27 = arith.constant 0 : index
    %c0_28 = arith.constant 0 : index
    %c640 = arith.constant 640 : index
    %22 = vector.load %arg9[%c0_27, %c0_28, %c640] : memref<1x16x1408xbf16, #tpu.memory_space<vmem>>, vector<1x16x128xbf16>
    tpu.vector_store %arg9[%c0_27, %c0_28, %c640], %1 {strides = array<i32>} : memref<1x16x1408xbf16, #tpu.memory_space<vmem>>, vector<1x16x128xbf16>,
    %23 = vector.extract_strided_slice %1 {offsets = [0, 1, 0], sizes = [1, 15, 128], strides = [1, 1, 1]} : vector<1x16x128xbf16> to vector<1x15x128xbf16>
    %c0_29 = arith.constant 0 : index
    %c0_30 = arith.constant 0 : index
    %c768 = arith.constant 768 : index
    %24 = vector.load %arg9[%c0_29, %c0_30, %c768] : memref<1x16x1408xbf16, #tpu.memory_space<vmem>>, vector<1x15x128xbf16>
    tpu.vector_store %arg9[%c0_29, %c0_30, %c768], %23 {strides = array<i32>} : memref<1x16x1408xbf16, #tpu.memory_space<vmem>>, vector<1x15x128xbf16>,
    %cst_31 = arith.constant 0.000000e+00 : bf16
    %25 = vector.broadcast %cst_31 : bf16 to vector<1x1x128xbf16>
    %c0_32 = arith.constant 0 : index
    %c15 = arith.constant 15 : index
    %c768_33 = arith.constant 768 : index
    %26 = vector.load %arg9[%c0_32, %c15, %c768_33] : memref<1x16x1408xbf16, #tpu.memory_space<vmem>>, vector<1x1x128xbf16>
    tpu.vector_store %arg9[%c0_32, %c15, %c768_33], %25 {strides = array<i32>} : memref<1x16x1408xbf16, #tpu.memory_space<vmem>>, vector<1x1x128xbf16>,
    %27 = vector.extract_strided_slice %1 {offsets = [0, 2, 0], sizes = [1, 14, 128], strides = [1, 1, 1]} : vector<1x16x128xbf16> to vector<1x14x128xbf16>
    %c0_34 = arith.constant 0 : index
    %c0_35 = arith.constant 0 : index
    %c896 = arith.constant 896 : index
    %28 = vector.load %arg9[%c0_34, %c0_35, %c896] : memref<1x16x1408xbf16, #tpu.memory_space<vmem>>, vector<1x14x128xbf16>
    tpu.vector_store %arg9[%c0_34, %c0_35, %c896], %27 {strides = array<i32>} : memref<1x16x1408xbf16, #tpu.memory_space<vmem>>, vector<1x14x128xbf16>,
    %cst_36 = arith.constant 0.000000e+00 : bf16
    %29 = vector.broadcast %cst_36 : bf16 to vector<1x2x128xbf16>
    %c0_37 = arith.constant 0 : index
    %c14 = arith.constant 14 : index
    %c896_38 = arith.constant 896 : index
    %30 = vector.load %arg9[%c0_37, %c14, %c896_38] : memref<1x16x1408xbf16, #tpu.memory_space<vmem>>, vector<1x2x128xbf16>
    tpu.vector_store %arg9[%c0_37, %c14, %c896_38], %29 {strides = array<i32>} : memref<1x16x1408xbf16, #tpu.memory_space<vmem>>, vector<1x2x128xbf16>,
    %31 = vector.extract_strided_slice %1 {offsets = [0, 3, 0], sizes = [1, 13, 128], strides = [1, 1, 1]} : vector<1x16x128xbf16> to vector<1x13x128xbf16>
    %c0_39 = arith.constant 0 : index
    %c0_40 = arith.constant 0 : index
    %c1024 = arith.constant 1024 : index
    %32 = vector.load %arg9[%c0_39, %c0_40, %c1024] : memref<1x16x1408xbf16, #tpu.memory_space<vmem>>, vector<1x13x128xbf16>
    tpu.vector_store %arg9[%c0_39, %c0_40, %c1024], %31 {strides = array<i32>} : memref<1x16x1408xbf16, #tpu.memory_space<vmem>>, vector<1x13x128xbf16>,
    %cst_41 = arith.constant 0.000000e+00 : bf16
    %33 = vector.broadcast %cst_41 : bf16 to vector<1x3x128xbf16>
    %c0_42 = arith.constant 0 : index
    %c13 = arith.constant 13 : index
    %c1024_43 = arith.constant 1024 : index
    %34 = vector.load %arg9[%c0_42, %c13, %c1024_43] : memref<1x16x1408xbf16, #tpu.memory_space<vmem>>, vector<1x3x128xbf16>
    tpu.vector_store %arg9[%c0_42, %c13, %c1024_43], %33 {strides = array<i32>} : memref<1x16x1408xbf16, #tpu.memory_space<vmem>>, vector<1x3x128xbf16>,
    %35 = vector.extract_strided_slice %1 {offsets = [0, 4, 0], sizes = [1, 12, 128], strides = [1, 1, 1]} : vector<1x16x128xbf16> to vector<1x12x128xbf16>
    %c0_44 = arith.constant 0 : index
    %c0_45 = arith.constant 0 : index
    %c1152 = arith.constant 1152 : index
    %36 = vector.load %arg9[%c0_44, %c0_45, %c1152] : memref<1x16x1408xbf16, #tpu.memory_space<vmem>>, vector<1x12x128xbf16>
    tpu.vector_store %arg9[%c0_44, %c0_45, %c1152], %35 {strides = array<i32>} : memref<1x16x1408xbf16, #tpu.memory_space<vmem>>, vector<1x12x128xbf16>,
    %cst_46 = arith.constant 0.000000e+00 : bf16
    %37 = vector.broadcast %cst_46 : bf16 to vector<1x4x128xbf16>
    %c0_47 = arith.constant 0 : index
    %c12 = arith.constant 12 : index
    %c1152_48 = arith.constant 1152 : index
    %38 = vector.load %arg9[%c0_47, %c12, %c1152_48] : memref<1x16x1408xbf16, #tpu.memory_space<vmem>>, vector<1x4x128xbf16>
    tpu.vector_store %arg9[%c0_47, %c12, %c1152_48], %37 {strides = array<i32>} : memref<1x16x1408xbf16, #tpu.memory_space<vmem>>, vector<1x4x128xbf16>,
    %39 = vector.extract_strided_slice %1 {offsets = [0, 5, 0], sizes = [1, 11, 128], strides = [1, 1, 1]} : vector<1x16x128xbf16> to vector<1x11x128xbf16>
    %c0_49 = arith.constant 0 : index
    %c0_50 = arith.constant 0 : index
    %c1280 = arith.constant 1280 : index
    %40 = vector.load %arg9[%c0_49, %c0_50, %c1280] : memref<1x16x1408xbf16, #tpu.memory_space<vmem>>, vector<1x11x128xbf16>
    tpu.vector_store %arg9[%c0_49, %c0_50, %c1280], %39 {strides = array<i32>} : memref<1x16x1408xbf16, #tpu.memory_space<vmem>>, vector<1x11x128xbf16>,
    %cst_51 = arith.constant 0.000000e+00 : bf16
    %41 = vector.broadcast %cst_51 : bf16 to vector<1x5x128xbf16>
    %c0_52 = arith.constant 0 : index
    %c11 = arith.constant 11 : index
    %c1280_53 = arith.constant 1280 : index
    %42 = vector.load %arg9[%c0_52, %c11, %c1280_53] : memref<1x16x1408xbf16, #tpu.memory_space<vmem>>, vector<1x5x128xbf16>
    tpu.vector_store %arg9[%c0_52, %c11, %c1280_53], %41 {strides = array<i32>} : memref<1x16x1408xbf16, #tpu.memory_space<vmem>>, vector<1x5x128xbf16>,
    %c0_54 = arith.constant 0 : index
    %c0_55 = arith.constant 0 : index
    %c0_56 = arith.constant 0 : index
    %43 = vector.load %arg9[%c0_54, %c0_55, %c0_56] : memref<1x16x1408xbf16, #tpu.memory_space<vmem>>, vector<1x16x1408xbf16>
    %44 = vector.shape_cast %43 : vector<1x16x1408xbf16> to vector<16x1408xbf16>
    %c0_57 = arith.constant 0 : index
    %c0_58 = arith.constant 0 : index
    %45 = vector.load %arg2[%c0_57, %c0_58] : memref<1408x640xbf16, #tpu.memory_space<vmem>>, vector<1408x640xbf16>
    %cst_59 = arith.constant dense<0.000000e+00> : vector<16x640xf32>
    %46 = tpu.matmul %44, %45, %cst_59 {dimension_numbers = #tpu.dot_dimension_numbers<[1], [0], [0], [1], [0, 0, 1, 1], [], []>} : vector<16x1408xbf16>, vector<1408x640xbf16>, vector<16x640xf32> -> vector<16x640xf32>
    %c0_60 = arith.constant 0 : index
    %c0_61 = arith.constant 0 : index
    %47 = vector.load %arg3[%c0_60, %c0_61] : memref<1x640xf32, #tpu.memory_space<vmem>>, vector<1x640xf32>
    %48 = vector.broadcast %47 : vector<1x640xf32> to vector<16x640xf32>
    %49 = arith.addf %46, %48 : vector<16x640xf32>
    %cst_62 = arith.constant 0.00999999977 : f32
    %50 = vector.broadcast %cst_62 : f32 to vector<16x640xf32>
    %51 = arith.mulf %50, %49 : vector<16x640xf32>
    %52 = arith.maximumf %49, %51 : vector<16x640xf32>
    %53 = arith.truncf %52 : vector<16x640xf32> to vector<16x640xbf16>
    %c0_63 = arith.constant 0 : index
    %c0_64 = arith.constant 0 : index
    %54 = vector.load %arg4[%c0_63, %c0_64] : memref<640x384xbf16, #tpu.memory_space<vmem>>, vector<640x384xbf16>
    %cst_65 = arith.constant dense<0.000000e+00> : vector<16x384xf32>
    %55 = tpu.matmul %53, %54, %cst_65 {dimension_numbers = #tpu.dot_dimension_numbers<[1], [0], [0], [1], [0, 0, 1, 1], [], []>} : vector<16x640xbf16>, vector<640x384xbf16>, vector<16x384xf32> -> vector<16x384xf32>
    %56 = vector.shape_cast %55 : vector<16x384xf32> to vector<1x16x384xf32>
    %57 = vector.extract_strided_slice %56 {offsets = [0, 0, 128], sizes = [1, 16, 128], strides = [1, 1, 1]} : vector<1x16x384xf32> to vector<1x16x128xf32>
    %c0_66 = arith.constant 0 : index
    %c0_67 = arith.constant 0 : index
    %c0_68 = arith.constant 0 : index
    %58 = vector.load %arg10[%c0_66, %c0_67, %c0_68] : memref<1x16x128xf32, #tpu.memory_space<vmem>>, vector<1x16x128xf32>
    tpu.vector_store %arg10[%c0_66, %c0_67, %c0_68], %57 {strides = array<i32>} : memref<1x16x128xf32, #tpu.memory_space<vmem>>, vector<1x16x128xf32>,
    %c0_69 = arith.constant 0 : index
    %c1_70 = arith.constant 1 : index
    %c0_71 = arith.constant 0 : index
    %59 = vector.load %arg10[%c0_69, %c1_70, %c0_71] : memref<1x16x128xf32, #tpu.memory_space<vmem>>, vector<1x15x128xf32>
    %60 = vector.extract_strided_slice %56 {offsets = [0, 0, 0], sizes = [1, 15, 128], strides = [1, 1, 1]} : vector<1x16x384xf32> to vector<1x15x128xf32>
    %61 = arith.addf %59, %60 : vector<1x15x128xf32>
    %c0_72 = arith.constant 0 : index
    %c1_73 = arith.constant 1 : index
    %c0_74 = arith.constant 0 : index
    %62 = vector.load %arg10[%c0_72, %c1_73, %c0_74] : memref<1x16x128xf32, #tpu.memory_space<vmem>>, vector<1x15x128xf32>
    tpu.vector_store %arg10[%c0_72, %c1_73, %c0_74], %61 {strides = array<i32>} : memref<1x16x128xf32, #tpu.memory_space<vmem>>, vector<1x15x128xf32>,
    %c0_75 = arith.constant 0 : index
    %c0_76 = arith.constant 0 : index
    %c0_77 = arith.constant 0 : index
    %63 = vector.load %arg10[%c0_75, %c0_76, %c0_77] : memref<1x16x128xf32, #tpu.memory_space<vmem>>, vector<1x15x128xf32>
    %64 = vector.extract_strided_slice %56 {offsets = [0, 1, 256], sizes = [1, 15, 128], strides = [1, 1, 1]} : vector<1x16x384xf32> to vector<1x15x128xf32>
    %65 = arith.addf %63, %64 : vector<1x15x128xf32>
    %c0_78 = arith.constant 0 : index
    %c0_79 = arith.constant 0 : index
    %c0_80 = arith.constant 0 : index
    %66 = vector.load %arg10[%c0_78, %c0_79, %c0_80] : memref<1x16x128xf32, #tpu.memory_space<vmem>>, vector<1x15x128xf32>
    tpu.vector_store %arg10[%c0_78, %c0_79, %c0_80], %65 {strides = array<i32>} : memref<1x16x128xf32, #tpu.memory_space<vmem>>, vector<1x15x128xf32>,
    %c0_81 = arith.constant 0 : index
    %c0_82 = arith.constant 0 : index
    %c0_83 = arith.constant 0 : index
    %67 = vector.load %arg10[%c0_81, %c0_82, %c0_83] : memref<1x16x128xf32, #tpu.memory_space<vmem>>, vector<1x16x128xf32>
    %68 = vector.shape_cast %67 : vector<1x16x128xf32> to vector<16x128xf32>
    %c0_84 = arith.constant 0 : index
    %c0_85 = arith.constant 0 : index
    %69 = vector.load %arg5[%c0_84, %c0_85] : memref<1x128xf32, #tpu.memory_space<vmem>>, vector<1x128xf32>
    %70 = vector.broadcast %69 : vector<1x128xf32> to vector<16x128xf32>
    %71 = arith.addf %68, %70 : vector<16x128xf32>
    %cst_86 = arith.constant 0.00999999977 : f32
    %72 = vector.broadcast %cst_86 : f32 to vector<16x128xf32>
    %73 = arith.mulf %72, %71 : vector<16x128xf32>
    %74 = arith.maximumf %71, %73 : vector<16x128xf32>
    %75 = vector.shape_cast %0 : vector<1x16x128xf32> to vector<16x128xf32>
    %76 = arith.addf %75, %74 : vector<16x128xf32>
    %cst_87 = arith.constant dense<0.000000e+00> : vector<16xf32>
    %77 = vector.multi_reduction <add>, %76, %cst_87 [1] : vector<16x128xf32> to vector<16xf32>
    %78 = vector.shape_cast %77 : vector<16xf32> to vector<16x1xf32>
    %cst_88 = arith.constant 1.280000e+02 : f32
    %79 = vector.broadcast %cst_88 : f32 to vector<16x1xf32>
    %80 = arith.divf %78, %79 : vector<16x1xf32>
    %81 = vector.broadcast %80 : vector<16x1xf32> to vector<16x128xf32>
    %82 = arith.subf %76, %81 : vector<16x128xf32>
    %83 = arith.mulf %82, %82 : vector<16x128xf32>
    %cst_89 = arith.constant dense<0.000000e+00> : vector<16xf32>
    %84 = vector.multi_reduction <add>, %83, %cst_89 [1] : vector<16x128xf32> to vector<16xf32>
    %85 = vector.shape_cast %84 : vector<16xf32> to vector<16x1xf32>
    %cst_90 = arith.constant 1.280000e+02 : f32
    %86 = vector.broadcast %cst_90 : f32 to vector<16x1xf32>
    %87 = arith.divf %85, %86 : vector<16x1xf32>
    %88 = vector.broadcast %80 : vector<16x1xf32> to vector<16x128xf32>
    %89 = arith.subf %76, %88 : vector<16x128xf32>
    %cst_91 = arith.constant 9.99999974E-6 : f32
    %90 = vector.broadcast %cst_91 : f32 to vector<16x1xf32>
    %91 = arith.addf %87, %90 : vector<16x1xf32>
    %92 = math.rsqrt %91 : vector<16x1xf32>
    %93 = vector.broadcast %92 : vector<16x1xf32> to vector<16x128xf32>
    %94 = arith.mulf %89, %93 : vector<16x128xf32>
    %c0_92 = arith.constant 0 : index
    %c0_93 = arith.constant 0 : index
    %95 = vector.load %arg6[%c0_92, %c0_93] : memref<1x128xf32, #tpu.memory_space<vmem>>, vector<1x128xf32>
    %96 = vector.broadcast %95 : vector<1x128xf32> to vector<16x128xf32>
    %97 = arith.mulf %94, %96 : vector<16x128xf32>
    %c0_94 = arith.constant 0 : index
    %c0_95 = arith.constant 0 : index
    %98 = vector.load %arg7[%c0_94, %c0_95] : memref<1x128xf32, #tpu.memory_space<vmem>>, vector<1x128xf32>
    %99 = vector.broadcast %98 : vector<1x128xf32> to vector<16x128xf32>
    %100 = arith.addf %97, %99 : vector<16x128xf32>
    %101 = vector.shape_cast %100 : vector<16x128xf32> to vector<1x16x128xf32>
    %c0_96 = arith.constant 0 : index
    %c0_97 = arith.constant 0 : index
    %c0_98 = arith.constant 0 : index
    %102 = vector.load %arg8[%c0_96, %c0_97, %c0_98] : memref<1x16x128xf32, #tpu.memory_space<vmem>>, vector<1x16x128xf32>
    tpu.vector_store %arg8[%c0_96, %c0_97, %c0_98], %101 {strides = array<i32>} : memref<1x16x128xf32, #tpu.memory_space<vmem>>, vector<1x16x128xf32>,
    return
  }
  func.func @transform_0(%arg0: i32) -> (i32, i32, i32) {
    %c0_i32 = arith.constant 0 : i32
    %c0_i32_0 = arith.constant 0 : i32
    %c0_i32_1 = arith.constant 0 : i32
    return %arg0, %c0_i32, %c0_i32_0 : i32, i32, i32
  }
  func.func @transform_1(%arg0: i32) -> (i32, i32) {
    %c0_i32 = arith.constant 0 : i32
    %c0_i32_0 = arith.constant 0 : i32
    %c0_i32_1 = arith.constant 0 : i32
    return %c0_i32, %c0_i32_0 : i32, i32
  }
  func.func @transform_2(%arg0: i32) -> (i32, i32) {
    %c0_i32 = arith.constant 0 : i32
    %c0_i32_0 = arith.constant 0 : i32
    %c0_i32_1 = arith.constant 0 : i32
    return %c0_i32, %c0_i32_0 : i32, i32
  }
  func.func @transform_3(%arg0: i32) -> (i32, i32) {
    %c0_i32 = arith.constant 0 : i32
    %c0_i32_0 = arith.constant 0 : i32
    %c0_i32_1 = arith.constant 0 : i32
    return %c0_i32, %c0_i32_0 : i32, i32
  }
  func.func @transform_4(%arg0: i32) -> (i32, i32) {
    %c0_i32 = arith.constant 0 : i32
    %c0_i32_0 = arith.constant 0 : i32
    %c0_i32_1 = arith.constant 0 : i32
    return %c0_i32, %c0_i32_0 : i32, i32
  }
  func.func @transform_5(%arg0: i32) -> (i32, i32) {
    %c0_i32 = arith.constant 0 : i32
    %c0_i32_0 = arith.constant 0 : i32
    %c0_i32_1 = arith.constant 0 : i32
    return %c0_i32, %c0_i32_0 : i32, i32
  }
  func.func @transform_6(%arg0: i32) -> (i32, i32) {
    %c0_i32 = arith.constant 0 : i32
    %c0_i32_0 = arith.constant 0 : i32
    %c0_i32_1 = arith.constant 0 : i32
    return %c0_i32, %c0_i32_0 : i32, i32
  }
  func.func @transform_7(%arg0: i32) -> (i32, i32, i32) {
    %c0_i32 = arith.constant 0 : i32
    %c0_i32_0 = arith.constant 0 : i32
    %c0_i32_1 = arith.constant 0 : i32
    return %arg0, %c0_i32, %c0_i32_0 : i32, i32, i32
  }
}

</mosaic_0001>

<bundles_post_ra>
// kernel: tpu_custom_call.1
= control target key start
LH: loop header
LB: loop body
LE: loop exit
PB: predicated region body
PF: predicated region fallthrough
CT: control target
= control target key end

     0   :  { %12 = vsyncpa [#allocation5], 0  ;;  %s7989_s0 = inlined_call_operand.hbm [shape: f32[2,16,128], index: 0, kind: input, shape index: {}]   ;;  %s7990_s1 = inlined_call_operand.hbm [shape: bf16[1408,640], index: 1, kind: input, shape index: {}]   ;;  %s7991_s2 = inlined_call_operand.hbm [shape: f32[1,640], index: 2, kind: input, shape index: {}]   ;;  %s7992_s3 = inlined_call_operand.hbm [shape: bf16[640,384], index: 3, kind: input, shape index: {}]   ;;  %s7993_s4 = inlined_call_operand.hbm [shape: f32[1,128], index: 4, kind: input, shape index: {}]   ;;  %s7994_s5 = inlined_call_operand.hbm [shape: f32[1,128], index: 5, kind: input, shape index: {}]   ;;  %s7995_s6 = inlined_call_operand.hbm [shape: f32[1,128], index: 6, kind: input, shape index: {}]   ;;  %s7996_s7 = inlined_call_operand.hbm [shape: f32[2,16,128], index: 7, kind: output, shape index: {}]  }
   0x1   :  { %14 = vsyncpa [#allocation5 + $0x1], 0 }
   0x2   :  { %15 = vsyncpa [#allocation8], 0 }
   0x3   :  { %16 = vsyncpa [#allocation11], 0 }
   0x4   :  { %17 = vsyncpa [#allocation14], 0 }
   0x5   :  { %18 = vsyncpa [#allocation6], 0 }
   0x6   :  { %20 = vsyncpa [#allocation6 + $0x1], 0  ;;  %s7522_s24 = smov 0   ;;  %s7524_s25 = smov 0  }
   0x7   :  { %s7526_s26 = smov 0   ;;  %s7528_s27 = smov 0  }
   0x8 LB: > { %s7463_s28 = smov [#allocation7]   ;;  %s7543_s30 = sadd.s32 4294967295, %s7461_s27   ;;  %s7461_s27 = sphi %s7528_s27, %s8022_s27   ;;  %s7457_s26 = sphi %s7526_s26, %s8021_s26   ;;  %s7453_s25 = sphi %s7524_s25, %s8020_s25   ;;  %s7449_s24 = sphi %s7522_s24, %s8019_s24  }
   0x9   : > { %s221_s29 = sshll.u32 %s7463_s28, 4  ;;  %p5416_p0 = scmp.ge.s32.totalorder %s7461_s27, 1  ;;  %s7548_s29 = int_to_ptr.vmem [resolvable:$true] %s221_s29 }
   0xa   : > { %p7997_p1 = scmp.eq.s32.totalorder %s7543_s30, 0  ;;  %p209_p2 = scmp.lt.s32.totalorder %s7461_s27, 3 }
   0xb   : > { %s7464_s9 = smov [#allocation10]   ;;  %s7465_s12 = smov [#allocation13]  }
   0xc   : > { %p7550_p3 = pnand %p5416_p0, %p209_p2  ;;  %s245_s10 = sshll.u32 %s7464_s9, 4  ;;  %s7563_s10 = int_to_ptr.vmem [resolvable:$true] %s245_s10 }
   0xd   : > { %s7565_s13 = sshll.u32 %s7465_s12, 4  ;;  %s7185_s16 = scalar_lea.hbm %s7990_s1, 56320  ;;  %s271_s13 = int_to_ptr.vmem [resolvable:$true] %s7565_s13 }
   0xe   : > { %s8000_s8 = scalar_select %p7550_p3, 1, 0 }
   0xf   : > { %p6302_p5 = pneg %p7550_p3  ;;  %p7186_p7 = scmp.ne.s32.totalorder %s7990_s1, %s7185_s16 }
  0x10   : > { %p7192_p11 = scmp.lt.u32.totalorder %s7185_s16, %s7990_s1 }
  0x11   : > { %p7559_p6 = pnand %p6302_p5, %p7997_p1 }
  0x13   : > { %p7575_p8 = pneg %p7559_p6 }
  0x15   : > { %p7188_p9 = pnand %p7575_p8, %p7186_p7 }
  0x17   : > { %p7189_p10 = pneg %p7188_p9 }
  0x19   : > { %p7194_p12 = pnand %p7192_p11, %p7189_p10 }
  0x1b   : > { %7197 = shalt.err (!%p7194_p12)
}
  0x1c   : > { %s7198_s22 = scalar_lea.vmem %s7548_s29, 56320  ;;  %p7206_p5 = scmp.lt.s32.totalorder %s7548_s29, %s7548_s29 }
  0x1d   : > { %p7199_p13 = scmp.ne.s32.totalorder %s7548_s29, %s7198_s22  ;;  %p7207_p4 = scmp.lt.s32.totalorder %s7198_s22, %s7198_s22 }
  0x1f   : > { %p7201_p0 = pnand %p7199_p13, %p7575_p8  ;;  %p7208_p7 = por %p7207_p4, %p7206_p5 }
  0x21   : > { %p7202_p2 = pneg %p7201_p0 }
  0x23   : > { %p7209_p9 = pnand %p7208_p7, %p7202_p2 }
  0x25   : > { %7212 = shalt.err (!%p7209_p9)
}
  0x26   : > { %s7466_s23 = smov 320   ;;  %s7467_s28 = smov 20  }
  0x27   : > { %6305 = dma.hbm_to_vmem [thread:$0]  (!%p7559_p6), %s7990_s1, 56320, %s7548_s29, [#allocation8], %s7466_s23, %s7466_s23, %s7467_s28  }
  0x28   : > { %s7213_s16 = scalar_lea.hbm %s7992_s3, 15360 }
  0x29   : > { %p7214_p4 = scmp.ne.s32.totalorder %s7992_s3, %s7213_s16  ;;  %p7220_p12 = scmp.lt.u32.totalorder %s7213_s16, %s7992_s3 }
  0x2b   : > { %p7216_p10 = pnand %p7214_p4, %p7575_p8 }
  0x2d   : > { %p7217_p11 = pneg %p7216_p10 }
  0x2f   : > { %p7222_p13 = pnand %p7220_p12, %p7217_p11 }
  0x31   : > { %7225 = shalt.err (!%p7222_p13)
}
  0x32   : > { %s7226_s29 = scalar_lea.vmem %s7563_s10, 15360  ;;  %p7234_p7 = scmp.lt.s32.totalorder %s7563_s10, %s7563_s10 }
  0x33   : > { %p7227_p0 = scmp.ne.s32.totalorder %s7563_s10, %s7226_s29  ;;  %p7235_p9 = scmp.lt.s32.totalorder %s7226_s29, %s7226_s29 }
  0x35   : > { %p7229_p2 = pnand %p7227_p0, %p7575_p8  ;;  %p7236_p4 = por %p7235_p9, %p7234_p7 }
  0x37   : > { %p7230_p5 = pneg %p7229_p2 }
  0x39   : > { %p7237_p10 = pnand %p7236_p4, %p7230_p5 }
  0x3b   : > { %7240 = shalt.err (!%p7237_p10)
}
  0x3c   : > { %s7468_s22 = smov 192   ;;  %s7469_s23 = smov 12  }
  0x3d   : > { %6311 = dma.hbm_to_vmem [thread:$0]  (!%p7559_p6), %s7992_s3, 15360, %s7563_s10, [#allocation11], %s7468_s22, %s7468_s22, %s7469_s23  }
  0x3e   : > { %s7241_s15 = scalar_lea.hbm %s7994_s5, 16 }
  0x3f   : > { %p7242_p11 = scmp.ne.s32.totalorder %s7994_s5, %s7241_s15  ;;  %p7248_p0 = scmp.lt.u32.totalorder %s7241_s15, %s7994_s5 }
  0x41   : > { %p7244_p12 = pnand %p7242_p11, %p7575_p8 }
  0x43   : > { %p7245_p13 = pneg %p7244_p12 }
  0x45   : > { %p7250_p2 = pnand %p7248_p0, %p7245_p13 }
  0x47   : > { %7253 = shalt.err (!%p7250_p2)
}
  0x48   : > { %s7254_s21 = scalar_lea.vmem %s271_s13, 16  ;;  %s7261_s10 = scalar_lea.vmem %s271_s13, 32 }
  0x49   : > { %p7255_p5 = scmp.ne.s32.totalorder %s271_s13, %s7254_s21  ;;  %p7262_p4 = scmp.lt.s32.totalorder %s271_s13, %s271_s13 }
  0x4a   : > { %p7263_p10 = scmp.lt.s32.totalorder %s7261_s10, %s7254_s21 }
  0x4b   : > { %p7257_p7 = pnand %p7255_p5, %p7575_p8 }
  0x4c   : > { %p7264_p1 = por %p7263_p10, %p7262_p4 }
  0x4d   : > { %p7258_p9 = pneg %p7257_p7 }
  0x4f   : > { %p7265_p3 = pnand %p7264_p1, %p7258_p9 }
  0x51   : > { %7268 = shalt.err (!%p7265_p3)
}
  0x52   : > { %6317 = dma.hbm_to_vmem [thread:$0]  (!%p7559_p6), %s7994_s5, 16, %s271_s13, [#allocation14]  }
  0x53   : > { %s7470_s23 = smov [#allocation9]   ;;  %s7471_s9 = smov [#allocation12]  }
  0x54   : > { %s235_s28 = sshll.u32 %s7470_s23, 4  ;;  %s259_s12 = sshll.u32 %s7471_s9, 4  ;;  %s236_s28 = int_to_ptr.vmem [resolvable:$true] %s235_s28  ;;  %s260_s12 = int_to_ptr.vmem [resolvable:$true] %s259_s12 }
  0x55   : > { %s7269_s16 = scalar_lea.hbm %s7991_s2, 80 }
  0x56   : > { %p7270_p1 = scmp.ne.s32.totalorder %s7991_s2, %s7269_s16  ;;  %p7276_p12 = scmp.lt.u32.totalorder %s7269_s16, %s7991_s2 }
  0x58   : > { %p7272_p3 = pnand %p7270_p1, %p7575_p8 }
  0x5a   : > { %p7273_p11 = pneg %p7272_p3 }
  0x5c   : > { %p7278_p13 = pnand %p7276_p12, %p7273_p11 }
  0x5e   : > { %7281 = shalt.err (!%p7278_p13)
}
  0x5f   : > { %s7282_s13 = scalar_lea.vmem %s236_s28, 80  ;;  %s7289_s10 = scalar_lea.vmem %s236_s28, 96 }
  0x60   : > { %p7283_p0 = scmp.ne.s32.totalorder %s236_s28, %s7282_s13  ;;  %p7290_p7 = scmp.lt.s32.totalorder %s236_s28, %s236_s28 }
  0x61   : > { %p7291_p9 = scmp.lt.s32.totalorder %s7289_s10, %s7282_s13 }
  0x62   : > { %p7285_p2 = pnand %p7283_p0, %p7575_p8 }
  0x63   : > { %p7292_p4 = por %p7291_p9, %p7290_p7 }
  0x64   : > { %p7286_p5 = pneg %p7285_p2 }
  0x66   : > { %p7293_p10 = pnand %p7292_p4, %p7286_p5 }
  0x68   : > { %7296 = shalt.err (!%p7293_p10)
}
  0x69   : > { %6308 = dma.hbm_to_vmem [thread:$0]  (!%p7559_p6), %s7991_s2, 80, %s236_s28, [#allocation8]  }
  0x6a   : > { %s7297_s14 = scalar_lea.hbm %s7993_s4, 16 }
  0x6b   : > { %p7298_p1 = scmp.ne.s32.totalorder %s7993_s4, %s7297_s14  ;;  %p7304_p12 = scmp.lt.u32.totalorder %s7297_s14, %s7993_s4 }
  0x6d   : > { %p7300_p3 = pnand %p7298_p1, %p7575_p8 }
  0x6f   : > { %p7301_p11 = pneg %p7300_p3 }
  0x71   : > { %p7306_p13 = pnand %p7304_p12, %p7301_p11 }
  0x73   : > { %7309 = shalt.err (!%p7306_p13)
}
  0x74   : > { %s7310_s20 = scalar_lea.vmem %s260_s12, 16  ;;  %s7317_s28 = scalar_lea.vmem %s260_s12, 32 }
  0x75   : > { %p7311_p0 = scmp.ne.s32.totalorder %s260_s12, %s7310_s20  ;;  %p7318_p7 = scmp.lt.s32.totalorder %s260_s12, %s260_s12 }
  0x76   : > { %p7319_p9 = scmp.lt.s32.totalorder %s7317_s28, %s7310_s20 }
  0x77   : > { %p7313_p2 = pnand %p7311_p0, %p7575_p8 }
  0x78   : > { %p7320_p4 = por %p7319_p9, %p7318_p7 }
  0x79   : > { %p7314_p5 = pneg %p7313_p2 }
  0x7b   : > { %p7321_p10 = pnand %p7320_p4, %p7314_p5 }
  0x7d   : > { %7324 = shalt.err (!%p7321_p10)
}
  0x7e   : > { %6314 = dma.hbm_to_vmem [thread:$0]  (!%p7559_p6), %s7993_s4, 16, %s260_s12, [#allocation11]  }
  0x7f   : > { %s7472_s10 = smov [#allocation15]   ;;  %s7325_s9 = scalar_lea.hbm %s7995_s6, 16 }
  0x80   : > { %s281_s29 = sshll.u32 %s7472_s10, 4  ;;  %p7326_p1 = scmp.ne.s32.totalorder %s7995_s6, %s7325_s9  ;;  %s282_s29 = int_to_ptr.vmem [resolvable:$true] %s281_s29 }
  0x81   : > { %p7332_p12 = scmp.lt.u32.totalorder %s7325_s9, %s7995_s6 }
  0x82   : > { %p7328_p3 = pnand %p7326_p1, %p7575_p8 }
  0x84   : > { %p7329_p11 = pneg %p7328_p3 }
  0x86   : > { %p7334_p13 = pnand %p7332_p12, %p7329_p11 }
  0x88   : > { %7337 = shalt.err (!%p7334_p13)
}
  0x89   : > { %s7338_s12 = scalar_lea.vmem %s282_s29, 16  ;;  %s7345_s18 = scalar_lea.vmem %s282_s29, 32 }
  0x8a   : > { %p7339_p0 = scmp.ne.s32.totalorder %s282_s29, %s7338_s12  ;;  %p7346_p7 = scmp.lt.s32.totalorder %s282_s29, %s282_s29 }
  0x8b   : > { %p7347_p9 = scmp.lt.s32.totalorder %s7345_s18, %s7338_s12 }
  0x8c   : > { %p7341_p2 = pnand %p7339_p0, %p7575_p8 }
  0x8d   : > { %p7348_p4 = por %p7347_p9, %p7346_p7 }
  0x8e   : > { %p7342_p5 = pneg %p7341_p2 }
  0x90   : > { %p7349_p10 = pnand %p7348_p4, %p7342_p5 }
  0x92   : > { %7352 = shalt.err (!%p7349_p10)
}
  0x93   : > { %6320 = dma.hbm_to_vmem [thread:$0]  (!%p7559_p6), %s7995_s6, 16, %s282_s29, [#allocation14]  }
  0x94   : > { %s5415_s19 = sadd.s32 4294967294, %s7461_s27   ;;  %s7694_s11 = sadd.s32 1, %s7461_s27  }
  0x95   : > { %s30_s21 = ssub.s32 %s7461_s27, %s7694_s11  ;;  %s33_s13 = sadd.s32 1, %s7457_s26 }
  0x96   : > { %p31_p8 = scmp.eq.s32.totalorder %s30_s21, 0  ;;  %p40_p1 = scmp.ne.s32.totalorder %s7457_s26, %s7453_s25 }
  0x97   : > { %p41_p3 = scmp.eq.s32.totalorder %s7461_s27, 0  ;;  %p46_p11 = scmp.ne.s32.totalorder %s7453_s25, %s7449_s24 }
  0x98   : > { %s7705_s10 = scalar_select %p31_p8, %s7457_s26, %s33_s13  }
  0x99   : > { %p7707_p12 = por %p41_p3, %p40_p1  ;;  %p8004_p13 = scmp.eq.s32.totalorder %s7543_s30, 0 }
  0x9a   : > { %p196_p0 = scmp.eq.s32.totalorder %s7543_s30, 1  ;;  %p202_p2 = scmp.eq.s32.totalorder %s5415_s19, 1 }
  0x9b   : > { %p7713_p6 = por %p8004_p13, %p46_p11  ;;  %p6335_p5 = scmp.lt.s32.totalorder %s7461_s27, 2 }
  0x9c   : > { %s292_s23 = sand.u32 1, %s7457_s26   ;;  %p7720_p7 = por %p196_p0, %p40_p1 }
  0x9d   : > { %p7724_p9 = por %p202_p2, %p46_p11  ;;  %s5424_s15 = sshll.u32 %s292_s23, 4 }
  0x9e   : > { %s8006_s9 = scalar_select %p7720_p7, 1, 0 }
  0x9f   : > { %s8007_s14 = scalar_select %p7724_p9, 1, 0 }
  0xa0   : > { %s6004_s16 = sshll.u32 %s7461_s27, 8  ;;  %s296_s20 = scalar_lea.vmem [#allocation4], %s5424_s15 }
  0xa1   : > { %s7732_s18 = scalar_lea.hbm %s7989_s0, %s6004_s16  ;;  %s303_s28 = sshll.u32 %s296_s20, 4  ;;  %s7734_s28 = int_to_ptr.vmem [resolvable:$true] %s303_s28 }
  0xa2   : > { %p7738_p4 = pnand %p6335_p5, %p7707_p12  ;;  %s7742_s21 = scalar_lea.sflag [#allocation5], %s292_s23 }
  0xa3   : > { %s7353_s13 = scalar_lea.hbm %s7732_s18, 256  ;;  %s7358_s22 = scalar_lea.hbm %s7989_s0, 512 }
  0xa4   : > { %p7354_p10 = scmp.ne.s32.totalorder %s7732_s18, %s7353_s13  ;;  %p7355_p8 = pneg %p7738_p4 }
  0xa5   : > { %p7359_p11 = scmp.lt.u32.totalorder %s7732_s18, %s7989_s0  ;;  %p7360_p12 = scmp.lt.u32.totalorder %s7358_s22, %s7353_s13 }
  0xa6   : > { %p7356_p1 = pnand %p7355_p8, %p7354_p10  ;;  %p7362_p0 = scmp.lt.u32.totalorder %s7353_s13, %s7732_s18 }
  0xa7   : > { %p7361_p13 = por %p7360_p12, %p7359_p11 }
  0xa8   : > { %p7357_p3 = pneg %p7356_p1 }
  0xa9   : > { %p7363_p2 = por %p7362_p0, %p7361_p13 }
  0xab   : > { %p7364_p5 = pnand %p7363_p2, %p7357_p3 }
  0xad   : > { %7367 = shalt.err (!%p7364_p5)
}
  0xae   : > { %s7368_s23 = scalar_lea.vmem %s7734_s28, 256  ;;  %s7473_s20 = smov [#allocation4]  }
  0xaf   : > { %p7369_p10 = scmp.ne.s32.totalorder %s7734_s28, %s7368_s23  ;;  %s7373_s15 = sshll.u32 %s7473_s20, 4  ;;  %s7374_s15 = int_to_ptr.vmem [resolvable:$false] %s7373_s15 }
  0xb0   : > { %s7375_s16 = scalar_lea.vmem %s7374_s15, 512  ;;  %p7376_p7 = scmp.lt.s32.totalorder %s7734_s28, %s7374_s15 }
  0xb1   : > { %p7371_p1 = pnand %p7369_p10, %p7355_p8  ;;  %p7377_p11 = scmp.lt.s32.totalorder %s7375_s16, %s7368_s23 }
  0xb3   : > { %p7372_p9 = pneg %p7371_p1  ;;  %p7378_p12 = por %p7377_p11, %p7376_p7 }
  0xb5   : > { %p7379_p13 = pnand %p7378_p12, %p7372_p9 }
  0xb7   : > { %7382 = shalt.err (!%p7379_p13)
}
  0xb8   : > { %s7474_s13 = smov 128   ;;  %s7475_s22 = smov 8  }
  0xb9   : > { %6324 = dma.hbm_to_vmem [thread:$0]  (!%p7738_p4), %s7732_s18, 256, %s7734_s28, %s7742_s21, %s7474_s13, %s7474_s13, %s7475_s22  }
  0xba   : > { %p8009_p8 = scmp.ne.s32.totalorder %s8000_s8, 0 }
  0xbb   : > { %s7773_s17 = sand.u32 (!%p8009_p8), 1, %s7453_s25  }
  0xbc   : > { %315 = sbr.rel (%p8009_p8) target bundleno = 1492 (0x5d4), region = 48  ;;  %s5428_s12 = sshll.u32 (!%p8009_p8), %s7773_s17, 4 }
  0xbd   : > { %s318_s23 = scalar_lea.sflag (!%p8009_p8), [#allocation5], %s7773_s17  ;;  %s7779_s20 = scalar_lea.vmem (!%p8009_p8), [#allocation4], %s5428_s12 }
  0xc3   : > { %7428 = dma.done.wait (%p7713_p6), %s318_s23, 256  }
  0xc4   : > { %7430 = vsyncadd (%p7713_p6), %s318_s23, 4294967040  ;;  %p8010_p7 = scmp.eq.s32.totalorder %s7543_s30, 0 }
  0xc6   : > { %7432 = dma.done.wait (%p8010_p7), [#allocation8], 56400   ;;  %p8011_p9 = pmov %p8010_p7 }
  0xc7   : > { %p8012_p4 = pmov %p8010_p7 }
  0xc8   : > { %7434 = vsyncadd (%p8011_p9), [#allocation8], 4294910896 }
  0xc9   : > { %7436 = dma.done.wait (%p8012_p4), [#allocation11], 15376   ;;  %p8013_p3 = pmov %p8012_p4 }
  0xcb   : > { %7438 = vsyncadd (%p8013_p3), [#allocation11], 4294951920  ;;  %p8014_p0 = pmov %p8013_p3 }
  0xcd   : > { %7440 = dma.done.wait (%p8014_p0), [#allocation14], 32   ;;  %p8015_p2 = pmov %p8014_p0 }
  0xce   : > { %v7476_v0 = vmov 0   ;;  %v6392_v1 = vld [vmem:[#allocation7 + $0x4] ss:$20 sps:$4 sm:$0xff]   ;;  %v6396_v3 = vld [vmem:[#allocation7] ss:$20 sps:$4 sm:$0xff]   ;;  %vm484_vm0 = vcmask 1045504  }
  0xcf   : > { %7442 = vsyncadd (%p8015_p2), [#allocation14], 4294967264  ;;  %405 = vst [vmem:[#allocation2 + $0x8] sm:$0x3] %v7476_v0  ;;  %3597 = vmatprep.mubr.bf16.mxu1 %v7476_v0  ;;  %v6394_v2 = vld [vmem:[#allocation7 + $0xc84] ss:$20 sps:$4 sm:$0xff]   ;;  %3350 = vmatprep.subr.bf16.mxu0 %v6392_v1 }
  0xd0   : > { %425 = vst [vmem:[#allocation2 + $0x18] sm:$0x1] %v7476_v0  ;;  %459 = vst [vmem:[#allocation2 + $0x38] sm:$0x80] %v7476_v0  ;;  %v6397_v4 = vld [vmem:[#allocation7 + $0xc80] ss:$20 sps:$4 sm:$0xff]   ;;  %3565 = vmatprep.subr.bf16.mxu1 %v6394_v2  ;;  %3351 = vmatpush1.bf16.msra.mxu0 %v6396_v3 }
  0xd1   : > { %479 = vst [vmem:[#allocation2 + $0x48] sm:$0xc0] %v7476_v0  ;;  %v6398_v5 = vld [vmem:[#allocation7 + $0x2c] ss:$20 sps:$4 sm:$0xff]   ;;  %3566 = vmatpush1.bf16.msra.mxu1 %v6397_v4  ;;  %v6402_v7 = vld [vmem:[#allocation7 + $0x28] ss:$20 sps:$4 sm:$0xff]  }
  0xd2   : > { %v6400_v6 = vld [vmem:[#allocation7 + $0xcac] ss:$20 sps:$4 sm:$0xff]   ;;  %3352 = vmatprep.subr.bf16.mxu0 %v6398_v5  ;;  %v6403_v8 = vld [vmem:[#allocation7 + $0xca8] ss:$20 sps:$4 sm:$0xff]   ;;  %v6408_v11 = vld [vmem:[#allocation7 + $0x50] ss:$20 sps:$4 sm:$0xff]  }
  0xd3   : > { %3567 = vmatprep.subr.bf16.mxu1 %v6400_v6  ;;  %v6404_v9 = vld [vmem:[#allocation7 + $0x54] ss:$20 sps:$4 sm:$0xff]   ;;  %v6409_v12 = vld [vmem:[#allocation7 + $0xcd0] ss:$20 sps:$4 sm:$0xff]   ;;  %v6414_v15 = vld [vmem:[#allocation7 + $0x78] ss:$20 sps:$4 sm:$0xff]  }
  0xd4   : > { %v6406_v10 = vld [vmem:[#allocation7 + $0xcd4] ss:$20 sps:$4 sm:$0xff]   ;;  %3353 = vmatpush1.bf16.msra.mxu0 %v6402_v7  ;;  %v6410_v13 = vld [vmem:[#allocation7 + $0x7c] ss:$20 sps:$4 sm:$0xff]   ;;  %v6415_v16 = vld [vmem:[#allocation7 + $0xcf8] ss:$20 sps:$4 sm:$0xff]  }
  0xd5   : > { %3568 = vmatpush1.bf16.msra.mxu1 %v6403_v8  ;;  %3354 = vmatprep.subr.bf16.mxu0 %v6404_v9  ;;  %v6412_v14 = vld [vmem:[#allocation7 + $0xcfc] ss:$20 sps:$4 sm:$0xff]   ;;  %v6416_v17 = vld [vmem:[#allocation7 + $0xa4] ss:$20 sps:$4 sm:$0xff]   ;;  %v6420_v19 = vld [vmem:[#allocation7 + $0xa0] ss:$20 sps:$4 sm:$0xff]  }
  0xd6   : > { %3569 = vmatprep.subr.bf16.mxu1 %v6406_v10  ;;  %v6418_v18 = vld [vmem:[#allocation7 + $0xd24] ss:$20 sps:$4 sm:$0xff]   ;;  %v6421_v20 = vld [vmem:[#allocation7 + $0xd20] ss:$20 sps:$4 sm:$0xff]   ;;  %v6426_v23 = vld [vmem:[#allocation7 + $0xc8] ss:$20 sps:$4 sm:$0xff]  }
  0xd7   : > { %v6422_v21 = vld [vmem:[#allocation7 + $0xcc] ss:$20 sps:$4 sm:$0xff]   ;;  %v6427_v24 = vld [vmem:[#allocation7 + $0xd48] ss:$20 sps:$4 sm:$0xff]   ;;  %vm485_vm1 = vsmask.f32 5376 }
  0xd8   : > { %3355 = vmatpush1.bf16.msra.mxu0 %v6408_v11  ;;  %v6424_v22 = vld [vmem:[#allocation7 + $0xd4c] ss:$20 sps:$4 sm:$0xff]   ;;  %v6428_v25 = vld [vmem:[#allocation7 + $0xf4] ss:$20 sps:$4 sm:$0xff]   ;;  %v6432_v30 = vld [vmem:[#allocation7 + $0xf0] ss:$20 sps:$4 sm:$0xff]  }
  0xd9   : > { %3570 = vmatpush1.bf16.msra.mxu1 %v6409_v12  ;;  %3356 = vmatprep.subr.bf16.mxu0 %v6410_v13  ;;  %v6430_v26 = vld [vmem:[#allocation7 + $0xd74] ss:$20 sps:$4 sm:$0xff]   ;;  %v6433_v31 = vld [vmem:[#allocation7 + $0xd70] ss:$20 sps:$4 sm:$0xff]   ;;  %v6438_v36 = vld [vmem:[#allocation7 + $0x118] ss:$20 sps:$4 sm:$0xff]  }
  0xda   : > { %3571 = vmatprep.subr.bf16.mxu1 %v6412_v14  ;;  %v377_v27 = vld [vmem:[%s7779_s20] sm:$0xff]  ;;  %v378_v28 = vld [vmem:[%s7779_s20 + $0x8] sm:$0xff]  ;;  %vm486_vm2 = vmand %vm484_vm0, %vm485_vm1  ;;  %vm490_vm3 = vcmask 1047557   ;;  %vm491_vm4 = vsmask.f32 7958  ;;  %vm389_vm6 = vcmask 1047554  }
  0xdb   : > { %v7804_v29 = vpack.c.bf16 %v378_v28, %v377_v27  ;;  %v6434_v32 = vld [vmem:[#allocation7 + $0x11c] ss:$20 sps:$4 sm:$0xff]   ;;  %v6439_v39 = vld [vmem:[#allocation7 + $0xd98] ss:$20 sps:$4 sm:$0xff]   ;;  %v6445_v47 = vld [vmem:[#allocation7 + $0x140] ss:$20 sps:$4 sm:$0xff]  }
  0xdc   : > { %3357 = vmatpush1.bf16.msra.mxu0 %v6414_v15  ;;  %v6436_v33 = vld [vmem:[#allocation7 + $0xd9c] ss:$20 sps:$4 sm:$0xff]   ;;  %v6440_v40 = vld [vmem:[#allocation7 + $0x144] ss:$20 sps:$4 sm:$0xff]   ;;  %v487_v43 = vld [vmem:[#allocation2 + $0x50] sm:$0x3f] }
  0xdd   : > { %3572 = vmatpush1.bf16.msra.mxu1 %v6415_v16  ;;  %3358 = vmatprep.subr.bf16.mxu0 %v6416_v17  ;;  %v7807_v34 = vshrl.u32 %v7804_v29, 16  ;;  %v7810_v35 = vshll.u32 %v7804_v29, 16  ;;  %441 = vst [vmem:[#allocation2 + $0x28] sm:$0xff] %v7804_v29  ;;  %v402_v37 = vrot.slane %v7804_v29, 6  ;;  %v422_v38 = vrot.slane %v7804_v29, 7  ;;  %vm492_vm5 = vmand %vm490_vm3, %vm491_vm4  ;;  %s375_s8 = scalar_lea.vmem [#allocation16], %s5428_s12 }
  0xde   : > { %3573 = vmatprep.subr.bf16.mxu1 %v6418_v18  ;;  %v6444_v45 = vld [vmem:[#allocation7 + $0xc] ss:$20 sps:$4 sm:$0xff]   ;;  %v6451_v49 = vld [vmem:[#allocation7 + $0x168] ss:$20 sps:$4 sm:$0xff]   ;;  %v6457_v54 = vld [vmem:[#allocation7 + $0x190] ss:$20 sps:$4 sm:$0xff]  }
  0xdf   : > { %v480_v41 = vrot.slane %v7807_v34, 2  ;;  %v481_v42 = vrot.slane %v7810_v35, 3  ;;  %404 = vst [vmem:[#allocation2 + $0x8] sm:$0xfc] %v402_v37  ;;  %424 = vst [vmem:[#allocation2 + $0x18] sm:$0xfe] %v422_v38 }
  0xe0   : > { %3359 = vmatpush1.bf16.msra.mxu0 %v6420_v19  ;;  %v6446_v48 = vld [vmem:[#allocation7 + $0x16c] ss:$20 sps:$4 sm:$0xff]   ;;  %v6452_v50 = vld [vmem:[#allocation7 + $0x194] ss:$20 sps:$4 sm:$0xff]   ;;  %v383_v52 = vrot.slane %v7807_v34, 5  ;;  %v386_v55 = vrot.slane %v7810_v35, 6 }
  0xe1   : > { %3574 = vmatpush1.bf16.msra.mxu1 %v6421_v20  ;;  %3360 = vmatprep.subr.bf16.mxu0 %v6422_v21  ;;  %v482_v44 = vor.u32 %v481_v42, %v480_v41  ;;  %v6458_v56 = vld [vmem:[#allocation7 + $0x1bc] ss:$20 sps:$4 sm:$0xff]   ;;  %vm390_vm7 = vsmask.f32 7946  ;;  %v6463_v57 = vld [vmem:[#allocation7 + $0x1b8] ss:$20 sps:$4 sm:$0xff]  }
  0xe2   : > { %3575 = vmatprep.subr.bf16.mxu1 %v6424_v22  ;;  %v387_v59 = vor.u32 %v386_v55, %v383_v52  ;;  %v6464_v60 = vld [vmem:[#allocation7 + $0x1e4] ss:$20 sps:$4 sm:$0xff]   ;;  %vm391_vm8 = vmand %vm389_vm6, %vm390_vm7  ;;  %v6442_v61 = vld [vmem:[#allocation7 + $0x8] ss:$20 sps:$4 sm:$0xff]   ;;  %vm395_vm9 = vcmask 1042432   ;;  %vm410_vm12 = vcmask 1047553  }
  0xe3   : > { %v488_v46 = vsel %vm486_vm2, %v482_v44, %v487_v43  ;;  %v6450_v62 = vld [vmem:[#allocation7 + $0x34] ss:$20 sps:$4 sm:$0xff]   ;;  %v392_v63 = vld [vmem:[#allocation2] sm:$0xfc]  ;;  %v6470_v4 = vld [vmem:[#allocation7 + $0x20c] ss:$20 sps:$4 sm:$0xff]  }
  0xe4   : > { %3361 = vmatpush1.bf16.msra.mxu0 %v6426_v23  ;;  %489 = vst [vmem:[#allocation2 + $0x50] sm:$0x3f] %v488_v46  ;;  %v6469_v2 = vld [vmem:[#allocation7 + $0x1e0] ss:$20 sps:$4 sm:$0xff]   ;;  %v393_v3 = vsel %vm391_vm8, %v387_v59, %v392_v63  ;;  %v6448_v5 = vld [vmem:[#allocation7 + $0x30] ss:$20 sps:$4 sm:$0xff]  }
  0xe5   : > { %3576 = vmatpush1.bf16.msra.mxu1 %v6427_v24  ;;  %3362 = vmatprep.subr.bf16.mxu0 %v6428_v25  ;;  %394 = vst [vmem:[#allocation2] sm:$0xfc] %v393_v3  ;;  %v6456_v6 = vld [vmem:[#allocation7 + $0x5c] ss:$20 sps:$4 sm:$0xff]   ;;  %vm396_vm10 = vsmask.f32 2304 }
  0xe6   : > { %3577 = vmatprep.subr.bf16.mxu1 %v6430_v26  ;;  %v497_v58 = vld [vmem:[#allocation2 + $0x8] sm:$0xff]  ;;  %v6475_v7 = vld [vmem:[#allocation7 + $0x208] ss:$20 sps:$4 sm:$0xff]   ;;  %v6454_v9 = vld [vmem:[#allocation7 + $0x58] ss:$20 sps:$4 sm:$0xff]   ;;  %v406_v46 = vrot.slane %v7807_v34, 6 }
  0xe7   : > { %3382 = vmatprep.mubr.bf16.mxu0 %v497_v58  ;;  %v6476_v8 = vld [vmem:[#allocation7 + $0x234] ss:$20 sps:$4 sm:$0xff]   ;;  %vm397_vm11 = vmand %vm395_vm9, %vm396_vm10  ;;  %v6462_v10 = vld [vmem:[#allocation7 + $0x84] ss:$20 sps:$4 sm:$0xff]   ;;  %vm411_vm13 = vsmask.f32 7942 }
  0xe8   : > { %3363 = vmatpush1.bf16.msra.mxu0 %v6432_v30  ;;  %v6481_v11 = vld [vmem:[#allocation7 + $0x230] ss:$20 sps:$4 sm:$0xff]   ;;  %v6460_v15 = vld [vmem:[#allocation7 + $0x80] ss:$20 sps:$4 sm:$0xff]   ;;  %v6487_v17 = vld [vmem:[#allocation7 + $0x258] ss:$20 sps:$4 sm:$0xff]  }
  0xe9   : > { %3578 = vmatpush1.bf16.msra.mxu1 %v6433_v31  ;;  %3364 = vmatprep.subr.bf16.mxu0 %v6434_v32  ;;  %v6482_v13 = vld [vmem:[#allocation7 + $0x25c] ss:$20 sps:$4 sm:$0xff]   ;;  %v6468_v16 = vld [vmem:[#allocation7 + $0xac] ss:$20 sps:$4 sm:$0xff]   ;;  %v6490_v18 = vld [vmem:[#allocation7 + $0x284] ss:$20 sps:$4 sm:$0xff]  }
  0xea   : > { %3579 = vmatprep.subr.bf16.mxu1 %v6436_v33  ;;  %v6466_v19 = vld [vmem:[#allocation7 + $0xa8] ss:$20 sps:$4 sm:$0xff]   ;;  %v6488_v21 = vld [vmem:[#allocation7 + $0x280] ss:$20 sps:$4 sm:$0xff]   ;;  %v6472_v24 = vld [vmem:[#allocation7 + $0xd0] ss:$20 sps:$4 sm:$0xff]  }
  0xeb   : > { %v493_v51 = vld [vmem:[#allocation2 + $0x50] sm:$0xe0]  ;;  %v6474_v20 = vld [vmem:[#allocation7 + $0xd4] ss:$20 sps:$4 sm:$0xff]   ;;  %v6480_v25 = vld [vmem:[#allocation7 + $0xfc] ss:$20 sps:$4 sm:$0xff]  }
  0xec   : > { %3365 = vmatpush1.bf16.msra.mxu0 %v6438_v36  ;;  %v494_v53 = vsel %vm492_vm5, 0, %v493_v51  ;;  %v398_v12 = vld [vmem:[#allocation2] sm:$0x7]  ;;  %v6496_v23 = vld [vmem:[#allocation7 + $0x2ac] ss:$20 sps:$4 sm:$0xff]   ;;  %v7826_v52 = vld [vmem:[#allocation2 + $0x18] sm:$0xff] }
  0xed   : > { %3580 = vmatpush1.bf16.msra.mxu1 %v6439_v39  ;;  %3366 = vmatprep.subr.bf16.mxu0 %v6440_v40  ;;  %495 = vst [vmem:[#allocation2 + $0x50] sm:$0xe0] %v494_v53  ;;  %v399_v14 = vsel %vm397_vm11, 0, %v398_v12  ;;  %v6494_v26 = vld [vmem:[#allocation7 + $0x2a8] ss:$20 sps:$4 sm:$0xff]   ;;  %vm412_vm14 = vmand %vm410_vm12, %vm411_vm13  ;;  %vm416_vm15 = vcmask 1041408  }
  0xee   : > { %3608 = vmatprep.subr.bf16.mxu1 %v6444_v45  ;;  %400 = vst [vmem:[#allocation2] sm:$0x7] %v399_v14  ;;  %v6502_v27 = vld [vmem:[#allocation7 + $0x2d4] ss:$20 sps:$4 sm:$0xff]   ;;  %v6478_v28 = vld [vmem:[#allocation7 + $0xf8] ss:$20 sps:$4 sm:$0xff]  }
  0xef   : > { %v6486_v30 = vld [vmem:[#allocation7 + $0x124] ss:$20 sps:$4 sm:$0xff]   ;;  %v6508_v32 = vld [vmem:[#allocation7 + $0x2fc] ss:$20 sps:$4 sm:$0xff]   ;;  %v6484_v33 = vld [vmem:[#allocation7 + $0x120] ss:$20 sps:$4 sm:$0xff]  }
  0xf0   : > { %3367 = vmatpush1.bf16.msra.mxu0 %v6445_v47  ;;  %v6500_v31 = vld [vmem:[#allocation7 + $0x2d0] ss:$20 sps:$4 sm:$0xff]   ;;  %v6493_v36 = vld [vmem:[#allocation7 + $0x14c] ss:$20 sps:$4 sm:$0xff]   ;;  %v6491_v39 = vld [vmem:[#allocation7 + $0x148] ss:$20 sps:$4 sm:$0xff]  }
  0xf1   : > { %3368 = vmatprep.subr.bf16.mxu0 %v6446_v48  ;;  %v6506_v37 = vld [vmem:[#allocation7 + $0x2f8] ss:$20 sps:$4 sm:$0xff]   ;;  %v6499_v40 = vld [vmem:[#allocation7 + $0x174] ss:$20 sps:$4 sm:$0xff]   ;;  %v6497_v43 = vld [vmem:[#allocation7 + $0x170] ss:$20 sps:$4 sm:$0xff]  }
  0xf2   : > { %v6514_v38 = vld [vmem:[#allocation7 + $0x324] ss:$20 sps:$4 sm:$0xff]   ;;  %v6512_v41 = vld [vmem:[#allocation7 + $0x320] ss:$20 sps:$4 sm:$0xff]   ;;  %v6505_v44 = vld [vmem:[#allocation7 + $0x19c] ss:$20 sps:$4 sm:$0xff]  }
  0xf3   : > { %v6520_v42 = vld [vmem:[#allocation7 + $0x34c] ss:$20 sps:$4 sm:$0xff]   ;;  %v6518_v45 = vld [vmem:[#allocation7 + $0x348] ss:$20 sps:$4 sm:$0xff]   ;;  %v407_v47 = vrot.slane %v7810_v35, 7  ;;  %vm429_vm2 = vcmask 1047552  }
  0xf4   : > { %3369 = vmatpush1.bf16.msra.mxu0 %v6451_v49  ;;  %v506_v1 = vld [vmem:[#allocation2 + $0x50] sm:$0xff]  ;;  %v6524_v51 = vld [vmem:[#allocation7 + $0x370] ss:$20 sps:$4 sm:$0xff]   ;;  %v6509_v55 = vld [vmem:[#allocation7 + $0x1c0] ss:$20 sps:$4 sm:$0xff]   ;;  %vm435_vm5 = vcmask 1040384  }
  0xf5   : > { %3370 = vmatprep.subr.bf16.mxu0 %v6452_v50  ;;  %3598 = vmatmul.mubr.bf16.vlgmr.msra.gmra.mrb[0].mxu1 %v506_v1  ;;  %v7821_v22 = vld [vmem:[#allocation2] sm:$0xff]  ;;  %v6526_v48 = vld [vmem:[#allocation7 + $0x374] ss:$20 sps:$4 sm:$0xff]   ;;  %v408_v53 = vor.u32 %v407_v47, %v406_v46  ;;  %vm417_vm0 = vsmask.f32 1280  ;;  %vm450_vm10 = vcmask 1047559  }
  0xf6   : > { %3609 = vmatpush1.bf16.msra.mxu1 %v6442_v61  ;;  %3640 = vmatprep.mubr.bf16.mxu1 %v497_v58  ;;  %v6503_v49 = vld [vmem:[#allocation7 + $0x198] ss:$20 sps:$4 sm:$0xff]   ;;  %v6515_v61 = vld [vmem:[#allocation7 + $0x1e8] ss:$20 sps:$4 sm:$0xff]   ;;  %v6536_v63 = vld [vmem:[#allocation7 + $0x3c0] ss:$20 sps:$4 sm:$0xff]  }
  0xf7   : > { %3610 = vmatprep.subr.bf16.mxu1 %v6450_v62  ;;  %v6511_v50 = vld [vmem:[#allocation7 + $0x1c4] ss:$20 sps:$4 sm:$0xff]   ;;  %v6523_v62 = vld [vmem:[#allocation7 + $0x214] ss:$20 sps:$4 sm:$0xff]   ;;  %v6544_v1 = vld [vmem:[#allocation7 + $0x3ec] ss:$20 sps:$4 sm:$0xff]  }
  0xf8   : > { %3371 = vmatpush1.bf16.msra.mxu0 %v6457_v54  ;;  %v6532_v54 = vld [vmem:[#allocation7 + $0x39c] ss:$20 sps:$4 sm:$0xff]   ;;  %v6530_v58 = vld [vmem:[#allocation7 + $0x398] ss:$20 sps:$4 sm:$0xff]   ;;  %vm418_vm1 = vmand %vm416_vm15, %vm417_vm0  ;;  %vm430_vm3 = vsmask.f32 7938 }
  0xf9   : > { %3372 = vmatprep.subr.bf16.mxu0 %v6458_v56  ;;  %v6517_v56 = vld [vmem:[#allocation7 + $0x1ec] ss:$20 sps:$4 sm:$0xff]   ;;  %v6529_v3 = vld [vmem:[#allocation7 + $0x23c] ss:$20 sps:$4 sm:$0xff]   ;;  %vm431_vm4 = vmand %vm429_vm2, %vm430_vm3  ;;  %vm436_vm6 = vsmask.f32 256 }
  0xfa   : > { %3611 = vmatpush1.bf16.msra.mxu1 %v6448_v5  ;;  %v6533_v12 = vld [vmem:[#allocation7 + $0x260] ss:$20 sps:$4 sm:$0xff]   ;;  %v6554_v14 = vld [vmem:[#allocation7 + $0x438] ss:$20 sps:$4 sm:$0xff]   ;;  %vm437_vm7 = vmand %vm435_vm5, %vm436_vm6  ;;  %vm445_vm8 = vsmask.f32 7424 }
  0xfb   : > { %3612 = vmatprep.subr.bf16.mxu1 %v6456_v6  ;;  %v6550_v6 = vld [vmem:[#allocation7 + $0x414] ss:$20 sps:$4 sm:$0xff]   ;;  %v6575_v47 = vld [vmem:[#allocation7 + $0x378] ss:$20 sps:$4 sm:$0xff]   ;;  %vm446_vm9 = vmand %vm429_vm2, %vm445_vm8  ;;  %vm451_vm11 = vsmask.f32 7966 }
  0xfc   : > { %3373 = vmatpush1.bf16.msra.mxu0 %v6463_v57  ;;  %v413_v57 = vld [vmem:[#allocation2 + $0x10] sm:$0xfe]  ;;  %vm452_vm12 = vmand %vm450_vm10, %vm451_vm11  ;;  %vm464_vm13 = vcmask 1046528   ;;  %vm470_vm0 = vcmask 1047558   ;;  %vm7478_vm3 = vmmov 0   ;;  %s6005_s29 = sshll.u32 %s7543_s30, 8 }
  0xfd   : > { %3374 = vmatprep.subr.bf16.mxu0 %v6464_v60  ;;  %v414_v59 = vsel %vm412_vm14, %v408_v53, %v413_v57  ;;  %v6538_v60 = vld [vmem:[#allocation7 + $0x3c4] ss:$20 sps:$4 sm:$0xff]   ;;  %v6587_v57 = vld [vmem:[#allocation7 + $0x3c8] ss:$20 sps:$4 sm:$0xff]   ;;  %vm465_vm14 = vsmask.f32 6400  ;;  %s7943_s21 = scalar_lea.hbm %s7996_s7, %s6005_s29 }
  0xfe   : > { %3613 = vmatpush1.bf16.msra.mxu1 %v6454_v9  ;;  %415 = vst [vmem:[#allocation2 + $0x10] sm:$0xfe] %v414_v59  ;;  %v6535_v9 = vld [vmem:[#allocation7 + $0x264] ss:$20 sps:$4 sm:$0xff]   ;;  %v6608_v59 = vld [vmem:[#allocation7 + $0x5a0] ss:$20 sps:$4 sm:$0xff]   ;;  %vm466_vm15 = vmand %vm464_vm13, %vm465_vm14 }
  0xff   : > { %3614 = vmatprep.subr.bf16.mxu1 %v6462_v10  ;;  %v6548_v10 = vld [vmem:[#allocation7 + $0x410] ss:$20 sps:$4 sm:$0xff]   ;;  %s5285_s18 = sshll.u32 %s375_s8, 4  ;;  %s5272_s15 = scalar_lea.sflag [#allocation6], %s7773_s17  ;;  %s7945_s18 = int_to_ptr.vmem [resolvable:$true] %s5285_s18 }
 0x100   : > { %3375 = vmatpush1.bf16.msra.mxu0 %v6469_v2  ;;  %v6521_v2 = vld [vmem:[#allocation7 + $0x210] ss:$20 sps:$4 sm:$0xff]   ;;  %s7383_s16 = scalar_lea.vmem %s7945_s18, 256  ;;  %p8016_p5 = scmp.ne.s32.totalorder %s8006_s9, 0 }
 0x101   : > { %3376 = vmatprep.subr.bf16.mxu0 %v6470_v4  ;;  %v6542_v4 = vld [vmem:[#allocation7 + $0x3e8] ss:$20 sps:$4 sm:$0xff]   ;;  %p7384_p6 = scmp.ne.s32.totalorder %s7945_s18, %s7383_s16  ;;  %s7479_s30 = smov [#allocation16]  }
 0x102   : > { %3615 = vmatpush1.bf16.msra.mxu1 %v6460_v15  ;;  %v6562_v15 = vld [vmem:[#allocation7 + $0x464] ss:$20 sps:$4 sm:$0xff]   ;;  %s7387_s13 = sshll.u32 %s7479_s30, 4  ;;  %s7388_s13 = int_to_ptr.vmem [resolvable:$false] %s7387_s13 }
 0x103   : > { %3616 = vmatprep.subr.bf16.mxu1 %v6468_v16  ;;  %v6539_v16 = vld [vmem:[#allocation7 + $0x288] ss:$20 sps:$4 sm:$0xff]   ;;  %p7385_p10 = pnand %p7384_p6, %p8016_p5  ;;  %s7389_s22 = scalar_lea.vmem %s7388_s13, 512 }
 0x104   : > { %3377 = vmatpush1.bf16.msra.mxu0 %v6475_v7  ;;  %p7390_p11 = scmp.lt.s32.totalorder %s7945_s18, %s7388_s13  ;;  %p7391_p12 = scmp.lt.s32.totalorder %s7389_s22, %s7383_s16 }
 0x105   : > { %3378 = vmatprep.subr.bf16.mxu0 %v6476_v8  ;;  %v419_v5 = vld [vmem:[#allocation2 + $0x10] sm:$0x3]  ;;  %v6527_v8 = vld [vmem:[#allocation7 + $0x238] ss:$20 sps:$4 sm:$0xff]   ;;  %p7386_p1 = pneg %p7385_p10 }
 0x106   : > { %3617 = vmatpush1.bf16.msra.mxu1 %v6466_v19  ;;  %v420_v7 = vsel %vm418_vm1, 0, %v419_v5  ;;  %v6568_v19 = vld [vmem:[#allocation7 + $0x48c] ss:$20 sps:$4 sm:$0xff]   ;;  %v6607_v5 = vld [vmem:[#allocation7 + $0x444] ss:$20 sps:$4 sm:$0xff]   ;;  %p7392_p13 = por %p7391_p12, %p7390_p11 }
 0x107   : > { %3618 = vmatprep.subr.bf16.mxu1 %v6474_v20  ;;  %421 = vst [vmem:[#allocation2 + $0x10] sm:$0x3] %v420_v7  ;;  %v6545_v20 = vld [vmem:[#allocation7 + $0x2b0] ss:$20 sps:$4 sm:$0xff]   ;;  %vm471_vm1 = vsmask.f32 7962 }
 0x108   : > { %3379 = vmatpush1.bf16.msra.mxu0 %v6481_v11  ;;  %v6556_v11 = vld [vmem:[#allocation7 + $0x43c] ss:$20 sps:$4 sm:$0xff]   ;;  %vm472_vm2 = vmand %vm470_vm0, %vm471_vm1  ;;  %p7393_p8 = pnand %p7392_p13, %p7386_p1 }
 0x109   : > { %3380 = vmatprep.subr.bf16.mxu0 %v6482_v13  ;;  %v6541_v13 = vld [vmem:[#allocation7 + $0x28c] ss:$20 sps:$4 sm:$0xff]   ;;  %v6628_v7 = vld [vmem:[#allocation7 + $0x61c] ss:$20 sps:$4 sm:$0xff]  }
 0x10a   : > { %3619 = vmatpush1.bf16.msra.mxu1 %v6472_v24  ;;  %v6574_v24 = vld [vmem:[#allocation7 + $0x4b4] ss:$20 sps:$4 sm:$0xff]  }
 0x10b   : > { %3620 = vmatprep.subr.bf16.mxu1 %v6480_v25  ;;  %v6551_v25 = vld [vmem:[#allocation7 + $0x2d8] ss:$20 sps:$4 sm:$0xff]  }
 0x10c   : > { %3381 = vmatpush1.bf16.msra.mxu0 %v6487_v17  ;;  %v6547_v17 = vld [vmem:[#allocation7 + $0x2b4] ss:$20 sps:$4 sm:$0xff]  }
 0x10d   : > { %3393 = vmatprep.subr.bf16.mxu0 %v6490_v18  ;;  %v6560_v18 = vld [vmem:[#allocation7 + $0x460] ss:$20 sps:$4 sm:$0xff]  }
 0x10e   : > { %3621 = vmatpush1.bf16.msra.mxu1 %v6478_v28  ;;  %v6557_v28 = vld [vmem:[#allocation7 + $0x300] ss:$20 sps:$4 sm:$0xff]  }
 0x10f   : > { %3383 = vmatmul.mubr.bf16.vlgmr.msra.gmra.mrb[0].mxu0 %v7821_v22  ;;  %3622 = vmatprep.subr.bf16.mxu1 %v6486_v30  ;;  %v6565_v30 = vld [vmem:[#allocation7 + $0x32c] ss:$20 sps:$4 sm:$0xff]  }
 0x110   : > { %3394 = vmatpush1.bf16.msra.mxu0 %v6488_v21  ;;  %3425 = vmatprep.mubr.bf16.mxu0 %v7826_v52  ;;  %v6553_v21 = vld [vmem:[#allocation7 + $0x2dc] ss:$20 sps:$4 sm:$0xff]  }
 0x111   : > { %3395 = vmatprep.subr.bf16.mxu0 %v6496_v23  ;;  %v6566_v23 = vld [vmem:[#allocation7 + $0x488] ss:$20 sps:$4 sm:$0xff]  }
 0x112   : > { %3623 = vmatpush1.bf16.msra.mxu1 %v6484_v33  ;;  %v6563_v33 = vld [vmem:[#allocation7 + $0x328] ss:$20 sps:$4 sm:$0xff]  }
 0x113   : > { %3624 = vmatprep.subr.bf16.mxu1 %v6493_v36  ;;  %v6571_v36 = vld [vmem:[#allocation7 + $0x354] ss:$20 sps:$4 sm:$0xff]  }
 0x114   : > { %3396 = vmatpush1.bf16.msra.mxu0 %v6494_v26  ;;  %v6559_v26 = vld [vmem:[#allocation7 + $0x304] ss:$20 sps:$4 sm:$0xff]  }
 0x115   : > { %3397 = vmatprep.subr.bf16.mxu0 %v6502_v27  ;;  %v6572_v27 = vld [vmem:[#allocation7 + $0x4b0] ss:$20 sps:$4 sm:$0xff]  }
 0x116   : > { %3625 = vmatpush1.bf16.msra.mxu1 %v6491_v39  ;;  %v6592_v39 = vld [vmem:[#allocation7 + $0x52c] ss:$20 sps:$4 sm:$0xff]  }
 0x117   : > { %3626 = vmatprep.subr.bf16.mxu1 %v6499_v40  ;;  %v426_v40 = vrot.slane %v7807_v34, 7 }
 0x118   : > { %3398 = vmatpush1.bf16.msra.mxu0 %v6500_v31  ;;  %v6578_v31 = vld [vmem:[#allocation7 + $0x4d8] ss:$20 sps:$4 sm:$0xff]  }
 0x119   : > { %3399 = vmatprep.subr.bf16.mxu0 %v6508_v32  ;;  %v6586_v32 = vld [vmem:[#allocation7 + $0x504] ss:$20 sps:$4 sm:$0xff]   ;;  %v427_v46 = vor.u32 %v426_v40, %v7810_v35  ;;  %v6662_v40 = vld [vmem:[#allocation7 + $0x708] ss:$20 sps:$4 sm:$0xff]  }
 0x11a   : > { %3627 = vmatpush1.bf16.msra.mxu1 %v6497_v43  ;;  %v6590_v43 = vld [vmem:[#allocation7 + $0x528] ss:$20 sps:$4 sm:$0xff]  }
 0x11b   : > { %3628 = vmatprep.subr.bf16.mxu1 %v6505_v44  ;;  %v7835_v44 = vld [vmem:[#allocation2 + $0x28] sm:$0xff] }
 0x11c   : > { %3400 = vmatpush1.bf16.msra.mxu0 %v6506_v37  ;;  %v6584_v37 = vld [vmem:[#allocation7 + $0x500] ss:$20 sps:$4 sm:$0xff]  }
 0x11d   : > { %3401 = vmatprep.subr.bf16.mxu0 %v6514_v38  ;;  %v7831_v38 = vld [vmem:[#allocation2 + $0x10] sm:$0xff] }
 0x11e   : > { %3629 = vmatpush1.bf16.msra.mxu1 %v6503_v49  ;;  %v456_v49 = vrot.slane %v7804_v29, 1  ;;  %v6595_v29 = vld [vmem:[#allocation7 + $0x3f4] ss:$20 sps:$4 sm:$0xff]  }
 0x11f   : > { %3630 = vmatprep.subr.bf16.mxu1 %v6511_v50  ;;  %v6596_v50 = vld [vmem:[#allocation7 + $0x550] ss:$20 sps:$4 sm:$0xff]  }
 0x120   : > { %3402 = vmatpush1.bf16.msra.mxu0 %v6512_v41  ;;  %v6569_v41 = vld [vmem:[#allocation7 + $0x350] ss:$20 sps:$4 sm:$0xff]   ;;  %458 = vst [vmem:[#allocation2 + $0x38] sm:$0x7f] %v456_v49  ;;  %v6674_v49 = vld [vmem:[#allocation7 + $0x758] ss:$20 sps:$4 sm:$0xff]  }
 0x121   : > { %3403 = vmatprep.subr.bf16.mxu0 %v6520_v42  ;;  %v6577_v42 = vld [vmem:[#allocation7 + $0x37c] ss:$20 sps:$4 sm:$0xff]  }
 0x122   : > { %3631 = vmatpush1.bf16.msra.mxu1 %v6509_v55  ;;  %v6589_v55 = vld [vmem:[#allocation7 + $0x3cc] ss:$20 sps:$4 sm:$0xff]  }
 0x123   : > { %3632 = vmatprep.subr.bf16.mxu1 %v6517_v56  ;;  %v6602_v56 = vld [vmem:[#allocation7 + $0x578] ss:$20 sps:$4 sm:$0xff]  }
 0x124   : > { %3404 = vmatpush1.bf16.msra.mxu0 %v6518_v45  ;;  %v6598_v45 = vld [vmem:[#allocation7 + $0x554] ss:$20 sps:$4 sm:$0xff]  }
 0x125   : > { %3405 = vmatprep.subr.bf16.mxu0 %v6526_v48  ;;  %v6583_v48 = vld [vmem:[#allocation7 + $0x3a4] ss:$20 sps:$4 sm:$0xff]  }
 0x126   : > { %3633 = vmatpush1.bf16.msra.mxu1 %v6515_v61 }
 0x127   : > { %3634 = vmatprep.subr.bf16.mxu1 %v6523_v62  ;;  %v6593_v62 = vld [vmem:[#allocation7 + $0x3f0] ss:$20 sps:$4 sm:$0xff]  }
 0x128   : > { %3406 = vmatpush1.bf16.msra.mxu0 %v6524_v51  ;;  %v432_v51 = vld [vmem:[#allocation2 + $0x20] sm:$0xff] }
 0x129   : > { %3407 = vmatprep.subr.bf16.mxu0 %v6532_v54  ;;  %v433_v53 = vsel %vm431_vm4, %v427_v46, %v432_v51  ;;  %v6581_v54 = vld [vmem:[#allocation7 + $0x3a0] ss:$20 sps:$4 sm:$0xff]   ;;  %v6668_v46 = vld [vmem:[#allocation7 + $0x730] ss:$20 sps:$4 sm:$0xff]  }
 0x12a   : > { %3635 = vmatpush1.bf16.msra.mxu1 %v6521_v2  ;;  %434 = vst [vmem:[#allocation2 + $0x20] sm:$0xff] %v433_v53  ;;  %v6614_v2 = vld [vmem:[#allocation7 + $0x5c8] ss:$20 sps:$4 sm:$0xff]  }
 0x12b   : > { %3636 = vmatprep.subr.bf16.mxu1 %v6529_v3  ;;  %v6622_v3 = vld [vmem:[#allocation7 + $0x5f4] ss:$20 sps:$4 sm:$0xff]  }
 0x12c   : > { %3408 = vmatpush1.bf16.msra.mxu0 %v6530_v58  ;;  %v6610_v58 = vld [vmem:[#allocation7 + $0x5a4] ss:$20 sps:$4 sm:$0xff]   ;;  %v6667_v53 = vld [vmem:[#allocation7 + $0x5d4] ss:$20 sps:$4 sm:$0xff]  }
 0x12d   : > { %3409 = vmatprep.subr.bf16.mxu0 %v6538_v60  ;;  %v6616_v60 = vld [vmem:[#allocation7 + $0x5cc] ss:$20 sps:$4 sm:$0xff]  }
 0x12e   : > { %3637 = vmatpush1.bf16.msra.mxu1 %v6527_v8  ;;  %v6605_v8 = vld [vmem:[#allocation7 + $0x440] ss:$20 sps:$4 sm:$0xff]  }
 0x12f   : > { %3638 = vmatprep.subr.bf16.mxu1 %v6535_v9  ;;  %v6613_v9 = vld [vmem:[#allocation7 + $0x46c] ss:$20 sps:$4 sm:$0xff]  }
 0x130   : > { %3410 = vmatpush1.bf16.msra.mxu0 %v6536_v63 }
 0x131   : > { %3411 = vmatprep.subr.bf16.mxu0 %v6544_v1  ;;  %v438_v61 = vld [vmem:[#allocation2 + $0x20] sm:$0x1]  ;;  %v6601_v1 = vld [vmem:[#allocation7 + $0x41c] ss:$20 sps:$4 sm:$0xff]  }
 0x132   : > { %3639 = vmatpush1.bf16.msra.mxu1 %v6533_v12  ;;  %v439_v63 = vsel %vm437_vm7, 0, %v438_v61  ;;  %v6611_v12 = vld [vmem:[#allocation7 + $0x468] ss:$20 sps:$4 sm:$0xff]  }
 0x133   : > { %3651 = vmatprep.subr.bf16.mxu1 %v6541_v13  ;;  %440 = vst [vmem:[#allocation2 + $0x20] sm:$0x1] %v439_v63  ;;  %v6619_v13 = vld [vmem:[#allocation7 + $0x494] ss:$20 sps:$4 sm:$0xff]   ;;  %v7172_v63 = vld [vmem:[#allocation2 + $0x28] sm:$0xff] }
 0x134   : > { %3412 = vmatpush1.bf16.msra.mxu0 %v6542_v4  ;;  %v6599_v4 = vld [vmem:[#allocation7 + $0x418] ss:$20 sps:$4 sm:$0xff]   ;;  %v6694_v61 = vld [vmem:[#allocation7 + $0x7d4] ss:$20 sps:$4 sm:$0xff]  }
 0x135   : > { %3413 = vmatprep.subr.bf16.mxu0 %v6550_v6  ;;  %3641 = vmatmul.mubr.bf16.vlgmr.msra.gmra.mrb[4].mxu1 %v7821_v22  ;;  %v6580_v22 = vld [vmem:[#allocation7 + $0x4dc] ss:$20 sps:$4 sm:$0xff]  }
 0x136   : > { %3652 = vmatpush1.bf16.msra.mxu1 %v6539_v16  ;;  %3683 = vmatprep.mubr.bf16.mxu1 %v7826_v52  ;;  %v6604_v52 = vld [vmem:[#allocation7 + $0x57c] ss:$20 sps:$4 sm:$0xff]  }
 0x137   : > { %3653 = vmatprep.subr.bf16.mxu1 %v6547_v17  ;;  %v6620_v6 = vld [vmem:[#allocation7 + $0x5f0] ss:$20 sps:$4 sm:$0xff]  }
 0x138   : > { %3414 = vmatpush1.bf16.msra.mxu0 %v6548_v10  ;;  %v6626_v10 = vld [vmem:[#allocation7 + $0x618] ss:$20 sps:$4 sm:$0xff]   ;;  %v6617_v16 = vld [vmem:[#allocation7 + $0x490] ss:$20 sps:$4 sm:$0xff]  }
 0x139   : > { %3415 = vmatprep.subr.bf16.mxu0 %v6556_v11  ;;  %v6634_v11 = vld [vmem:[#allocation7 + $0x644] ss:$20 sps:$4 sm:$0xff]   ;;  %v6625_v17 = vld [vmem:[#allocation7 + $0x4bc] ss:$20 sps:$4 sm:$0xff]  }
 0x13a   : > { %3654 = vmatpush1.bf16.msra.mxu1 %v6545_v20  ;;  %v6623_v20 = vld [vmem:[#allocation7 + $0x4b8] ss:$20 sps:$4 sm:$0xff]  }
 0x13b   : > { %3655 = vmatprep.subr.bf16.mxu1 %v6553_v21  ;;  %v6631_v21 = vld [vmem:[#allocation7 + $0x4e4] ss:$20 sps:$4 sm:$0xff]  }
 0x13c   : > { %3416 = vmatpush1.bf16.msra.mxu0 %v6554_v14  ;;  %v6632_v14 = vld [vmem:[#allocation7 + $0x640] ss:$20 sps:$4 sm:$0xff]  }
 0x13d   : > { %3417 = vmatprep.subr.bf16.mxu0 %v6562_v15  ;;  %v6640_v15 = vld [vmem:[#allocation7 + $0x66c] ss:$20 sps:$4 sm:$0xff]  }
 0x13e   : > { %3656 = vmatpush1.bf16.msra.mxu1 %v6551_v25  ;;  %v6629_v25 = vld [vmem:[#allocation7 + $0x4e0] ss:$20 sps:$4 sm:$0xff]  }
 0x13f   : > { %3657 = vmatprep.subr.bf16.mxu1 %v6559_v26  ;;  %v6637_v26 = vld [vmem:[#allocation7 + $0x50c] ss:$20 sps:$4 sm:$0xff]  }
 0x140   : > { %3418 = vmatpush1.bf16.msra.mxu0 %v6560_v18  ;;  %v6638_v18 = vld [vmem:[#allocation7 + $0x668] ss:$20 sps:$4 sm:$0xff]  }
 0x141   : > { %3419 = vmatprep.subr.bf16.mxu0 %v6568_v19  ;;  %v6646_v19 = vld [vmem:[#allocation7 + $0x694] ss:$20 sps:$4 sm:$0xff]  }
 0x142   : > { %3658 = vmatpush1.bf16.msra.mxu1 %v6557_v28  ;;  %v442_v28 = vrot.slane %v7810_v35, 1 }
 0x143   : > { %3659 = vmatprep.subr.bf16.mxu1 %v6565_v30  ;;  %v6635_v30 = vld [vmem:[#allocation7 + $0x508] ss:$20 sps:$4 sm:$0xff]  }
 0x144   : > { %3420 = vmatpush1.bf16.msra.mxu0 %v6566_v23  ;;  %v6644_v23 = vld [vmem:[#allocation7 + $0x690] ss:$20 sps:$4 sm:$0xff]  }
 0x145   : > { %3421 = vmatprep.subr.bf16.mxu0 %v6574_v24  ;;  %v6652_v24 = vld [vmem:[#allocation7 + $0x6bc] ss:$20 sps:$4 sm:$0xff]  }
 0x146   : > { %3660 = vmatpush1.bf16.msra.mxu1 %v6563_v33  ;;  %v6664_v33 = vld [vmem:[#allocation7 + $0x70c] ss:$20 sps:$4 sm:$0xff]  }
 0x147   : > { %3661 = vmatprep.subr.bf16.mxu1 %v6571_v36  ;;  %v443_v36 = vor.u32 %v442_v28, %v7807_v34  ;;  %v6707_v28 = vld [vmem:[#allocation7 + $0x6e8] ss:$20 sps:$4 sm:$0xff]  }
 0x148   : > { %3422 = vmatpush1.bf16.msra.mxu0 %v6572_v27  ;;  %v6650_v27 = vld [vmem:[#allocation7 + $0x6b8] ss:$20 sps:$4 sm:$0xff]  }
 0x149   : > { %3423 = vmatprep.subr.bf16.mxu0 %v6580_v22  ;;  %v6658_v22 = vld [vmem:[#allocation7 + $0x6e4] ss:$20 sps:$4 sm:$0xff]  }
 0x14a   : > { %3662 = vmatpush1.bf16.msra.mxu1 %v6569_v41  ;;  %v447_v41 = vld [vmem:[#allocation2 + $0x30] sm:$0xff] }
 0x14b   : > { %3663 = vmatprep.subr.bf16.mxu1 %v6577_v42  ;;  %v6670_v42 = vld [vmem:[#allocation7 + $0x734] ss:$20 sps:$4 sm:$0xff]  }
 0x14c   : > { %3424 = vmatpush1.bf16.msra.mxu0 %v6578_v31  ;;  %v6643_v31 = vld [vmem:[#allocation7 + $0x534] ss:$20 sps:$4 sm:$0xff]  }
 0x14d   : > { %3436 = vmatprep.subr.bf16.mxu0 %v6586_v32  ;;  %v6656_v32 = vld [vmem:[#allocation7 + $0x6e0] ss:$20 sps:$4 sm:$0xff]  }
 0x14e   : > { %3664 = vmatpush1.bf16.msra.mxu1 %v6575_v47  ;;  %v6653_v47 = vld [vmem:[#allocation7 + $0x580] ss:$20 sps:$4 sm:$0xff]  }
 0x14f   : > { %3426 = vmatmul.mubr.bf16.vlgmr.msra.gmra.mrb[0].mxu0 %v7831_v38  ;;  %3665 = vmatprep.subr.bf16.mxu1 %v6583_v48  ;;  %v6661_v48 = vld [vmem:[#allocation7 + $0x5ac] ss:$20 sps:$4 sm:$0xff]  }
 0x150   : > { %3437 = vmatpush1.bf16.msra.mxu0 %v6584_v37  ;;  %3468 = vmatprep.mubr.bf16.mxu0 %v7835_v44  ;;  %v6641_v37 = vld [vmem:[#allocation7 + $0x530] ss:$20 sps:$4 sm:$0xff]  }
 0x151   : > { %3438 = vmatprep.subr.bf16.mxu0 %v6592_v39  ;;  %v6649_v39 = vld [vmem:[#allocation7 + $0x55c] ss:$20 sps:$4 sm:$0xff]  }
 0x152   : > { %3666 = vmatpush1.bf16.msra.mxu1 %v6581_v54 }
 0x153   : > { %3667 = vmatprep.subr.bf16.mxu1 %v6589_v55  ;;  %v6680_v55 = vld [vmem:[#allocation7 + $0x780] ss:$20 sps:$4 sm:$0xff]  }
 0x154   : > { %3439 = vmatpush1.bf16.msra.mxu0 %v6590_v43  ;;  %v448_v43 = vsel %vm446_vm9, %v443_v36, %v447_v41  ;;  %v6721_v36 = vld [vmem:[#allocation7 + $0x73c] ss:$20 sps:$4 sm:$0xff]   ;;  %v6727_v41 = vld [vmem:[#allocation7 + $0x764] ss:$20 sps:$4 sm:$0xff]  }
 0x155   : > { %3440 = vmatprep.subr.bf16.mxu0 %v6598_v45  ;;  %449 = vst [vmem:[#allocation2 + $0x30] sm:$0xff] %v448_v43  ;;  %v6655_v45 = vld [vmem:[#allocation7 + $0x584] ss:$20 sps:$4 sm:$0xff]   ;;  %v6725_v43 = vld [vmem:[#allocation7 + $0x760] ss:$20 sps:$4 sm:$0xff]  }
 0x156   : > { %3668 = vmatpush1.bf16.msra.mxu1 %v6587_v57  ;;  %v6688_v57 = vld [vmem:[#allocation7 + $0x7ac] ss:$20 sps:$4 sm:$0xff]  }
 0x157   : > { %3669 = vmatprep.subr.bf16.mxu1 %v6595_v29  ;;  %v6665_v29 = vld [vmem:[#allocation7 + $0x5d0] ss:$20 sps:$4 sm:$0xff]  }
 0x158   : > { %3441 = vmatpush1.bf16.msra.mxu0 %v6596_v50  ;;  %v6682_v50 = vld [vmem:[#allocation7 + $0x784] ss:$20 sps:$4 sm:$0xff]  }
 0x159   : > { %3442 = vmatprep.subr.bf16.mxu0 %v6604_v52  ;;  %v6659_v52 = vld [vmem:[#allocation7 + $0x5a8] ss:$20 sps:$4 sm:$0xff]  }
 0x15a   : > { %3670 = vmatpush1.bf16.msra.mxu1 %v6593_v62  ;;  %v6671_v62 = vld [vmem:[#allocation7 + $0x5f8] ss:$20 sps:$4 sm:$0xff]  }
 0x15b   : > { %3671 = vmatprep.subr.bf16.mxu1 %v6601_v1  ;;  %v476_v1 = vrot.slane %v7172_v63, 2  ;;  %v6770_v63 = vld [vmem:[#allocation7 + $0x9d8] ss:$20 sps:$4 sm:$0xff]  }
 0x15c   : > { %3443 = vmatpush1.bf16.msra.mxu0 %v6602_v56  ;;  %v453_v51 = vld [vmem:[#allocation2 + $0x30] sm:$0x80]  ;;  %v7846_v56 = vld [vmem:[#allocation2 + $0x20] sm:$0xff] }
 0x15d   : > { %3444 = vmatprep.subr.bf16.mxu0 %v6610_v58  ;;  %v454_v54 = vsel %vm452_vm12, 0, %v453_v51  ;;  %v7848_v58 = vld [vmem:[#allocation2 + $0x38] sm:$0xff]  ;;  %478 = vst [vmem:[#allocation2 + $0x48] sm:$0x3f] %v476_v1  ;;  %v6755_v1 = vld [vmem:[#allocation7 + $0x828] ss:$20 sps:$4 sm:$0xff]  }
 0x15e   : > { %3672 = vmatpush1.bf16.msra.mxu1 %v6599_v4  ;;  %455 = vst [vmem:[#allocation2 + $0x30] sm:$0x80] %v454_v54  ;;  %v6700_v4 = vld [vmem:[#allocation7 + $0x7fc] ss:$20 sps:$4 sm:$0xff]   ;;  %v6752_v51 = vld [vmem:[#allocation7 + $0x960] ss:$20 sps:$4 sm:$0xff]  }
 0x15f   : > { %3673 = vmatprep.subr.bf16.mxu1 %v6607_v5  ;;  %v6677_v5 = vld [vmem:[#allocation7 + $0x620] ss:$20 sps:$4 sm:$0xff]   ;;  %v6745_v54 = vld [vmem:[#allocation7 + $0x7dc] ss:$20 sps:$4 sm:$0xff]  }
 0x160   : > { %3445 = vmatpush1.bf16.msra.mxu0 %v6608_v59  ;;  %v6673_v59 = vld [vmem:[#allocation7 + $0x5fc] ss:$20 sps:$4 sm:$0xff]  }
 0x161   : > { %3446 = vmatprep.subr.bf16.mxu0 %v6616_v60  ;;  %v6686_v60 = vld [vmem:[#allocation7 + $0x7a8] ss:$20 sps:$4 sm:$0xff]  }
 0x162   : > { %3674 = vmatpush1.bf16.msra.mxu1 %v6605_v8  ;;  %v6706_v8 = vld [vmem:[#allocation7 + $0x824] ss:$20 sps:$4 sm:$0xff]  }
 0x163   : > { %3675 = vmatprep.subr.bf16.mxu1 %v6613_v9  ;;  %v6683_v9 = vld [vmem:[#allocation7 + $0x648] ss:$20 sps:$4 sm:$0xff]  }
 0x164   : > { %3447 = vmatpush1.bf16.msra.mxu0 %v6614_v2  ;;  %v6679_v2 = vld [vmem:[#allocation7 + $0x624] ss:$20 sps:$4 sm:$0xff]  }
 0x165   : > { %3448 = vmatprep.subr.bf16.mxu0 %v6622_v3  ;;  %v6692_v3 = vld [vmem:[#allocation7 + $0x7d0] ss:$20 sps:$4 sm:$0xff]  }
 0x166   : > { %3676 = vmatpush1.bf16.msra.mxu1 %v6611_v12  ;;  %v6712_v12 = vld [vmem:[#allocation7 + $0x84c] ss:$20 sps:$4 sm:$0xff]  }
 0x167   : > { %3677 = vmatprep.subr.bf16.mxu1 %v6619_v13  ;;  %v6689_v13 = vld [vmem:[#allocation7 + $0x670] ss:$20 sps:$4 sm:$0xff]  }
 0x168   : > { %3449 = vmatpush1.bf16.msra.mxu0 %v6620_v6  ;;  %v6685_v6 = vld [vmem:[#allocation7 + $0x64c] ss:$20 sps:$4 sm:$0xff]  }
 0x169   : > { %3450 = vmatprep.subr.bf16.mxu0 %v6628_v7  ;;  %v6698_v7 = vld [vmem:[#allocation7 + $0x7f8] ss:$20 sps:$4 sm:$0xff]  }
 0x16a   : > { %3678 = vmatpush1.bf16.msra.mxu1 %v6617_v16  ;;  %v6718_v16 = vld [vmem:[#allocation7 + $0x874] ss:$20 sps:$4 sm:$0xff]  }
 0x16b   : > { %3679 = vmatprep.subr.bf16.mxu1 %v6625_v17  ;;  %v6695_v17 = vld [vmem:[#allocation7 + $0x698] ss:$20 sps:$4 sm:$0xff]  }
 0x16c   : > { %3451 = vmatpush1.bf16.msra.mxu0 %v6626_v10  ;;  %v6691_v10 = vld [vmem:[#allocation7 + $0x674] ss:$20 sps:$4 sm:$0xff]  }
 0x16d   : > { %3452 = vmatprep.subr.bf16.mxu0 %v6634_v11  ;;  %v6704_v11 = vld [vmem:[#allocation7 + $0x820] ss:$20 sps:$4 sm:$0xff]  }
 0x16e   : > { %3680 = vmatpush1.bf16.msra.mxu1 %v6623_v20  ;;  %v461_v20 = vrot.slane %v7810_v35, 2  ;;  %v6715_v35 = vld [vmem:[#allocation7 + $0x714] ss:$20 sps:$4 sm:$0xff]  }
 0x16f   : > { %3681 = vmatprep.subr.bf16.mxu1 %v6631_v21  ;;  %v6716_v21 = vld [vmem:[#allocation7 + $0x870] ss:$20 sps:$4 sm:$0xff]  }
 0x170   : > { %3453 = vmatpush1.bf16.msra.mxu0 %v6632_v14  ;;  %v6697_v14 = vld [vmem:[#allocation7 + $0x69c] ss:$20 sps:$4 sm:$0xff]  }
 0x171   : > { %3454 = vmatprep.subr.bf16.mxu0 %v6640_v15  ;;  %v6710_v15 = vld [vmem:[#allocation7 + $0x848] ss:$20 sps:$4 sm:$0xff]  }
 0x172   : > { %3682 = vmatpush1.bf16.msra.mxu1 %v6629_v25  ;;  %v6709_v25 = vld [vmem:[#allocation7 + $0x6ec] ss:$20 sps:$4 sm:$0xff]  }
 0x173   : > { %3694 = vmatprep.subr.bf16.mxu1 %v6637_v26 }
 0x174   : > { %3455 = vmatpush1.bf16.msra.mxu0 %v6638_v18  ;;  %v6703_v18 = vld [vmem:[#allocation7 + $0x6c4] ss:$20 sps:$4 sm:$0xff]  }
 0x175   : > { %3456 = vmatprep.subr.bf16.mxu0 %v6646_v19  ;;  %3684 = vmatmul.mubr.bf16.vlgmr.msra.gmra.mrb[4].mxu1 %v7831_v38  ;;  %v6647_v38 = vld [vmem:[#allocation7 + $0x558] ss:$20 sps:$4 sm:$0xff]   ;;  %v460_v19 = vrot.slane %v7807_v34, 1 }
 0x176   : > { %3695 = vmatpush1.bf16.msra.mxu1 %v6635_v30  ;;  %3726 = vmatprep.mubr.bf16.mxu1 %v7835_v44  ;;  %v6676_v44 = vld [vmem:[#allocation7 + $0x75c] ss:$20 sps:$4 sm:$0xff]  }
 0x177   : > { %3696 = vmatprep.subr.bf16.mxu1 %v6643_v31  ;;  %v462_v26 = vor.u32 %v461_v20, %v460_v19  ;;  %v467_v34 = vld [vmem:[#allocation2 + $0x40] sm:$0x7f]  ;;  %v6728_v31 = vld [vmem:[#allocation7 + $0x8c0] ss:$20 sps:$4 sm:$0xff]  }
 0x178   : > { %3457 = vmatpush1.bf16.msra.mxu0 %v6644_v23  ;;  %v6701_v23 = vld [vmem:[#allocation7 + $0x6c0] ss:$20 sps:$4 sm:$0xff]  }
 0x179   : > { %3458 = vmatprep.subr.bf16.mxu0 %v6652_v24  ;;  %v6724_v24 = vld [vmem:[#allocation7 + $0x89c] ss:$20 sps:$4 sm:$0xff]   ;;  %v468_v30 = vsel %vm466_vm15, %v462_v26, %v467_v34  ;;  %v6773_v19 = vld [vmem:[#allocation7 + $0x8a0] ss:$20 sps:$4 sm:$0xff]  }
 0x17a   : > { %3697 = vmatpush1.bf16.msra.mxu1 %v6641_v37  ;;  %469 = vst [vmem:[#allocation2 + $0x40] sm:$0x7f] %v468_v30  ;;  %v6734_v37 = vld [vmem:[#allocation7 + $0x8e8] ss:$20 sps:$4 sm:$0xff]   ;;  %v6781_v20 = vld [vmem:[#allocation7 + $0x8cc] ss:$20 sps:$4 sm:$0xff]  }
 0x17b   : > { %3698 = vmatprep.subr.bf16.mxu1 %v6649_v39  ;;  %v6742_v39 = vld [vmem:[#allocation7 + $0x914] ss:$20 sps:$4 sm:$0xff]   ;;  %v6791_v30 = vld [vmem:[#allocation7 + $0x918] ss:$20 sps:$4 sm:$0xff]  }
 0x17c   : > { %3459 = vmatpush1.bf16.msra.mxu0 %v6650_v27  ;;  %v6722_v27 = vld [vmem:[#allocation7 + $0x898] ss:$20 sps:$4 sm:$0xff]   ;;  %v6800_v26 = vld [vmem:[#allocation7 + $0xaa0] ss:$20 sps:$4 sm:$0xff]   ;;  %v6806_v34 = vld [vmem:[#allocation7 + $0xac8] ss:$20 sps:$4 sm:$0xff]  }
 0x17d   : > { %3460 = vmatprep.subr.bf16.mxu0 %v6658_v22  ;;  %v6730_v22 = vld [vmem:[#allocation7 + $0x8c4] ss:$20 sps:$4 sm:$0xff]  }
 0x17e   : > { %3699 = vmatpush1.bf16.msra.mxu1 %v6647_v38  ;;  %v6740_v38 = vld [vmem:[#allocation7 + $0x910] ss:$20 sps:$4 sm:$0xff]  }
 0x17f   : > { %3700 = vmatprep.subr.bf16.mxu1 %v6655_v45  ;;  %v6748_v45 = vld [vmem:[#allocation7 + $0x93c] ss:$20 sps:$4 sm:$0xff]  }
 0x180   : > { %3461 = vmatpush1.bf16.msra.mxu0 %v6656_v32  ;;  %v6713_v32 = vld [vmem:[#allocation7 + $0x710] ss:$20 sps:$4 sm:$0xff]  }
 0x181   : > { %3462 = vmatprep.subr.bf16.mxu0 %v6664_v33  ;;  %v6736_v33 = vld [vmem:[#allocation7 + $0x8ec] ss:$20 sps:$4 sm:$0xff]  }
 0x182   : > { %3701 = vmatpush1.bf16.msra.mxu1 %v6653_v47  ;;  %v6746_v47 = vld [vmem:[#allocation7 + $0x938] ss:$20 sps:$4 sm:$0xff]  }
 0x183   : > { %3702 = vmatprep.subr.bf16.mxu1 %v6661_v48  ;;  %v6754_v48 = vld [vmem:[#allocation7 + $0x964] ss:$20 sps:$4 sm:$0xff]  }
 0x184   : > { %3463 = vmatpush1.bf16.msra.mxu0 %v6662_v40  ;;  %v6719_v40 = vld [vmem:[#allocation7 + $0x738] ss:$20 sps:$4 sm:$0xff]  }
 0x185   : > { %3464 = vmatprep.subr.bf16.mxu0 %v6670_v42  ;;  %v473_v42 = vld [vmem:[#allocation2 + $0x40] sm:$0xc0] }
 0x186   : > { %3703 = vmatpush1.bf16.msra.mxu1 %v6659_v52  ;;  %v6760_v52 = vld [vmem:[#allocation7 + $0x98c] ss:$20 sps:$4 sm:$0xff]  }
 0x187   : > { %3704 = vmatprep.subr.bf16.mxu1 %v6667_v53  ;;  %v6737_v53 = vld [vmem:[#allocation7 + $0x7b0] ss:$20 sps:$4 sm:$0xff]  }
 0x188   : > { %3465 = vmatpush1.bf16.msra.mxu0 %v6668_v46  ;;  %v474_v46 = vsel %vm472_vm2, 0, %v473_v42  ;;  %v6811_v42 = vld [vmem:[#allocation7 + $0x994] ss:$20 sps:$4 sm:$0xff]  }
 0x189   : > { %3466 = vmatprep.subr.bf16.mxu0 %v6676_v44  ;;  %475 = vst [vmem:[#allocation2 + $0x40] sm:$0xc0] %v474_v46  ;;  %v6733_v44 = vld [vmem:[#allocation7 + $0x78c] ss:$20 sps:$4 sm:$0xff]   ;;  %v6817_v46 = vld [vmem:[#allocation7 + $0x9bc] ss:$20 sps:$4 sm:$0xff]  }
 0x18a   : > { %3705 = vmatpush1.bf16.msra.mxu1 %v6665_v29  ;;  %v6743_v29 = vld [vmem:[#allocation7 + $0x7d8] ss:$20 sps:$4 sm:$0xff]  }
 0x18b   : > { %3706 = vmatprep.subr.bf16.mxu1 %v6673_v59  ;;  %v6751_v59 = vld [vmem:[#allocation7 + $0x804] ss:$20 sps:$4 sm:$0xff]  }
 0x18c   : > { %3467 = vmatpush1.bf16.msra.mxu0 %v6674_v49  ;;  %v6731_v49 = vld [vmem:[#allocation7 + $0x788] ss:$20 sps:$4 sm:$0xff]  }
 0x18d   : > { %3479 = vmatprep.subr.bf16.mxu0 %v6682_v50  ;;  %v6739_v50 = vld [vmem:[#allocation7 + $0x7b4] ss:$20 sps:$4 sm:$0xff]  }
 0x18e   : > { %3707 = vmatpush1.bf16.msra.mxu1 %v6671_v62  ;;  %v6757_v62 = vld [vmem:[#allocation7 + $0x82c] ss:$20 sps:$4 sm:$0xff]  }
 0x18f   : > { %3469 = vmatmul.mubr.bf16.vlgmr.msra.gmra.mrb[0].mxu0 %v7846_v56  ;;  %3708 = vmatprep.subr.bf16.mxu1 %v6679_v2  ;;  %v6763_v2 = vld [vmem:[#allocation7 + $0x854] ss:$20 sps:$4 sm:$0xff]  }
 0x190   : > { %3480 = vmatpush1.bf16.msra.mxu0 %v6680_v55  ;;  %3511 = vmatprep.mubr.bf16.mxu0 %v7848_v58  ;;  %v6758_v55 = vld [vmem:[#allocation7 + $0x988] ss:$20 sps:$4 sm:$0xff]  }
 0x191   : > { %3481 = vmatprep.subr.bf16.mxu0 %v6688_v57  ;;  %v6766_v57 = vld [vmem:[#allocation7 + $0x9b4] ss:$20 sps:$4 sm:$0xff]  }
 0x192   : > { %3709 = vmatpush1.bf16.msra.mxu1 %v6677_v5  ;;  %v6784_v5 = vld [vmem:[#allocation7 + $0xa2c] ss:$20 sps:$4 sm:$0xff]  }
 0x193   : > { %3710 = vmatprep.subr.bf16.mxu1 %v6685_v6  ;;  %v7859_v6 = vld [vmem:[#allocation2 + $0x48] sm:$0xff] }
 0x194   : > { %3482 = vmatpush1.bf16.msra.mxu0 %v6686_v60  ;;  %v6764_v60 = vld [vmem:[#allocation7 + $0x9b0] ss:$20 sps:$4 sm:$0xff]  }
 0x195   : > { %3483 = vmatprep.subr.bf16.mxu0 %v6694_v61  ;;  %v6749_v61 = vld [vmem:[#allocation7 + $0x800] ss:$20 sps:$4 sm:$0xff]  }
 0x196   : > { %3711 = vmatpush1.bf16.msra.mxu1 %v6683_v9  ;;  %v6782_v9 = vld [vmem:[#allocation7 + $0xa28] ss:$20 sps:$4 sm:$0xff]  }
 0x197   : > { %3712 = vmatprep.subr.bf16.mxu1 %v6691_v10 }
 0x198   : > { %3484 = vmatpush1.bf16.msra.mxu0 %v6692_v3  ;;  %v6776_v3 = vld [vmem:[#allocation7 + $0xa00] ss:$20 sps:$4 sm:$0xff]  }
 0x199   : > { %3485 = vmatprep.subr.bf16.mxu0 %v6700_v4  ;;  %v7857_v4 = vld [vmem:[#allocation2 + $0x30] sm:$0xff] }
 0x19a   : > { %3713 = vmatpush1.bf16.msra.mxu1 %v6689_v13 }
 0x19b   : > { %3714 = vmatprep.subr.bf16.mxu1 %v6697_v14  ;;  %v6767_v14 = vld [vmem:[#allocation7 + $0x878] ss:$20 sps:$4 sm:$0xff]  }
 0x19c   : > { %3486 = vmatpush1.bf16.msra.mxu0 %v6698_v7  ;;  %v6761_v7 = vld [vmem:[#allocation7 + $0x850] ss:$20 sps:$4 sm:$0xff]  }
 0x19d   : > { %3487 = vmatprep.subr.bf16.mxu0 %v6706_v8  ;;  %v6769_v8 = vld [vmem:[#allocation7 + $0x87c] ss:$20 sps:$4 sm:$0xff]  }
 0x19e   : > { %3715 = vmatpush1.bf16.msra.mxu1 %v6695_v17  ;;  %v6788_v17 = vld [vmem:[#allocation7 + $0xa50] ss:$20 sps:$4 sm:$0xff]  }
 0x19f   : > { %3716 = vmatprep.subr.bf16.mxu1 %v6703_v18  ;;  %v6796_v18 = vld [vmem:[#allocation7 + $0xa7c] ss:$20 sps:$4 sm:$0xff]  }
 0x1a0   : > { %3488 = vmatpush1.bf16.msra.mxu0 %v6704_v11 }
 0x1a1   : > { %3489 = vmatprep.subr.bf16.mxu0 %v6712_v12  ;;  %v6790_v12 = vld [vmem:[#allocation7 + $0xa54] ss:$20 sps:$4 sm:$0xff]  }
 0x1a2   : > { %3717 = vmatpush1.bf16.msra.mxu1 %v6701_v23  ;;  %v6802_v23 = vld [vmem:[#allocation7 + $0xaa4] ss:$20 sps:$4 sm:$0xff]  }
 0x1a3   : > { %3718 = vmatprep.subr.bf16.mxu1 %v6709_v25  ;;  %v6787_v25 = vld [vmem:[#allocation7 + $0x8f4] ss:$20 sps:$4 sm:$0xff]  }
 0x1a4   : > { %3490 = vmatpush1.bf16.msra.mxu0 %v6710_v15  ;;  %v6775_v15 = vld [vmem:[#allocation7 + $0x8a4] ss:$20 sps:$4 sm:$0xff]  }
 0x1a5   : > { %3491 = vmatprep.subr.bf16.mxu0 %v6718_v16 }
 0x1a6   : > { %3719 = vmatpush1.bf16.msra.mxu1 %v6707_v28  ;;  %v6793_v28 = vld [vmem:[#allocation7 + $0x91c] ss:$20 sps:$4 sm:$0xff]  }
 0x1a7   : > { %3720 = vmatprep.subr.bf16.mxu1 %v6715_v35  ;;  %v6814_v35 = vld [vmem:[#allocation7 + $0xaf4] ss:$20 sps:$4 sm:$0xff]  }
 0x1a8   : > { %3492 = vmatpush1.bf16.msra.mxu0 %v6716_v21  ;;  %v6794_v21 = vld [vmem:[#allocation7 + $0xa78] ss:$20 sps:$4 sm:$0xff]  }
 0x1a9   : > { %3493 = vmatprep.subr.bf16.mxu0 %v6724_v24  ;;  %v6779_v24 = vld [vmem:[#allocation7 + $0x8c8] ss:$20 sps:$4 sm:$0xff]  }
 0x1aa   : > { %3721 = vmatpush1.bf16.msra.mxu1 %v6713_v32  ;;  %v6812_v32 = vld [vmem:[#allocation7 + $0xaf0] ss:$20 sps:$4 sm:$0xff]  }
 0x1ab   : > { %3722 = vmatprep.subr.bf16.mxu1 %v6721_v36  ;;  %v6797_v36 = vld [vmem:[#allocation7 + $0x940] ss:$20 sps:$4 sm:$0xff]  }
 0x1ac   : > { %3494 = vmatpush1.bf16.msra.mxu0 %v6722_v27  ;;  %v6808_v27 = vld [vmem:[#allocation7 + $0xacc] ss:$20 sps:$4 sm:$0xff]  }
 0x1ad   : > { %3495 = vmatprep.subr.bf16.mxu0 %v6730_v22  ;;  %v6785_v22 = vld [vmem:[#allocation7 + $0x8f0] ss:$20 sps:$4 sm:$0xff]  }
 0x1ae   : > { %3723 = vmatpush1.bf16.msra.mxu1 %v6719_v40  ;;  %v6826_v40 = vld [vmem:[#allocation7 + $0xb44] ss:$20 sps:$4 sm:$0xff]  }
 0x1af   : > { %3724 = vmatprep.subr.bf16.mxu1 %v6727_v41  ;;  %v6803_v41 = vld [vmem:[#allocation7 + $0x968] ss:$20 sps:$4 sm:$0xff]  }
 0x1b0   : > { %3496 = vmatpush1.bf16.msra.mxu0 %v6728_v31  ;;  %v6799_v31 = vld [vmem:[#allocation7 + $0x944] ss:$20 sps:$4 sm:$0xff]  }
 0x1b1   : > { %3497 = vmatprep.subr.bf16.mxu0 %v6736_v33  ;;  %v6820_v33 = vld [vmem:[#allocation7 + $0xb1c] ss:$20 sps:$4 sm:$0xff]  }
 0x1b2   : > { %3725 = vmatpush1.bf16.msra.mxu1 %v6725_v43  ;;  %v6824_v43 = vld [vmem:[#allocation7 + $0xb40] ss:$20 sps:$4 sm:$0xff]  }
 0x1b3   : > { %3737 = vmatprep.subr.bf16.mxu1 %v6733_v44  ;;  %v6830_v44 = vld [vmem:[#allocation7 + $0xb68] ss:$20 sps:$4 sm:$0xff]  }
 0x1b4   : > { %3498 = vmatpush1.bf16.msra.mxu0 %v6734_v37  ;;  %v6805_v37 = vld [vmem:[#allocation7 + $0x96c] ss:$20 sps:$4 sm:$0xff]  }
 0x1b5   : > { %3499 = vmatprep.subr.bf16.mxu0 %v6742_v39  ;;  %3727 = vmatmul.mubr.bf16.vlgmr.msra.gmra.mrb[4].mxu1 %v7846_v56  ;;  %v6772_v56 = vld [vmem:[#allocation7 + $0x9dc] ss:$20 sps:$4 sm:$0xff]   ;;  %v6818_v39 = vld [vmem:[#allocation7 + $0xb18] ss:$20 sps:$4 sm:$0xff]  }
 0x1b6   : > { %3738 = vmatpush1.bf16.msra.mxu1 %v6731_v49  ;;  %3769 = vmatprep.mubr.bf16.mxu1 %v7848_v58  ;;  %v6778_v58 = vld [vmem:[#allocation7 + $0xa04] ss:$20 sps:$4 sm:$0xff]  }
 0x1b7   : > { %3739 = vmatprep.subr.bf16.mxu1 %v6739_v50  ;;  %v6823_v49 = vld [vmem:[#allocation7 + $0x9e4] ss:$20 sps:$4 sm:$0xff]  }
 0x1b8   : > { %3500 = vmatpush1.bf16.msra.mxu0 %v6740_v38  ;;  %v6832_v38 = vld [vmem:[#allocation7 + $0xb6c] ss:$20 sps:$4 sm:$0xff]   ;;  %v6836_v50 = vld [vmem:[#allocation7 + $0xb90] ss:$20 sps:$4 sm:$0xff]  }
 0x1b9   : > { %3501 = vmatprep.subr.bf16.mxu0 %v6748_v45  ;;  %v6809_v45 = vld [vmem:[#allocation7 + $0x990] ss:$20 sps:$4 sm:$0xff]  }
 0x1ba   : > { %3740 = vmatpush1.bf16.msra.mxu1 %v6737_v53  ;;  %v6829_v53 = vld [vmem:[#allocation7 + $0xa0c] ss:$20 sps:$4 sm:$0xff]  }
 0x1bb   : > { %3741 = vmatprep.subr.bf16.mxu1 %v6745_v54  ;;  %v6842_v54 = vld [vmem:[#allocation7 + $0xbb8] ss:$20 sps:$4 sm:$0xff]  }
 0x1bc   : > { %3502 = vmatpush1.bf16.msra.mxu0 %v6746_v47  ;;  %v6838_v47 = vld [vmem:[#allocation7 + $0xb94] ss:$20 sps:$4 sm:$0xff]  }
 0x1bd   : > { %3503 = vmatprep.subr.bf16.mxu0 %v6754_v48  ;;  %v6815_v48 = vld [vmem:[#allocation7 + $0x9b8] ss:$20 sps:$4 sm:$0xff]  }
 0x1be   : > { %3742 = vmatpush1.bf16.msra.mxu1 %v6743_v29  ;;  %v6835_v29 = vld [vmem:[#allocation7 + $0xa34] ss:$20 sps:$4 sm:$0xff]  }
 0x1bf   : > { %3743 = vmatprep.subr.bf16.mxu1 %v6751_v59  ;;  %v6848_v59 = vld [vmem:[#allocation7 + $0xbe0] ss:$20 sps:$4 sm:$0xff]  }
 0x1c0   : > { %3504 = vmatpush1.bf16.msra.mxu0 %v6752_v51  ;;  %v6844_v51 = vld [vmem:[#allocation7 + $0xbbc] ss:$20 sps:$4 sm:$0xff]  }
 0x1c1   : > { %3505 = vmatprep.subr.bf16.mxu0 %v6760_v52  ;;  %v6821_v52 = vld [vmem:[#allocation7 + $0x9e0] ss:$20 sps:$4 sm:$0xff]  }
 0x1c2   : > { %3744 = vmatpush1.bf16.msra.mxu1 %v6749_v61  ;;  %v6841_v61 = vld [vmem:[#allocation7 + $0xa5c] ss:$20 sps:$4 sm:$0xff]  }
 0x1c3   : > { %3745 = vmatprep.subr.bf16.mxu1 %v6757_v62  ;;  %v6854_v62 = vld [vmem:[#allocation7 + $0xc08] ss:$20 sps:$4 sm:$0xff]  }
 0x1c4   : > { %3506 = vmatpush1.bf16.msra.mxu0 %v6758_v55  ;;  %v6850_v55 = vld [vmem:[#allocation7 + $0xbe4] ss:$20 sps:$4 sm:$0xff]  }
 0x1c5   : > { %3507 = vmatprep.subr.bf16.mxu0 %v6766_v57  ;;  %v6827_v57 = vld [vmem:[#allocation7 + $0xa08] ss:$20 sps:$4 sm:$0xff]  }
 0x1c6   : > { %3746 = vmatpush1.bf16.msra.mxu1 %v6755_v1  ;;  %v6839_v1 = vld [vmem:[#allocation7 + $0xa58] ss:$20 sps:$4 sm:$0xff]  }
 0x1c7   : > { %3747 = vmatprep.subr.bf16.mxu1 %v6763_v2  ;;  %v6860_v2 = vld [vmem:[#allocation7 + $0xc30] ss:$20 sps:$4 sm:$0xff]  }
 0x1c8   : > { %3508 = vmatpush1.bf16.msra.mxu0 %v6764_v60  ;;  %v7862_v10 = vpop.f32.mrb[0].mxu1  ;;  %v6856_v60 = vld [vmem:[#allocation7 + $0xc0c] ss:$20 sps:$4 sm:$0xff]  }
 0x1c9   : > { %3509 = vmatprep.subr.bf16.mxu0 %v6772_v56  ;;  %v7865_v11 = vpop.f32.mrb[1].mxu1  ;;  %v6833_v56 = vld [vmem:[#allocation7 + $0xa30] ss:$20 sps:$4 sm:$0xff]  }
 0x1ca   : > { %v7867_v13 = vpop.f32.mrb[2].mxu1  ;;  %3748 = vmatpush1.bf16.msra.mxu1 %v6761_v7  ;;  %v6866_v7 = vld [vmem:[#allocation7 + $0xc58] ss:$20 sps:$4 sm:$0xff]  }
 0x1cb   : > { %v7869_v16 = vpop.f32.mrb[3].mxu1  ;;  %3749 = vmatprep.subr.bf16.mxu1 %v6769_v8  ;;  %v6851_v8 = vld [vmem:[#allocation7 + $0xaa8] ss:$20 sps:$4 sm:$0xff]  }
 0x1cc   : > { %3510 = vmatpush1.bf16.msra.mxu0 %v6770_v63  ;;  %v6862_v63 = vld [vmem:[#allocation7 + $0xc34] ss:$20 sps:$4 sm:$0xff]  }
 0x1cd   : > { %3522 = vmatprep.subr.bf16.mxu0 %v6778_v58  ;;  %v6847_v58 = vld [vmem:[#allocation7 + $0xa84] ss:$20 sps:$4 sm:$0xff]  }
 0x1ce   : > { %3750 = vmatpush1.bf16.msra.mxu1 %v6767_v14  ;;  %v6900_v14 = vld [vmem:[#allocation7 + $0x10] ss:$20 sps:$4 sm:$0xff]  }
 0x1cf   : > { %3512 = vmatmul.mubr.bf16.vlgmr.msra.gmra.mrb[0].mxu0 %v7857_v4  ;;  %3751 = vmatprep.subr.bf16.mxu1 %v6775_v15  ;;  %v6904_v15 = vld [vmem:[#allocation7 + $0x178] ss:$20 sps:$4 sm:$0xff]  }
 0x1d0   : > { %3523 = vmatpush1.bf16.msra.mxu0 %v6776_v3  ;;  %3554 = vmatprep.mubr.bf16.mxu0 %v7859_v6  ;;  %v6868_v3 = vld [vmem:[#allocation7 + $0xc5c] ss:$20 sps:$4 sm:$0xff]  }
 0x1d1   : > { %3524 = vmatprep.subr.bf16.mxu0 %v6784_v5  ;;  %v6853_v5 = vld [vmem:[#allocation7 + $0xaac] ss:$20 sps:$4 sm:$0xff]  }
 0x1d2   : > { %3752 = vmatpush1.bf16.msra.mxu1 %v6773_v19  ;;  %v6905_v19 = vld [vmem:[#allocation7 + $0x38] ss:$20 sps:$4 sm:$0xff]  }
 0x1d3   : > { %3753 = vmatprep.subr.bf16.mxu1 %v6781_v20  ;;  %v7173_v20 = vld [vmem:[#allocation2 + $0x8] sm:$0xff] }
 0x1d4   : > { %3525 = vmatpush1.bf16.msra.mxu0 %v6782_v9  ;;  %v6859_v9 = vld [vmem:[#allocation7 + $0xad4] ss:$20 sps:$4 sm:$0xff]  }
 0x1d5   : > { %3526 = vmatprep.subr.bf16.mxu0 %v6790_v12  ;;  %v7873_v12 = vld [vmem:[#allocation2 + $0x40] sm:$0xff] }
 0x1d6   : > { %3754 = vmatpush1.bf16.msra.mxu1 %v6779_v24  ;;  %v6871_v24 = vld [vmem:[#allocation7 + $0xb24] ss:$20 sps:$4 sm:$0xff]  }
 0x1d7   : > { %3755 = vmatprep.subr.bf16.mxu1 %v6787_v25  ;;  %v6910_v25 = vld [vmem:[#allocation7 + $0x60] ss:$20 sps:$4 sm:$0xff]  }
 0x1d8   : > { %3527 = vmatpush1.bf16.msra.mxu0 %v6788_v17  ;;  %v6857_v17 = vld [vmem:[#allocation7 + $0xad0] ss:$20 sps:$4 sm:$0xff]  }
 0x1d9   : > { %3528 = vmatprep.subr.bf16.mxu0 %v6796_v18  ;;  %v6865_v18 = vld [vmem:[#allocation7 + $0xafc] ss:$20 sps:$4 sm:$0xff]  }
 0x1da   : > { %3756 = vmatpush1.bf16.msra.mxu1 %v6785_v22  ;;  %v6874_v22 = vld [vmem:[#allocation7 + $0xb4c] ss:$20 sps:$4 sm:$0xff]  }
 0x1db   : > { %3757 = vmatprep.subr.bf16.mxu1 %v6793_v28  ;;  %v6915_v28 = vld [vmem:[#allocation7 + $0x88] ss:$20 sps:$4 sm:$0xff]  }
 0x1dc   : > { %3529 = vmatpush1.bf16.msra.mxu0 %v6794_v21  ;;  %v6909_v21 = vld [vmem:[#allocation7 + $0x1a0] ss:$20 sps:$4 sm:$0xff]  }
 0x1dd   : > { %3530 = vmatprep.subr.bf16.mxu0 %v6802_v23  ;;  %v6863_v23 = vld [vmem:[#allocation7 + $0xaf8] ss:$20 sps:$4 sm:$0xff]  }
 0x1de   : > { %3758 = vmatpush1.bf16.msra.mxu1 %v6791_v30  ;;  %v6919_v30 = vld [vmem:[#allocation7 + $0x1f0] ss:$20 sps:$4 sm:$0xff]  }
 0x1df   : > { %3759 = vmatprep.subr.bf16.mxu1 %v6799_v31  ;;  %v6920_v31 = vld [vmem:[#allocation7 + $0xb0] ss:$20 sps:$4 sm:$0xff]  }
 0x1e0   : > { %3531 = vmatpush1.bf16.msra.mxu0 %v6800_v26  ;;  %v6914_v26 = vld [vmem:[#allocation7 + $0x1c8] ss:$20 sps:$4 sm:$0xff]  }
 0x1e1   : > { %3532 = vmatprep.subr.bf16.mxu0 %v6808_v27  ;;  %v6869_v27 = vld [vmem:[#allocation7 + $0xb20] ss:$20 sps:$4 sm:$0xff]  }
 0x1e2   : > { %3760 = vmatpush1.bf16.msra.mxu1 %v6797_v36  ;;  %v6880_v36 = vld [vmem:[#allocation7 + $0xb9c] ss:$20 sps:$4 sm:$0xff]  }
 0x1e3   : > { %3761 = vmatprep.subr.bf16.mxu1 %v6805_v37  ;;  %v6925_v37 = vld [vmem:[#allocation7 + $0xd8] ss:$20 sps:$4 sm:$0xff]  }
 0x1e4   : > { %3533 = vmatpush1.bf16.msra.mxu0 %v6806_v34  ;;  %v6872_v34 = vld [vmem:[#allocation7 + $0xb48] ss:$20 sps:$4 sm:$0xff]  }
 0x1e5   : > { %3534 = vmatprep.subr.bf16.mxu0 %v6814_v35  ;;  %v6877_v35 = vld [vmem:[#allocation7 + $0xb74] ss:$20 sps:$4 sm:$0xff]  }
 0x1e6   : > { %3762 = vmatpush1.bf16.msra.mxu1 %v6803_v41  ;;  %v6883_v41 = vld [vmem:[#allocation7 + $0xbc4] ss:$20 sps:$4 sm:$0xff]  }
 0x1e7   : > { %3763 = vmatprep.subr.bf16.mxu1 %v6811_v42  ;;  %v6930_v42 = vld [vmem:[#allocation7 + $0x100] ss:$20 sps:$4 sm:$0xff]  }
 0x1e8   : > { %3535 = vmatpush1.bf16.msra.mxu0 %v6812_v32  ;;  %v6875_v32 = vld [vmem:[#allocation7 + $0xb70] ss:$20 sps:$4 sm:$0xff]  }
 0x1e9   : > { %3536 = vmatprep.subr.bf16.mxu0 %v6820_v33  ;;  %v6924_v33 = vld [vmem:[#allocation7 + $0x218] ss:$20 sps:$4 sm:$0xff]  }
 0x1ea   : > { %3764 = vmatpush1.bf16.msra.mxu1 %v6809_v45  ;;  %v6886_v45 = vld [vmem:[#allocation7 + $0xbec] ss:$20 sps:$4 sm:$0xff]  }
 0x1eb   : > { %3765 = vmatprep.subr.bf16.mxu1 %v6817_v46  ;;  %v6935_v46 = vld [vmem:[#allocation7 + $0x128] ss:$20 sps:$4 sm:$0xff]  }
 0x1ec   : > { %3537 = vmatpush1.bf16.msra.mxu0 %v6818_v39  ;;  %v6929_v39 = vld [vmem:[#allocation7 + $0x240] ss:$20 sps:$4 sm:$0xff]  }
 0x1ed   : > { %3538 = vmatprep.subr.bf16.mxu0 %v6826_v40  ;;  %v6878_v40 = vld [vmem:[#allocation7 + $0xb98] ss:$20 sps:$4 sm:$0xff]  }
 0x1ee   : > { %3766 = vmatpush1.bf16.msra.mxu1 %v6815_v48  ;;  %v6889_v48 = vld [vmem:[#allocation7 + $0xc14] ss:$20 sps:$4 sm:$0xff]  }
 0x1ef   : > { %3767 = vmatprep.subr.bf16.mxu1 %v6823_v49  ;;  %v6939_v49 = vld [vmem:[#allocation7 + $0x510] ss:$20 sps:$4 sm:$0xff]  }
 0x1f0   : > { %3539 = vmatpush1.bf16.msra.mxu0 %v6824_v43  ;;  %v6934_v43 = vld [vmem:[#allocation7 + $0x268] ss:$20 sps:$4 sm:$0xff]  }
 0x1f1   : > { %3540 = vmatprep.subr.bf16.mxu0 %v6832_v38  ;;  %v6881_v38 = vld [vmem:[#allocation7 + $0xbc0] ss:$20 sps:$4 sm:$0xff]  }
 0x1f2   : > { %3768 = vmatpush1.bf16.msra.mxu1 %v6821_v52  ;;  %v6892_v52 = vld [vmem:[#allocation7 + $0xc3c] ss:$20 sps:$4 sm:$0xff]  }
 0x1f3   : > { %3780 = vmatprep.subr.bf16.mxu1 %v6829_v53  ;;  %v6943_v53 = vld [vmem:[#allocation7 + $0x538] ss:$20 sps:$4 sm:$0xff]  }
 0x1f4   : > { %3541 = vmatpush1.bf16.msra.mxu0 %v6830_v44  ;;  %v6938_v44 = vld [vmem:[#allocation7 + $0x650] ss:$20 sps:$4 sm:$0xff]  }
 0x1f5   : > { %3542 = vmatprep.subr.bf16.mxu0 %v6838_v47  ;;  %3770 = vmatmul.mubr.bf16.vlgmr.msra.gmra.mrb[4].mxu1 %v7857_v4  ;;  %v6845_v4 = vld [vmem:[#allocation7 + $0xa80] ss:$20 sps:$4 sm:$0xff]   ;;  %v6884_v47 = vld [vmem:[#allocation7 + $0xbe8] ss:$20 sps:$4 sm:$0xff]  }
 0x1f6   : > { %3781 = vmatpush1.bf16.msra.mxu1 %v6827_v57  ;;  %3812 = vmatprep.mubr.bf16.mxu1 %v7859_v6  ;;  %v6899_v6 = vld [vmem:[#allocation7 + $0x150] ss:$20 sps:$4 sm:$0xff]   ;;  %v6890_v57 = vld [vmem:[#allocation7 + $0xc38] ss:$20 sps:$4 sm:$0xff]  }
 0x1f7   : > { %3782 = vmatprep.subr.bf16.mxu1 %v6835_v29  ;;  %v7175_v29 = vld [vmem:[#allocation2 + $0x28] sm:$0xff] }
 0x1f8   : > { %3543 = vmatpush1.bf16.msra.mxu0 %v6836_v50  ;;  %v6942_v50 = vld [vmem:[#allocation7 + $0x678] ss:$20 sps:$4 sm:$0xff]  }
 0x1f9   : > { %3544 = vmatprep.subr.bf16.mxu0 %v6844_v51  ;;  %v6887_v51 = vld [vmem:[#allocation7 + $0xc10] ss:$20 sps:$4 sm:$0xff]  }
 0x1fa   : > { %3783 = vmatpush1.bf16.msra.mxu1 %v6833_v56  ;;  %v6950_v56 = vld [vmem:[#allocation7 + $0x6c8] ss:$20 sps:$4 sm:$0xff]  }
 0x1fb   : > { %3784 = vmatprep.subr.bf16.mxu1 %v6841_v61  ;;  %v6893_v61 = vld [vmem:[#allocation7 + $0xc60] ss:$20 sps:$4 sm:$0xff]  }
 0x1fc   : > { %3545 = vmatpush1.bf16.msra.mxu0 %v6842_v54  ;;  %v7174_v54 = vld [vmem:[#allocation2] sm:$0xff] }
 0x1fd   : > { %3546 = vmatprep.subr.bf16.mxu0 %v6850_v55  ;;  %v6946_v55 = vld [vmem:[#allocation7 + $0x6a0] ss:$20 sps:$4 sm:$0xff]  }
 0x1fe   : > { %3785 = vmatpush1.bf16.msra.mxu1 %v6839_v1  ;;  %v6954_v1 = vld [vmem:[#allocation7 + $0x6f0] ss:$20 sps:$4 sm:$0xff]  }
 0x1ff   : > { %3786 = vmatprep.subr.bf16.mxu1 %v6847_v58  ;;  %v6896_v58 = vld [vmem:[#allocation7 + $0xc88] ss:$20 sps:$4 sm:$0xff]  }
 0x200   : > { %3547 = vmatpush1.bf16.msra.mxu0 %v6848_v59  ;;  %v6895_v59 = vld [vmem:[#allocation7 + $0xc64] ss:$20 sps:$4 sm:$0xff]  }
 0x201   : > { %3548 = vmatprep.subr.bf16.mxu0 %v6856_v60  ;;  %v6947_v60 = vld [vmem:[#allocation7 + $0x560] ss:$20 sps:$4 sm:$0xff]  }
 0x202   : > { %3787 = vmatpush1.bf16.msra.mxu1 %v6845_v4  ;;  %v6958_v4 = vld [vmem:[#allocation7 + $0x718] ss:$20 sps:$4 sm:$0xff]  }
 0x203   : > { %3788 = vmatprep.subr.bf16.mxu1 %v6853_v5  ;;  %v6901_v5 = vld [vmem:[#allocation7 + $0xcb0] ss:$20 sps:$4 sm:$0xff]  }
 0x204   : > { %3549 = vmatpush1.bf16.msra.mxu0 %v6854_v62  ;;  %v6898_v62 = vld [vmem:[#allocation7 + $0xc8c] ss:$20 sps:$4 sm:$0xff]  }
 0x205   : > { %3550 = vmatprep.subr.bf16.mxu0 %v6862_v63  ;;  %v6951_v63 = vld [vmem:[#allocation7 + $0x588] ss:$20 sps:$4 sm:$0xff]  }
 0x206   : > { %3789 = vmatpush1.bf16.msra.mxu1 %v6851_v8  ;;  %v6959_v8 = vld [vmem:[#allocation7 + $0x5d8] ss:$20 sps:$4 sm:$0xff]  }
 0x207   : > { %3790 = vmatprep.subr.bf16.mxu1 %v6859_v9  ;;  %v6906_v9 = vld [vmem:[#allocation7 + $0xcd8] ss:$20 sps:$4 sm:$0xff]  }
 0x208   : > { %3551 = vmatpush1.bf16.msra.mxu0 %v6860_v2  ;;  %v6903_v2 = vld [vmem:[#allocation7 + $0xcb4] ss:$20 sps:$4 sm:$0xff]  }
 0x209   : > { %3552 = vmatprep.subr.bf16.mxu0 %v6868_v3  ;;  %v6955_v3 = vld [vmem:[#allocation7 + $0x5b0] ss:$20 sps:$4 sm:$0xff]  }
 0x20a   : > { %3791 = vmatpush1.bf16.msra.mxu1 %v6857_v17  ;;  %v6966_v17 = vld [vmem:[#allocation7 + $0x768] ss:$20 sps:$4 sm:$0xff]  }
 0x20b   : > { %3792 = vmatprep.subr.bf16.mxu1 %v6865_v18  ;;  %v6911_v18 = vld [vmem:[#allocation7 + $0xd00] ss:$20 sps:$4 sm:$0xff]  }
 0x20c   : > { %3553 = vmatpush1.bf16.msra.mxu0 %v6866_v7  ;;  %v6908_v7 = vld [vmem:[#allocation7 + $0xcdc] ss:$20 sps:$4 sm:$0xff]  }
 0x20d   : > { %6006 = vmatprep.subr.bf16.mxu0 %v6899_v6  ;;  %v6962_v6 = vld [vmem:[#allocation7 + $0x740] ss:$20 sps:$4 sm:$0xff]  }
 0x20e   : > { %3793 = vmatpush1.bf16.msra.mxu1 %v6863_v23  ;;  %v6916_v23 = vld [vmem:[#allocation7 + $0xd28] ss:$20 sps:$4 sm:$0xff]  }
 0x20f   : > { %3555 = vmatmul.mubr.bf16.vlgmr.msra.gmra.mrb[0].mxu0 %v7873_v12  ;;  %3794 = vmatprep.subr.bf16.mxu1 %v6871_v24  ;;  %v6923_v24 = vld [vmem:[#allocation7 + $0xd54] ss:$20 sps:$4 sm:$0xff]  }
 0x210   : > { %6007 = vmatpush3.bf16.msra.mxu0 %v6900_v14  ;;  %3898 = vmatprep.mubr.bf16.mxu0 %v7173_v20  ;;  %v6913_v14 = vld [vmem:[#allocation7 + $0xd04] ss:$20 sps:$4 sm:$0xff]   ;;  %v6967_v20 = vld [vmem:[#allocation7 + $0x628] ss:$20 sps:$4 sm:$0xff]  }
 0x211   : > { %6008 = vmatprep.subr.bf16.mxu0 %v6904_v15  ;;  %v6963_v15 = vld [vmem:[#allocation7 + $0x600] ss:$20 sps:$4 sm:$0xff]  }
 0x212   : > { %3795 = vmatpush1.bf16.msra.mxu1 %v6869_v27  ;;  %v6921_v27 = vld [vmem:[#allocation7 + $0xd50] ss:$20 sps:$4 sm:$0xff]  }
 0x213   : > { %3796 = vmatprep.subr.bf16.mxu1 %v6874_v22  ;;  %v6928_v22 = vld [vmem:[#allocation7 + $0xd7c] ss:$20 sps:$4 sm:$0xff]  }
 0x214   : > { %6009 = vmatpush3.bf16.msra.mxu0 %v6905_v19  ;;  %v6918_v19 = vld [vmem:[#allocation7 + $0xd2c] ss:$20 sps:$4 sm:$0xff]  }
 0x215   : > { %6010 = vmatprep.subr.bf16.mxu0 %v6909_v21  ;;  %v6970_v21 = vld [vmem:[#allocation7 + $0xb50] ss:$20 sps:$4 sm:$0xff]  }
 0x216   : > { %3797 = vmatpush1.bf16.msra.mxu1 %v6872_v34  ;;  %v7176_v34 = vld [vmem:[#allocation2 + $0x20] sm:$0xff] }
 0x217   : > { %3798 = vmatprep.subr.bf16.mxu1 %v6877_v35  ;;  %v6978_v35 = vld [vmem:[#allocation7 + $0xba0] ss:$20 sps:$4 sm:$0xff]  }
 0x218   : > { %6011 = vmatpush3.bf16.msra.mxu0 %v6910_v25  ;;  %v6971_v25 = vld [vmem:[#allocation7 + $0xa10] ss:$20 sps:$4 sm:$0xff]  }
 0x219   : > { %6012 = vmatprep.subr.bf16.mxu0 %v6914_v26  ;;  %v6974_v26 = vld [vmem:[#allocation7 + $0xb78] ss:$20 sps:$4 sm:$0xff]  }
 0x21a   : > { %3799 = vmatpush1.bf16.msra.mxu1 %v6875_v32  ;;  %v6933_v32 = vld [vmem:[#allocation7 + $0xda4] ss:$20 sps:$4 sm:$0xff]  }
 0x21b   : > { %3800 = vmatprep.subr.bf16.mxu1 %v6880_v36  ;;  %v6982_v36 = vld [vmem:[#allocation7 + $0xbc8] ss:$20 sps:$4 sm:$0xff]  }
 0x21c   : > { %6013 = vmatpush3.bf16.msra.mxu0 %v6915_v28  ;;  %v6975_v28 = vld [vmem:[#allocation7 + $0xa38] ss:$20 sps:$4 sm:$0xff]  }
 0x21d   : > { %6014 = vmatprep.subr.bf16.mxu0 %v6919_v30  ;;  %v6926_v30 = vld [vmem:[#allocation7 + $0xd78] ss:$20 sps:$4 sm:$0xff]  }
 0x21e   : > { %3801 = vmatpush1.bf16.msra.mxu1 %v6878_v40  ;;  %v6983_v40 = vld [vmem:[#allocation7 + $0xa88] ss:$20 sps:$4 sm:$0xff]  }
 0x21f   : > { %3802 = vmatprep.subr.bf16.mxu1 %v6883_v41  ;;  %v6986_v41 = vld [vmem:[#allocation7 + $0xbf0] ss:$20 sps:$4 sm:$0xff]  }
 0x220   : > { %6015 = vmatpush3.bf16.msra.mxu0 %v6920_v31  ;;  %v7177_v31 = vld [vmem:[#allocation2 + $0x48] sm:$0xff] }
 0x221   : > { %6016 = vmatprep.subr.bf16.mxu0 %v6924_v33  ;;  %v6979_v33 = vld [vmem:[#allocation7 + $0xa60] ss:$20 sps:$4 sm:$0xff]  }
 0x222   : > { %3803 = vmatpush1.bf16.msra.mxu1 %v6881_v38  ;;  %v6987_v38 = vld [vmem:[#allocation7 + $0xab0] ss:$20 sps:$4 sm:$0xff]  }
 0x223   : > { %3804 = vmatprep.subr.bf16.mxu1 %v6886_v45  ;;  %v7878_v45 = vld [vmem:[#allocation2 + $0x50] sm:$0xff] }
 0x224   : > { %6017 = vmatpush3.bf16.msra.mxu0 %v6925_v37  ;;  %v6931_v37 = vld [vmem:[#allocation7 + $0xda0] ss:$20 sps:$4 sm:$0xff]  }
 0x225   : > { %6018 = vmatprep.subr.bf16.mxu0 %v6929_v39  ;;  %v6936_v39 = vld [vmem:[#allocation7 + $0x3d0] ss:$20 sps:$4 sm:$0xff]  }
 0x226   : > { %3805 = vmatpush1.bf16.msra.mxu1 %v6884_v47  ;;  %v7179_v47 = vld [vmem:[#allocation2 + $0x18] sm:$0xff] }
 0x227   : > { %3806 = vmatprep.subr.bf16.mxu1 %v6889_v48  ;;  %v6944_v48 = vld [vmem:[#allocation7 + $0x420] ss:$20 sps:$4 sm:$0xff]  }
 0x228   : > { %6019 = vmatpush3.bf16.msra.mxu0 %v6930_v42  ;;  %v6937_v42 = vld [vmem:[#allocation7 + $0x290] ss:$20 sps:$4 sm:$0xff]  }
 0x229   : > { %6020 = vmatprep.subr.bf16.mxu0 %v6934_v43  ;;  %v6940_v43 = vld [vmem:[#allocation7 + $0x3f8] ss:$20 sps:$4 sm:$0xff]  }
 0x22a   : > { %3807 = vmatpush1.bf16.msra.mxu1 %v6887_v51  ;;  %v6945_v51 = vld [vmem:[#allocation7 + $0x2e0] ss:$20 sps:$4 sm:$0xff]  }
 0x22b   : > { %3808 = vmatprep.subr.bf16.mxu1 %v6892_v52  ;;  %v6948_v52 = vld [vmem:[#allocation7 + $0x448] ss:$20 sps:$4 sm:$0xff]  }
 0x22c   : > { %6021 = vmatpush3.bf16.msra.mxu0 %v6935_v46  ;;  %v6990_v46 = vld [vmem:[#allocation7 + $0xc18] ss:$20 sps:$4 sm:$0xff]  }
 0x22d   : > { %6050 = vmatprep.subr.bf16.mxu0 %v6938_v44  ;;  %v6941_v44 = vld [vmem:[#allocation7 + $0x2b8] ss:$20 sps:$4 sm:$0xff]  }
 0x22e   : > { %3809 = vmatpush1.bf16.msra.mxu1 %v6890_v57  ;;  %v6952_v57 = vld [vmem:[#allocation7 + $0x470] ss:$20 sps:$4 sm:$0xff]  }
 0x22f   : > { %3899 = vmatmul.mubr.bf16.vlgmr.msra.gmra.mrb[4].mxu0 %v7174_v54  ;;  %3810 = vmatprep.subr.bf16.mxu1 %v6895_v59  ;;  %v6998_v54 = vld [vmem:[#allocation7 + $0xc68] ss:$20 sps:$4 sm:$0xff]  }
 0x230   : > { %6051 = vmatpush3.bf16.msra.mxu0 %v6939_v49  ;;  %3980 = vmatprep.mubr.bf16.mxu0 %v7175_v29  ;;  %v6991_v49 = vld [vmem:[#allocation7 + $0xad8] ss:$20 sps:$4 sm:$0xff]   ;;  %v6999_v29 = vld [vmem:[#allocation7 + $0xb28] ss:$20 sps:$4 sm:$0xff]  }
 0x231   : > { %6052 = vmatprep.subr.bf16.mxu0 %v6942_v50  ;;  %v6994_v50 = vld [vmem:[#allocation7 + $0xc40] ss:$20 sps:$4 sm:$0xff]  }
 0x232   : > { %3811 = vmatpush1.bf16.msra.mxu1 %v6893_v61  ;;  %v7010_v59 = vld [vmem:[#allocation10 + $0x4] ss:$12 sps:$4 sm:$0xff]   ;;  %v7008_v61 = vld [vmem:[#allocation10] ss:$12 sps:$4 sm:$0xff]  }
 0x233   : > { %3823 = vmatprep.subr.bf16.mxu1 %v6898_v62  ;;  %v7013_v62 = vld [vmem:[#allocation10 + $0x1c] ss:$12 sps:$4 sm:$0xff]  }
 0x234   : > { %6053 = vmatpush3.bf16.msra.mxu0 %v6943_v53  ;;  %v6995_v53 = vld [vmem:[#allocation7 + $0xb00] ss:$20 sps:$4 sm:$0xff]  }
 0x235   : > { %6054 = vmatprep.subr.bf16.mxu0 %v6946_v55  ;;  %3813 = vmatmul.mubr.bf16.vlgmr.msra.gmra.mrb[4].mxu1 %v7873_v12  ;;  %v6949_v55 = vld [vmem:[#allocation7 + $0x308] ss:$20 sps:$4 sm:$0xff]  }
 0x236   : > { %3824 = vmatpush1.bf16.msra.mxu1 %v6896_v58  ;;  %3855 = vmatprep.mubr.bf16.mxu1 %v7476_v0  ;;  %v7011_v58 = vld [vmem:[#allocation10 + $0x18] ss:$12 sps:$4 sm:$0xff]  }
 0x237   : > { %3825 = vmatprep.subr.bf16.mxu1 %v6903_v2  ;;  %v7016_v2 = vld [vmem:[#allocation10 + $0x34] ss:$12 sps:$4 sm:$0xff]  }
 0x238   : > { %6055 = vmatpush3.bf16.msra.mxu0 %v6947_v60  ;;  %v6953_v60 = vld [vmem:[#allocation7 + $0x330] ss:$20 sps:$4 sm:$0xff]  }
 0x239   : > { %6056 = vmatprep.subr.bf16.mxu0 %v6950_v56  ;;  %v6956_v56 = vld [vmem:[#allocation7 + $0x498] ss:$20 sps:$4 sm:$0xff]  }
 0x23a   : > { %3826 = vmatpush1.bf16.msra.mxu1 %v6901_v5  ;;  %v7014_v5 = vld [vmem:[#allocation10 + $0x30] ss:$12 sps:$4 sm:$0xff]  }
 0x23b   : > { %3827 = vmatprep.subr.bf16.mxu1 %v6908_v7  ;;  %v7019_v7 = vld [vmem:[#allocation10 + $0x4c] ss:$12 sps:$4 sm:$0xff]  }
 0x23c   : > { %6057 = vmatpush3.bf16.msra.mxu0 %v6951_v63  ;;  %v6957_v63 = vld [vmem:[#allocation7 + $0x358] ss:$20 sps:$4 sm:$0xff]  }
 0x23d   : > { %6058 = vmatprep.subr.bf16.mxu0 %v6954_v1  ;;  %v6960_v1 = vld [vmem:[#allocation7 + $0x4c0] ss:$20 sps:$4 sm:$0xff]  }
 0x23e   : > { %3828 = vmatpush1.bf16.msra.mxu1 %v6906_v9  ;;  %v7017_v9 = vld [vmem:[#allocation10 + $0x48] ss:$12 sps:$4 sm:$0xff]  }
 0x23f   : > { %3829 = vmatprep.subr.bf16.mxu1 %v6913_v14  ;;  %v6969_v14 = vld [vmem:[#allocation7 + $0x790] ss:$20 sps:$4 sm:$0xff]  }
 0x240   : > { %6059 = vmatpush3.bf16.msra.mxu0 %v6955_v3  ;;  %v6961_v3 = vld [vmem:[#allocation7 + $0x380] ss:$20 sps:$4 sm:$0xff]  }
 0x241   : > { %6060 = vmatprep.subr.bf16.mxu0 %v6958_v4  ;;  %v6964_v4 = vld [vmem:[#allocation7 + $0x4e8] ss:$20 sps:$4 sm:$0xff]  }
 0x242   : > { %3830 = vmatpush1.bf16.msra.mxu1 %v6911_v18  ;;  %v7180_v18 = vld [vmem:[#allocation2 + $0x10] sm:$0xff] }
 0x243   : > { %3831 = vmatprep.subr.bf16.mxu1 %v6918_v19  ;;  %v7025_v19 = vld [vmem:[#allocation10 + $0x7c] ss:$12 sps:$4 sm:$0xff]  }
 0x244   : > { %6061 = vmatpush3.bf16.msra.mxu0 %v6959_v8  ;;  %v6965_v8 = vld [vmem:[#allocation7 + $0x3a8] ss:$20 sps:$4 sm:$0xff]  }
 0x245   : > { %6062 = vmatprep.subr.bf16.mxu0 %v6962_v6  ;;  %v6968_v6 = vld [vmem:[#allocation7 + $0x8d0] ss:$20 sps:$4 sm:$0xff]  }
 0x246   : > { %3832 = vmatpush1.bf16.msra.mxu1 %v6916_v23  ;;  %v6976_v23 = vld [vmem:[#allocation7 + $0x920] ss:$20 sps:$4 sm:$0xff]  }
 0x247   : > { %3833 = vmatprep.subr.bf16.mxu1 %v6923_v24  ;;  %v7023_v24 = vld [vmem:[#allocation10 + $0x78] ss:$12 sps:$4 sm:$0xff]  }
 0x248   : > { %6063 = vmatpush3.bf16.msra.mxu0 %v6963_v15  ;;  %v6972_v15 = vld [vmem:[#allocation7 + $0x8f8] ss:$20 sps:$4 sm:$0xff]  }
 0x249   : > { %6064 = vmatprep.subr.bf16.mxu0 %v6966_v17  ;;  %v7020_v17 = vld [vmem:[#allocation10 + $0x60] ss:$12 sps:$4 sm:$0xff]  }
 0x24a   : > { %3834 = vmatpush1.bf16.msra.mxu1 %v6921_v27  ;;  %v6980_v27 = vld [vmem:[#allocation7 + $0x948] ss:$20 sps:$4 sm:$0xff]  }
 0x24b   : > { %3835 = vmatprep.subr.bf16.mxu1 %v6928_v22  ;;  %v7026_v22 = vld [vmem:[#allocation10 + $0x90] ss:$12 sps:$4 sm:$0xff]  }
 0x24c   : > { %6065 = vmatpush3.bf16.msra.mxu0 %v6967_v20  ;;  %v6973_v20 = vld [vmem:[#allocation7 + $0x7b8] ss:$20 sps:$4 sm:$0xff]  }
 0x24d   : > { %6094 = vmatprep.subr.bf16.mxu0 %v6970_v21  ;;  %v7181_v21 = vld [vmem:[#allocation2 + $0x38] sm:$0xff] }
 0x24e   : > { %3836 = vmatpush1.bf16.msra.mxu1 %v6926_v30  ;;  %v7029_v30 = vld [vmem:[#allocation10 + $0xa8] ss:$12 sps:$4 sm:$0xff]  }
 0x24f   : > { %3981 = vmatmul.mubr.bf16.vlgmr.msra.gmra.mrb[8].mxu0 %v7176_v34  ;;  %3837 = vmatprep.subr.bf16.mxu1 %v6933_v32  ;;  %v6981_v34 = vld [vmem:[#allocation7 + $0x808] ss:$20 sps:$4 sm:$0xff]   ;;  %v6985_v32 = vld [vmem:[#allocation7 + $0x830] ss:$20 sps:$4 sm:$0xff]  }
 0x250   : > { %6095 = vmatpush3.bf16.msra.mxu0 %v6971_v25  ;;  %4062 = vmatprep.mubr.bf16.mxu0 %v7177_v31  ;;  %v7028_v25 = vld [vmem:[#allocation10 + $0x94] ss:$12 sps:$4 sm:$0xff]   ;;  %v7034_v31 = vld [vmem:[#allocation10 + $0xc4] ss:$12 sps:$4 sm:$0xff]  }
 0x251   : > { %6096 = vmatprep.subr.bf16.mxu0 %v6974_v26  ;;  %v6977_v26 = vld [vmem:[#allocation7 + $0x7e0] ss:$20 sps:$4 sm:$0xff]  }
 0x252   : > { %3838 = vmatpush1.bf16.msra.mxu1 %v6931_v37  ;;  %v7039_v37 = vld [vmem:[#allocation10 + $0xdc] ss:$12 sps:$4 sm:$0xff]  }
 0x253   : > { %6028 = vmatprep.subr.bf16.mxu1 %v6936_v39  ;;  %v6989_v39 = vld [vmem:[#allocation7 + $0x858] ss:$20 sps:$4 sm:$0xff]  }
 0x254   : > { %6097 = vmatpush3.bf16.msra.mxu0 %v6975_v28  ;;  %v7031_v28 = vld [vmem:[#allocation10 + $0xac] ss:$12 sps:$4 sm:$0xff]  }
 0x255   : > { %6098 = vmatprep.subr.bf16.mxu0 %v6978_v35  ;;  %3856 = vmatmul.mubr.bf16.vlgmr.msra.gmra.mrb[4].mxu1 %v7878_v45  ;;  %v6984_v35 = vld [vmem:[#allocation7 + $0x970] ss:$20 sps:$4 sm:$0xff]  }
 0x256   : > { %6029 = vmatpush3.bf16.msra.mxu1 %v6937_v42  ;;  %3939 = vmatprep.mubr.bf16.mxu1 %v7179_v47  ;;  %v7044_v42 = vld [vmem:[#allocation10 + $0xf4] ss:$12 sps:$4 sm:$0xff]  }
 0x257   : > { %6030 = vmatprep.subr.bf16.mxu1 %v6940_v43  ;;  %v6993_v43 = vld [vmem:[#allocation7 + $0x880] ss:$20 sps:$4 sm:$0xff]   ;;  %v6997_v47 = vld [vmem:[#allocation7 + $0x8a8] ss:$20 sps:$4 sm:$0xff]  }
 0x258   : > { %6099 = vmatpush3.bf16.msra.mxu0 %v6979_v33  ;;  %v6988_v33 = vld [vmem:[#allocation7 + $0x998] ss:$20 sps:$4 sm:$0xff]  }
 0x259   : > { %6100 = vmatprep.subr.bf16.mxu0 %v6982_v36  ;;  %v7032_v36 = vld [vmem:[#allocation10 + $0xc0] ss:$12 sps:$4 sm:$0xff]  }
 0x25a   : > { %6031 = vmatpush3.bf16.msra.mxu1 %v6941_v44  ;;  %v7049_v44 = vld [vmem:[#allocation10 + $0x10c] ss:$12 sps:$4 sm:$0xff]  }
 0x25b   : > { %6032 = vmatprep.subr.bf16.mxu1 %v6944_v48  ;;  %v7047_v48 = vld [vmem:[#allocation10 + $0x108] ss:$12 sps:$4 sm:$0xff]  }
 0x25c   : > { %6101 = vmatpush3.bf16.msra.mxu0 %v6983_v40  ;;  %v6992_v40 = vld [vmem:[#allocation7 + $0x9c0] ss:$20 sps:$4 sm:$0xff]  }
 0x25d   : > { %6102 = vmatprep.subr.bf16.mxu0 %v6986_v41  ;;  %v7037_v41 = vld [vmem:[#allocation10 + $0xd8] ss:$12 sps:$4 sm:$0xff]  }
 0x25e   : > { %6033 = vmatpush3.bf16.msra.mxu1 %v6945_v51  ;;  %v7477_v51 = vmov 0.0  }
 0x25f   : > { %6034 = vmatprep.subr.bf16.mxu1 %v6948_v52  ;;  %v7052_v52 = vld [vmem:[#allocation10 + $0x120] ss:$12 sps:$4 sm:$0xff]  }
 0x260   : > { %6103 = vmatpush3.bf16.msra.mxu0 %v6987_v38  ;;  %v6996_v38 = vld [vmem:[#allocation7 + $0x9e8] ss:$20 sps:$4 sm:$0xff]  }
 0x261   : > { %6104 = vmatprep.subr.bf16.mxu0 %v6990_v46  ;;  %v7042_v46 = vld [vmem:[#allocation10 + $0xf0] ss:$12 sps:$4 sm:$0xff]  }
 0x262   : > { %6035 = vmatpush3.bf16.msra.mxu1 %v6949_v55  ;;  %v7001_v55 = vld [vmem:[#allocation7 + $0xcb8] ss:$20 sps:$4 sm:$0xff]  }
 0x263   : > { %6036 = vmatprep.subr.bf16.mxu1 %v6952_v57  ;;  %v7057_v57 = vld [vmem:[#allocation10 + $0x138] ss:$12 sps:$4 sm:$0xff]  }
 0x264   : > { %6105 = vmatpush3.bf16.msra.mxu0 %v6991_v49  ;;  %v7054_v49 = vld [vmem:[#allocation10 + $0x124] ss:$12 sps:$4 sm:$0xff]  }
 0x265   : > { %6106 = vmatprep.subr.bf16.mxu0 %v6994_v50  ;;  %v7000_v50 = vld [vmem:[#allocation7 + $0xc90] ss:$20 sps:$4 sm:$0xff]  }
 0x266   : > { %6037 = vmatpush3.bf16.msra.mxu1 %v6953_v60  ;;  %v7062_v60 = vld [vmem:[#allocation10 + $0x150] ss:$12 sps:$4 sm:$0xff]  }
 0x267   : > { %6038 = vmatprep.subr.bf16.mxu1 %v6956_v56  ;;  %v7069_v56 = vld [vmem:[#allocation10 + $0x16c] ss:$12 sps:$4 sm:$0xff]  }
 0x268   : > { %6107 = vmatpush3.bf16.msra.mxu0 %v6995_v53  ;;  %v7182_v53 = vld [vmem:[#allocation2 + $0x30] sm:$0xff] }
 0x269   : > { %6108 = vmatprep.subr.bf16.mxu0 %v6998_v54  ;;  %v7059_v54 = vld [vmem:[#allocation10 + $0x13c] ss:$12 sps:$4 sm:$0xff]  }
 0x26a   : > { %6039 = vmatpush3.bf16.msra.mxu1 %v6957_v63  ;;  %v7074_v63 = vld [vmem:[#allocation10 + $0x184] ss:$12 sps:$4 sm:$0xff]  }
 0x26b   : > { %6040 = vmatprep.subr.bf16.mxu1 %v6960_v1  ;;  %v7004_v1 = vld [vmem:[#allocation7 + $0xd30] ss:$20 sps:$4 sm:$0xff]  }
 0x26c   : > { %6109 = vmatpush3.bf16.msra.mxu0 %v6999_v29  ;;  %v7064_v29 = vld [vmem:[#allocation10 + $0x154] ss:$12 sps:$4 sm:$0xff]  }
 0x26d   : > { %4937 = vmatprep.subr.bf16.mxu0 %v7010_v59  ;;  %v7002_v59 = vld [vmem:[#allocation7 + $0xce0] ss:$20 sps:$4 sm:$0xff]  }
 0x26e   : > { %6041 = vmatpush3.bf16.msra.mxu1 %v6961_v3  ;;  %v7007_v3 = vld [vmem:[#allocation7 + $0xda8] ss:$20 sps:$4 sm:$0xff]  }
 0x26f   : > { %4063 = vmatmul.mubr.bf16.vlgmr.msra.gmra.mrb[12].mxu0 %v7873_v12  ;;  %6042 = vmatprep.subr.bf16.mxu1 %v6964_v4  ;;  %v7022_v12 = vld [vmem:[#allocation10 + $0x64] ss:$12 sps:$4 sm:$0xff]   ;;  %v7035_v4 = vld [vmem:[#allocation10 + $0xc8] ss:$12 sps:$4 sm:$0xff]  }
 0x270   : > { %4938 = vmatpush1.bf16.msra.mxu0 %v7008_v61  ;;  %v7003_v61 = vld [vmem:[#allocation7 + $0xd08] ss:$20 sps:$4 sm:$0xff]  }
 0x271   : > { %4939 = vmatprep.subr.bf16.mxu0 %v7013_v62  ;;  %v7067_v62 = vld [vmem:[#allocation10 + $0x168] ss:$12 sps:$4 sm:$0xff]  }
 0x272   : > { %6043 = vmatpush3.bf16.msra.mxu1 %v6965_v8  ;;  %v7041_v8 = vld [vmem:[#allocation10 + $0x20] ss:$12 sps:$4 sm:$0xff]  }
 0x273   : > { %6072 = vmatprep.subr.bf16.mxu1 %v6968_v6  ;;  %v7045_v6 = vld [vmem:[#allocation10 + $0xf8] ss:$12 sps:$4 sm:$0xff]  }
 0x274   : > { %4940 = vmatpush1.bf16.msra.mxu0 %v7011_v58  ;;  %v7005_v58 = vld [vmem:[#allocation7 + $0xd58] ss:$20 sps:$4 sm:$0xff]  }
 0x275   : > { %4941 = vmatprep.subr.bf16.mxu0 %v7016_v2  ;;  %3940 = vmatmul.mubr.bf16.vlgmr.msra.gmra.mrb[8].mxu1 %v7180_v18  ;;  %v7006_v2 = vld [vmem:[#allocation7 + $0xd80] ss:$20 sps:$4 sm:$0xff]  }
 0x276   : > { %6073 = vmatpush3.bf16.msra.mxu1 %v6969_v14  ;;  %4021 = vmatprep.mubr.bf16.mxu1 %v7181_v21  ;;  %v7051_v14 = vld [vmem:[#allocation10 + $0x50] ss:$12 sps:$4 sm:$0xff]   ;;  %v7060_v18 = vld [vmem:[#allocation10 + $0x140] ss:$12 sps:$4 sm:$0xff]   ;;  %v1037_v21 = vlaneseq }
 0x277   : > { %6074 = vmatprep.subr.bf16.mxu1 %v6972_v15  ;;  %v7055_v15 = vld [vmem:[#allocation10 + $0x128] ss:$12 sps:$4 sm:$0xff]  }
 0x278   : > { %4942 = vmatpush1.bf16.msra.mxu0 %v7014_v5  ;;  %v7036_v5 = vld [vmem:[#allocation10 + $0x8] ss:$12 sps:$4 sm:$0xff]  }
 0x279   : > { %4943 = vmatprep.subr.bf16.mxu0 %v7019_v7  ;;  %v7040_v7 = vld [vmem:[#allocation10 + $0xe0] ss:$12 sps:$4 sm:$0xff]  }
 0x27a   : > { %6075 = vmatpush3.bf16.msra.mxu1 %v6973_v20  ;;  %v7066_v20 = vld [vmem:[#allocation10 + $0x98] ss:$12 sps:$4 sm:$0xff]  }
 0x27b   : > { %6076 = vmatprep.subr.bf16.mxu1 %v6976_v23  ;;  %v7070_v23 = vld [vmem:[#allocation10 + $0x170] ss:$12 sps:$4 sm:$0xff]  }
 0x27c   : > { %4944 = vmatpush1.bf16.msra.mxu0 %v7017_v9  ;;  %v7046_v9 = vld [vmem:[#allocation10 + $0x38] ss:$12 sps:$4 sm:$0xff]  }
 0x27d   : > { %4945 = vmatprep.subr.bf16.mxu0 %v7022_v12  ;;  %v7050_v12 = vld [vmem:[#allocation10 + $0x110] ss:$12 sps:$4 sm:$0xff]  }
 0x27e   : > { %6077 = vmatpush3.bf16.msra.mxu1 %v6977_v26  ;;  %v7096_v26 = vld [vmem:[#allocation10 + $0x248] ss:$12 sps:$4 sm:$0xff]  }
 0x27f   : > { %6078 = vmatprep.subr.bf16.mxu1 %v6980_v27 }
 0x280   : > { %4946 = vmatpush1.bf16.msra.mxu0 %v7020_v17  ;;  %v7056_v17 = vld [vmem:[#allocation10 + $0x68] ss:$12 sps:$4 sm:$0xff]  }
 0x281   : > { %4947 = vmatprep.subr.bf16.mxu0 %v7025_v19  ;;  %v7061_v19 = vld [vmem:[#allocation10 + $0x80] ss:$12 sps:$4 sm:$0xff]  }
 0x282   : > { %6079 = vmatpush3.bf16.msra.mxu1 %v6981_v34 }
 0x283   : > { %6080 = vmatprep.subr.bf16.mxu1 %v6984_v35 }
 0x284   : > { %4948 = vmatpush1.bf16.msra.mxu0 %v7023_v24  ;;  %v7071_v24 = vld [vmem:[#allocation10 + $0xb0] ss:$12 sps:$4 sm:$0xff]  }
 0x285   : > { %4949 = vmatprep.subr.bf16.mxu0 %v7028_v25  ;;  %v7893_v25 = vshrl.u32 %v1037_v21, 7  ;;  %v7130_v21 = vld [vmem:[#allocation10 + $0x218] ss:$12 sps:$4 sm:$0xff]  }
 0x286   : > { %6081 = vmatpush3.bf16.msra.mxu1 %v6985_v32 }
 0x287   : > { %6082 = vmatprep.subr.bf16.mxu1 %v6988_v33  ;;  %v1039_v27 = vsub.s32 0, %v7893_v25 }
 0x288   : > { %4950 = vmatpush1.bf16.msra.mxu0 %v7026_v22  ;;  %v7896_v22 = vld [vmem:[#allocation9] sm:$0x1f] }
 0x289   : > { %4951 = vmatprep.subr.bf16.mxu0 %v7031_v28  ;;  %v1043_v28 = vsub.s32 1, %v7893_v25  ;;  %v1040_v34 = vrot.slane %v7896_v22, %v1039_v27  ;;  %v7093_v27 = vld [vmem:[#allocation10 + $0x228] ss:$12 sps:$4 sm:$0xff]  }
 0x28a   : > { %6083 = vmatpush3.bf16.msra.mxu1 %v6989_v39 }
 0x28b   : > { %6084 = vmatprep.subr.bf16.mxu1 %v6992_v40  ;;  %v1044_v35 = vrot.slane %v7896_v22, %v1043_v28  ;;  %v7135_v28 = vld [vmem:[#allocation10 + $0x230] ss:$12 sps:$4 sm:$0xff]  }
 0x28c   : > { %4952 = vmatpush1.bf16.msra.mxu0 %v7029_v30 }
 0x28d   : > { %4953 = vmatprep.subr.bf16.mxu0 %v7034_v31 }
 0x28e   : > { %6085 = vmatpush3.bf16.msra.mxu1 %v6993_v43 }
 0x28f   : > { %6086 = vmatprep.subr.bf16.mxu1 %v6996_v38 }
 0x290   : > { %4954 = vmatpush1.bf16.msra.mxu0 %v7032_v36 }
 0x291   : > { %4955 = vmatprep.subr.bf16.mxu0 %v7039_v37 }
 0x292   : > { %6087 = vmatpush3.bf16.msra.mxu1 %v6997_v47 }
 0x293   : > { %6178 = vmatprep.subr.bf16.mxu1 %v7477_v51 }
 0x294   : > { %4956 = vmatpush1.bf16.msra.mxu0 %v7037_v41 }
 0x295   : > { %4957 = vmatprep.subr.bf16.mxu0 %v7044_v42  ;;  %4022 = vmatmul.mubr.bf16.vlgmr.msra.gmra.mrb[12].mxu1 %v7182_v53 }
 0x296   : > { %6179 = vmatpush3.bf16.msra.mxu1 %v7000_v50  ;;  %6194 = vmatprep.mubr.msk.bf16.mxu1 %vm7478_vm3, %v7477_v51 }
 0x297   : > { %6180 = vmatprep.subr.bf16.mxu1 %v7477_v51 }
 0x298   : > { %4958 = vmatpush1.bf16.msra.mxu0 %v7042_v46 }
 0x299   : > { %4959 = vmatprep.subr.bf16.mxu0 %v7049_v44 }
 0x29a   : > { %6181 = vmatpush3.bf16.msra.mxu1 %v7001_v55 }
 0x29b   : > { %6182 = vmatprep.subr.bf16.mxu1 %v7477_v51 }
 0x29c   : > { %4960 = vmatpush1.bf16.msra.mxu0 %v7047_v48 }
 0x29d   : > { %4961 = vmatprep.subr.bf16.mxu0 %v7054_v49 }
 0x29e   : > { %6183 = vmatpush3.bf16.msra.mxu1 %v7002_v59  ;;  %v7101_v59 = vld [vmem:[#allocation10 + $0x260] ss:$12 sps:$4 sm:$0xff]  }
 0x29f   : > { %6184 = vmatprep.subr.bf16.mxu1 %v7477_v51 }
 0x2a0   : > { %4962 = vmatpush1.bf16.msra.mxu0 %v7052_v52 }
 0x2a1   : > { %4963 = vmatprep.subr.bf16.mxu0 %v7059_v54 }
 0x2a2   : > { %6185 = vmatpush3.bf16.msra.mxu1 %v7003_v61  ;;  %v7110_v61 = vld [vmem:[#allocation10 + $0x1b8] ss:$12 sps:$4 sm:$0xff]  }
 0x2a3   : > { %6186 = vmatprep.subr.bf16.mxu1 %v7477_v51 }
 0x2a4   : > { %4964 = vmatpush1.bf16.msra.mxu0 %v7057_v57  ;;  %v7100_v57 = vld [vmem:[#allocation10 + $0x188] ss:$12 sps:$4 sm:$0xff]  }
 0x2a5   : > { %4965 = vmatprep.subr.bf16.mxu0 %v7064_v29  ;;  %v7077_v29 = vld [vmem:[#allocation10 + $0x19c] ss:$12 sps:$4 sm:$0xff]  }
 0x2a6   : > { %6187 = vmatpush3.bf16.msra.mxu1 %v7004_v1  ;;  %v7081_v1 = vld [vmem:[#allocation10 + $0x1c8] ss:$12 sps:$4 sm:$0xff]  }
 0x2a7   : > { %6188 = vmatprep.subr.bf16.mxu1 %v7477_v51 }
 0x2a8   : > { %4966 = vmatpush1.bf16.msra.mxu0 %v7062_v60  ;;  %v7106_v60 = vld [vmem:[#allocation10 + $0x278] ss:$12 sps:$4 sm:$0xff]  }
 0x2a9   : > { %4967 = vmatprep.subr.bf16.mxu0 %v7069_v56  ;;  %v7078_v56 = vld [vmem:[#allocation10 + $0x1b0] ss:$12 sps:$4 sm:$0xff]  }
 0x2aa   : > { %6189 = vmatpush3.bf16.msra.mxu1 %v7005_v58  ;;  %v7115_v58 = vld [vmem:[#allocation10 + $0x1d0] ss:$12 sps:$4 sm:$0xff]  }
 0x2ab   : > { %6190 = vmatprep.subr.bf16.mxu1 %v7477_v51 }
 0x2ac   : > { %4968 = vmatpush1.bf16.msra.mxu0 %v7067_v62  ;;  %v7083_v62 = vld [vmem:[#allocation10 + $0x1cc] ss:$12 sps:$4 sm:$0xff]  }
 0x2ad   : > { %4980 = vmatprep.subr.bf16.mxu0 %v7074_v63  ;;  %v7111_v63 = vld [vmem:[#allocation10 + $0x290] ss:$12 sps:$4 sm:$0xff]  }
 0x2ae   : > { %6191 = vmatpush3.bf16.msra.mxu1 %v7006_v2  ;;  %v7086_v2 = vld [vmem:[#allocation10 + $0x1e4] ss:$12 sps:$4 sm:$0xff]  }
 0x2af   : > { %6192 = vmatprep.subr.bf16.mxu1 %v7477_v51 }
 0x2b2   : > { %6193 = vmatpush3.bf16.msra.mxu1 %v7007_v3  ;;  %v7116_v3 = vld [vmem:[#allocation10 + $0x2a8] ss:$12 sps:$4 sm:$0xff]  }
 0x2b3   : > { %6125 = vmatprep.subr.bf16.mxu1 %v7035_v4  ;;  %v7084_v4 = vld [vmem:[#allocation10 + $0x1e0] ss:$12 sps:$4 sm:$0xff]  }
 0x2b5   : > { %6195 = vmatmul.mubr.bf16.vlgmr.msra.gmra.mrb[16].mxu1 %v7878_v45  ;;  %v7065_v45 = vld [vmem:[#allocation10 + $0x158] ss:$12 sps:$4 sm:$0xff]  }
 0x2b6   : > { %6126 = vmatpush3.bf16.msra.mxu1 %v7036_v5  ;;  %v7120_v5 = vld [vmem:[#allocation10 + $0x1e8] ss:$12 sps:$4 sm:$0xff]  }
 0x2b7   : > { %6127 = vmatprep.subr.bf16.mxu1 %v7040_v7  ;;  %v7089_v7 = vld [vmem:[#allocation10 + $0x1fc] ss:$12 sps:$4 sm:$0xff]  }
 0x2ba   : > { %6128 = vmatpush3.bf16.msra.mxu1 %v7041_v8  ;;  %v7121_v8 = vld [vmem:[#allocation10 + $0x2c0] ss:$12 sps:$4 sm:$0xff]  }
 0x2bb   : > { %6129 = vmatprep.subr.bf16.mxu1 %v7045_v6  ;;  %v7087_v6 = vld [vmem:[#allocation10 + $0x1f8] ss:$12 sps:$4 sm:$0xff]  }
 0x2be   : > { %6130 = vmatpush3.bf16.msra.mxu1 %v7046_v9  ;;  %v7125_v9 = vld [vmem:[#allocation10 + $0x200] ss:$12 sps:$4 sm:$0xff]  }
 0x2bf   : > { %6131 = vmatprep.subr.bf16.mxu1 %v7050_v12 }
 0x2c2   : > { %6132 = vmatpush3.bf16.msra.mxu1 %v7051_v14  ;;  %v7092_v14 = vld [vmem:[#allocation10 + $0x214] ss:$12 sps:$4 sm:$0xff]  }
 0x2c3   : > { %6133 = vmatprep.subr.bf16.mxu1 %v7055_v15  ;;  %v7126_v15 = vld [vmem:[#allocation10 + $0x2d8] ss:$12 sps:$4 sm:$0xff]  }
 0x2c6   : > { %6134 = vmatpush3.bf16.msra.mxu1 %v7056_v17 }
 0x2c7   : > { %6135 = vmatprep.subr.bf16.mxu1 %v7060_v18 }
 0x2ca   : > { %6136 = vmatpush3.bf16.msra.mxu1 %v7061_v19 }
 0x2cb   : > { %6137 = vmatprep.subr.bf16.mxu1 %v7065_v45 }
 0x2ce   : > { %6138 = vmatpush3.bf16.msra.mxu1 %v7066_v20  ;;  %v7090_v20 = vld [vmem:[#allocation10 + $0x210] ss:$12 sps:$4 sm:$0xff]  }
 0x2cf   : > { %6139 = vmatprep.subr.bf16.mxu1 %v7070_v23 }
 0x2d2   : > { %6140 = vmatpush3.bf16.msra.mxu1 %v7071_v24  ;;  %v7095_v24 = vld [vmem:[#allocation10 + $0x22c] ss:$12 sps:$4 sm:$0xff]  }
 0x2d3   : > { %6147 = vmatprep.subr.bf16.mxu1 %v7096_v26  ;;  %v7131_v26 = vld [vmem:[#allocation10 + $0x2f0] ss:$12 sps:$4 sm:$0xff]  }
 0x2e2   : > { %v3556_v30 = vpop.f32.mrb[0].mxu0 }
 0x2e3   : > { %v6218_v31 = vadd.f32 %v3556_v30, %v1040_v34  ;;  %v3558_v32 = vpop.f32.mrb[1].mxu0  ;;  %v7104_v30 = vld [vmem:[#allocation10 + $0x25c] ss:$12 sps:$4 sm:$0xff]  }
 0x2e4   : > { %v6220_v33 = vadd.f32 %v3558_v32, %v1044_v35  ;;  %v3560_v36 = vpop.f32.mrb[2].mxu0  ;;  %v7109_v32 = vld [vmem:[#allocation10 + $0x274] ss:$12 sps:$4 sm:$0xff]  }
 0x2e5   : > { %v6219_v37 = vadd.f32 %v6218_v31, %v7862_v10  ;;  %v6222_v39 = vadd.f32 %v3560_v36, %v1040_v34  ;;  %v3562_v40 = vpop.f32.mrb[3].mxu0  ;;  %v7072_v10 = vld [vmem:[#allocation10 + $0x180] ss:$12 sps:$4 sm:$0xff]   ;;  %v7099_v34 = vld [vmem:[#allocation10 + $0x244] ss:$12 sps:$4 sm:$0xff]  }
 0x2e6   : > { %v6221_v41 = vadd.f32 %v6220_v33, %v7865_v11  ;;  %v6224_v42 = vadd.f32 %v3562_v40, %v1044_v35  ;;  %v7075_v11 = vld [vmem:[#allocation10 + $0x198] ss:$12 sps:$4 sm:$0xff]   ;;  %v7097_v35 = vld [vmem:[#allocation10 + $0x240] ss:$12 sps:$4 sm:$0xff]   ;;  %v7107_v33 = vld [vmem:[#allocation10 + $0x270] ss:$12 sps:$4 sm:$0xff]  }
 0x2e7   : > { %v4112_v43 = vmul.f32 0.01, %v6219_v37  ;;  %v6223_v38 = vadd.f32 %v6222_v39, %v7867_v13  ;;  %v7105_v13 = vld [vmem:[#allocation10 + $0x1a0] ss:$12 sps:$4 sm:$0xff]   ;;  %v7102_v31 = vld [vmem:[#allocation10 + $0x258] ss:$12 sps:$4 sm:$0xff]  }
 0x2e8   : > { %v4113_v46 = vmul.f32 0.01, %v6221_v41  ;;  %v6225_v44 = vadd.f32 %v6224_v42, %v7869_v16  ;;  %v7080_v16 = vld [vmem:[#allocation10 + $0x1b4] ss:$12 sps:$4 sm:$0xff]   ;;  %v7114_v36 = vld [vmem:[#allocation10 + $0x28c] ss:$12 sps:$4 sm:$0xff]  }
 0x2e9   : > { %v4117_v47 = vmul.f32 0.01, %v6223_v38  ;;  %v4122_v49 = vmax.f32 %v6219_v37, %v4112_v43  ;;  %v7112_v37 = vld [vmem:[#allocation10 + $0x288] ss:$12 sps:$4 sm:$0xff]   ;;  %v7119_v39 = vld [vmem:[#allocation10 + $0x2a4] ss:$12 sps:$4 sm:$0xff]  }
 0x2ea   : > { %v4118_v48 = vmul.f32 0.01, %v6225_v44  ;;  %v4123_v52 = vmax.f32 %v6221_v41, %v4113_v46  ;;  %v7117_v40 = vld [vmem:[#allocation10 + $0x2a0] ss:$12 sps:$4 sm:$0xff]   ;;  %v7124_v41 = vld [vmem:[#allocation10 + $0x2bc] ss:$12 sps:$4 sm:$0xff]  }
 0x2eb   : > { %v4127_v50 = vmax.f32 %v6223_v38, %v4117_v47  ;;  %v7122_v42 = vld [vmem:[#allocation10 + $0x2b8] ss:$12 sps:$4 sm:$0xff]   ;;  %v7129_v38 = vld [vmem:[#allocation10 + $0x2d4] ss:$12 sps:$4 sm:$0xff]  }
 0x2ec   : > { %v4128_v53 = vmax.f32 %v6225_v44, %v4118_v48 }
 0x2ed   : > { %v4132_v54 = vpack.c.bf16 %v4127_v50, %v4122_v49  ;;  %v7127_v49 = vld [vmem:[#allocation10 + $0x2d0] ss:$12 sps:$4 sm:$0xff]  }
 0x2ee   : > { %v4133_v55 = vpack.c.bf16 %v4128_v53, %v4123_v52  ;;  %v7134_v52 = vld [vmem:[#allocation10 + $0x2ec] ss:$12 sps:$4 sm:$0xff]   ;;  %v1047_v53 = vsub.s32 2, %v7893_v25 }
 0x2f0   : > { %4969 = vmatprep.mubr.bf16.mxu0 %v4133_v55  ;;  %5098 = vmatprep.mubr.bf16.mxu1 %v4133_v55  ;;  %v7132_v55 = vld [vmem:[#allocation10 + $0x2e8] ss:$12 sps:$4 sm:$0xff]  }
 0x2f1   : > { %4970 = vmatmul.mubr.bf16.vlgmr.msra.gmra.mrb[16].mxu0 %v4132_v54  ;;  %5099 = vmatmul.mubr.bf16.vlgmr.msra.gmra.mrb[20].mxu1 %v4132_v54  ;;  %v1051_v54 = vsub.s32 3, %v7893_v25 }
 0x2f2   : > { %4981 = vmatpush1.bf16.msra.mxu0 %v7072_v10  ;;  %6148 = vmatpush3.bf16.msra.mxu1 %v7100_v57  ;;  %v7138_v10 = vld [vmem:[#allocation10 + $0x304] ss:$12 sps:$4 sm:$0xff]   ;;  %v1048_v57 = vrot.slane %v7896_v22, %v1047_v53 }
 0x2f3   : > { %4982 = vmatprep.subr.bf16.mxu0 %v7077_v29  ;;  %6149 = vmatprep.subr.bf16.mxu1 %v7101_v59  ;;  %v1052_v29 = vrot.slane %v7896_v22, %v1051_v54 }
 0x2f6   : > { %4983 = vmatpush1.bf16.msra.mxu0 %v7075_v11  ;;  %6150 = vmatpush3.bf16.msra.mxu1 %v7105_v13 }
 0x2f7   : > { %4984 = vmatprep.subr.bf16.mxu0 %v7080_v16  ;;  %6151 = vmatprep.subr.bf16.mxu1 %v7106_v60 }
 0x2fa   : > { %4985 = vmatpush1.bf16.msra.mxu0 %v7078_v56  ;;  %6152 = vmatpush3.bf16.msra.mxu1 %v7110_v61 }
 0x2fb   : > { %4986 = vmatprep.subr.bf16.mxu0 %v7083_v62  ;;  %6153 = vmatprep.subr.bf16.mxu1 %v7111_v63 }
 0x2fe   : > { %4987 = vmatpush1.bf16.msra.mxu0 %v7081_v1  ;;  %6154 = vmatpush3.bf16.msra.mxu1 %v7115_v58 }
 0x2ff   : > { %4988 = vmatprep.subr.bf16.mxu0 %v7086_v2  ;;  %6155 = vmatprep.subr.bf16.mxu1 %v7116_v3 }
 0x302   : > { %4989 = vmatpush1.bf16.msra.mxu0 %v7084_v4  ;;  %6156 = vmatpush3.bf16.msra.mxu1 %v7120_v5  ;;  %v6022_v12 = vpop.f32.mrb[4].mxu0 }
 0x303   : > { %4990 = vmatprep.subr.bf16.mxu0 %v7089_v7  ;;  %6157 = vmatprep.subr.bf16.mxu1 %v7121_v8  ;;  %v6023_v17 = vpop.f32.mrb[5].mxu0 }
 0x304   : > { %v7905_v18 = vadd.f32 %v6023_v17, %v6022_v12  ;;  %v6025_v19 = vpop.f32.mrb[6].mxu0  ;;  %v7139_v12 = vld [vmem:[#allocation10 + $0x308] ss:$12 sps:$4 sm:$0xff]   ;;  %v7143_v17 = vld [vmem:[#allocation10 + $0x320] ss:$12 sps:$4 sm:$0xff]  }
 0x305   : > { %v6026_v45 = vpop.f32.mrb[7].mxu0 }
 0x306   : > { %4991 = vmatpush1.bf16.msra.mxu0 %v7087_v6  ;;  %6158 = vmatpush3.bf16.msra.mxu1 %v7125_v9  ;;  %v7907_v23 = vadd.f32 %v6026_v45, %v6025_v19  ;;  %v7136_v9 = vld [vmem:[#allocation10 + $0x300] ss:$12 sps:$4 sm:$0xff]  }
 0x307   : > { %4992 = vmatprep.subr.bf16.mxu0 %v7092_v14  ;;  %6159 = vmatprep.subr.bf16.mxu1 %v7126_v15  ;;  %v7142_v14 = vld [vmem:[#allocation10 + $0x31c] ss:$12 sps:$4 sm:$0xff]   ;;  %v7140_v15 = vld [vmem:[#allocation10 + $0x318] ss:$12 sps:$4 sm:$0xff]   ;;  %v7146_v19 = vld [vmem:[#allocation10 + $0x334] ss:$12 sps:$4 sm:$0xff]  }
 0x30a   : > { %4993 = vmatpush1.bf16.msra.mxu0 %v7090_v20  ;;  %6160 = vmatpush3.bf16.msra.mxu1 %v7130_v21  ;;  %v7144_v20 = vld [vmem:[#allocation10 + $0x330] ss:$12 sps:$4 sm:$0xff]   ;;  %v7147_v21 = vld [vmem:[#allocation10 + $0x338] ss:$12 sps:$4 sm:$0xff]  }
 0x30b   : > { %4994 = vmatprep.subr.bf16.mxu0 %v7095_v24  ;;  %6161 = vmatprep.subr.bf16.mxu1 %v7131_v26  ;;  %v7150_v26 = vld [vmem:[#allocation10 + $0x34c] ss:$12 sps:$4 sm:$0xff]  }
 0x30e   : > { %4995 = vmatpush1.bf16.msra.mxu0 %v7093_v27  ;;  %6162 = vmatpush3.bf16.msra.mxu1 %v7135_v28 }
 0x30f   : > { %4996 = vmatprep.subr.bf16.mxu0 %v7099_v34  ;;  %6198 = vmatprep.subr.bf16.mxu1 %v7477_v51 }
 0x312   : > { %4997 = vmatpush1.bf16.msra.mxu0 %v7097_v35 }
 0x313   : > { %4998 = vmatprep.subr.bf16.mxu0 %v7104_v30  ;;  %v7151_v30 = vld [vmem:[#allocation10 + $0x350] ss:$12 sps:$4 sm:$0xff]  }
 0x316   : > { %4999 = vmatpush1.bf16.msra.mxu0 %v7102_v31  ;;  %v7154_v31 = vld [vmem:[#allocation10 + $0x364] ss:$12 sps:$4 sm:$0xff]  }
 0x317   : > { %5000 = vmatprep.subr.bf16.mxu0 %v7109_v32  ;;  %v1055_v32 = vsub.s32 4, %v7893_v25 }
 0x31a   : > { %5001 = vmatpush1.bf16.msra.mxu0 %v7107_v33  ;;  %v7152_v33 = vld [vmem:[#allocation10 + $0x360] ss:$12 sps:$4 sm:$0xff]  }
 0x31b   : > { %5002 = vmatprep.subr.bf16.mxu0 %v7114_v36  ;;  %v7155_v36 = vld [vmem:[#allocation10 + $0x368] ss:$12 sps:$4 sm:$0xff]  }
 0x31e   : > { %5003 = vmatpush1.bf16.msra.mxu0 %v7112_v37  ;;  %v7158_v37 = vld [vmem:[#allocation10 + $0x37c] ss:$12 sps:$4 sm:$0xff]  }
 0x31f   : > { %5004 = vmatprep.subr.bf16.mxu0 %v7119_v39  ;;  %v1056_v39 = vrot.slane %v7896_v22, %v1055_v32  ;;  %v7166_v22 = vld [vmem:[#allocation10 + $0x3ac] ss:$12 sps:$4 sm:$0xff]  }
 0x321   : > { %v3904_v53 = vadd.f32 %v7907_v23, %v1056_v39 }
 0x322   : > { %5005 = vmatpush1.bf16.msra.mxu0 %v7117_v40  ;;  %v6066_v43 = vpop.f32.mrb[8].mxu0  ;;  %v7156_v40 = vld [vmem:[#allocation10 + $0x378] ss:$12 sps:$4 sm:$0xff]  }
 0x323   : > { %5006 = vmatprep.subr.bf16.mxu0 %v7124_v41  ;;  %v6067_v46 = vpop.f32.mrb[9].mxu0  ;;  %v7159_v41 = vld [vmem:[#allocation10 + $0x380] ss:$12 sps:$4 sm:$0xff]  }
 0x324   : > { %v7910_v44 = vadd.f32 %v6067_v46, %v6066_v43  ;;  %v6069_v47 = vpop.f32.mrb[10].mxu0 }
 0x325   : > { %v6070_v48 = vpop.f32.mrb[11].mxu0 }
 0x326   : > { %5007 = vmatpush1.bf16.msra.mxu0 %v7122_v42  ;;  %v7912_v50 = vadd.f32 %v6070_v48, %v6069_v47  ;;  %v7162_v42 = vld [vmem:[#allocation10 + $0x394] ss:$12 sps:$4 sm:$0xff]   ;;  %v7160_v48 = vld [vmem:[#allocation10 + $0x390] ss:$12 sps:$4 sm:$0xff]  }
 0x327   : > { %5008 = vmatprep.subr.bf16.mxu0 %v7129_v38  ;;  %v3901_v38 = vadd.f32 %v7905_v18, %v1056_v39  ;;  %v7164_v18 = vld [vmem:[#allocation10 + $0x3a8] ss:$12 sps:$4 sm:$0xff]  }
 0x328   : > { %v3857_v59 = vpop.f32.mrb[4].mxu1 }
 0x329   : > { %v6226_v11 = vadd.f32 %v3857_v59, %v1048_v57  ;;  %v3859_v13 = vpop.f32.mrb[5].mxu1 }
 0x32a   : > { %5009 = vmatpush1.bf16.msra.mxu0 %v7127_v49  ;;  %v6227_v16 = vadd.f32 %v3859_v13, %v1052_v29  ;;  %v3861_v60 = vpop.f32.mrb[6].mxu1  ;;  %v7163_v49 = vld [vmem:[#allocation10 + $0x398] ss:$12 sps:$4 sm:$0xff]  }
 0x32b   : > { %5010 = vmatprep.subr.bf16.mxu0 %v7134_v52  ;;  %v4114_v56 = vmul.f32 0.01, %v6226_v11  ;;  %v6228_v61 = vadd.f32 %v3861_v60, %v1048_v57  ;;  %v3863_v62 = vpop.f32.mrb[7].mxu1 }
 0x32c   : > { %v4115_v63 = vmul.f32 0.01, %v6227_v16  ;;  %v6229_v1 = vadd.f32 %v3863_v62, %v1052_v29  ;;  %v7167_v29 = vld [vmem:[#allocation10 + $0x3b0] ss:$12 sps:$4 sm:$0xff]  }
 0x32d   : > { %v4119_v58 = vmul.f32 0.01, %v6228_v61  ;;  %v4124_v3 = vmax.f32 %v6226_v11, %v4114_v56 }
 0x32e   : > { %5011 = vmatpush1.bf16.msra.mxu0 %v7132_v55  ;;  %v4120_v2 = vmul.f32 0.01, %v6229_v1  ;;  %v4125_v5 = vmax.f32 %v6227_v16, %v4115_v63 }
 0x32f   : > { %5023 = vmatprep.subr.bf16.mxu0 %v7138_v10  ;;  %v4129_v4 = vmax.f32 %v6228_v61, %v4119_v58 }
 0x330   : > { %v4130_v7 = vmax.f32 %v6229_v1, %v4120_v2 }
 0x331   : > { %v4134_v8 = vpack.c.bf16 %v4129_v4, %v4124_v3 }
 0x332   : > { %v4135_v6 = vpack.c.bf16 %v4130_v7, %v4125_v5 }
 0x334   : > { %5012 = vmatprep.mubr.bf16.mxu0 %v4135_v6  ;;  %5139 = vmatprep.mubr.bf16.mxu1 %v4135_v6 }
 0x335   : > { %5140 = vmatmul.mubr.bf16.vlgmr.msra.gmra.mrb[24].mxu1 %v4134_v8  ;;  %5013 = vmatmul.mubr.bf16.vlgmr.msra.gmra.mrb[16].mxu0 %v4134_v8 }
 0x336   : > { %5024 = vmatpush1.bf16.msra.mxu0 %v7136_v9  ;;  %6199 = vmatpush3.bf16.msra.mxu1 %v7139_v12 }
 0x337   : > { %5025 = vmatprep.subr.bf16.mxu0 %v7142_v14  ;;  %6200 = vmatprep.subr.bf16.mxu1 %v7477_v51 }
 0x338   : > { %5055 = vmatprep.mubr.bf16.mxu0 %v7476_v0  ;;  %6214 = vmatprep.mubr.msk.bf16.mxu1 %vm7478_vm3, %v7477_v51  ;;  %v7148_v0 = vld [vmem:[#allocation10 + $0x348] ss:$12 sps:$4 sm:$0xff]  }
 0x33a   : > { %5026 = vmatpush1.bf16.msra.mxu0 %v7140_v15  ;;  %6201 = vmatpush3.bf16.msra.mxu1 %v7143_v17 }
 0x33b   : > { %5027 = vmatprep.subr.bf16.mxu0 %v7146_v19  ;;  %6202 = vmatprep.subr.bf16.mxu1 %v7477_v51 }
 0x33e   : > { %5028 = vmatpush1.bf16.msra.mxu0 %v7144_v20  ;;  %6203 = vmatpush3.bf16.msra.mxu1 %v7147_v21 }
 0x33f   : > { %5029 = vmatprep.subr.bf16.mxu0 %v7150_v26  ;;  %6204 = vmatprep.subr.bf16.mxu1 %v7477_v51 }
 0x342   : > { %v6110_v45 = vpop.f32.mrb[12].mxu0  ;;  %5030 = vmatpush1.bf16.msra.mxu0 %v7148_v0  ;;  %6205 = vmatpush3.bf16.msra.mxu1 %v7151_v30 }
 0x343   : > { %v6111_v24 = vpop.f32.mrb[13].mxu0  ;;  %5031 = vmatprep.subr.bf16.mxu0 %v7154_v31  ;;  %6206 = vmatprep.subr.bf16.mxu1 %v7477_v51 }
 0x344   : > { %v6112_v27 = vadd.f32 %v6111_v24, %v6110_v45  ;;  %v6113_v28 = vpop.f32.mrb[14].mxu0 }
 0x345   : > { %v6114_v34 = vpop.f32.mrb[15].mxu0 }
 0x346   : > { %v6115_v35 = vadd.f32 %v6114_v34, %v6113_v28  ;;  %5032 = vmatpush1.bf16.msra.mxu0 %v7152_v33  ;;  %6207 = vmatpush3.bf16.msra.mxu1 %v7155_v36 }
 0x347   : > { %5033 = vmatprep.subr.bf16.mxu0 %v7158_v37  ;;  %6208 = vmatprep.subr.bf16.mxu1 %v7477_v51 }
 0x348   : > { %v6044_v43 = vpop.f32.mrb[8].mxu1 }
 0x349   : > { %v6045_v25 = vpop.f32.mrb[9].mxu1 }
 0x34a   : > { %v6046_v46 = vadd.f32 %v6045_v25, %v6044_v43  ;;  %v6047_v47 = vpop.f32.mrb[10].mxu1  ;;  %5034 = vmatpush1.bf16.msra.mxu0 %v7156_v40  ;;  %6209 = vmatpush3.bf16.msra.mxu1 %v7159_v41 }
 0x34b   : > { %v6048_v52 = vpop.f32.mrb[11].mxu1  ;;  %5035 = vmatprep.subr.bf16.mxu0 %v7162_v42  ;;  %6210 = vmatprep.subr.bf16.mxu1 %v7477_v51 }
 0x34c   : > { %v3942_v54 = vadd.f32 %v6046_v46, %v3901_v38  ;;  %v6049_v55 = vadd.f32 %v6048_v52, %v6047_v47  ;;  %v5996_v52 = vld [vmem:[#allocation12] ss:$0 sm:$0xff] }
 0x34e   : > { %v3945_v10 = vadd.f32 %v6049_v55, %v3904_v53  ;;  %v3983_v57 = vadd.f32 %v7910_v44, %v3942_v54  ;;  %5036 = vmatpush1.bf16.msra.mxu0 %v7160_v48  ;;  %6211 = vmatpush3.bf16.msra.mxu1 %v7163_v49 }
 0x34f   : > { %5037 = vmatprep.subr.bf16.mxu0 %v7166_v22  ;;  %6212 = vmatprep.subr.bf16.mxu1 %v7477_v51 }
 0x350   : > { %v3986_v59 = vadd.f32 %v7912_v50, %v3945_v10 }
 0x352   : > { %5038 = vmatpush1.bf16.msra.mxu0 %v7164_v18  ;;  %6213 = vmatpush3.bf16.msra.mxu1 %v7167_v29 }
 0x368   : > { %v6088_v11 = vpop.f32.mrb[12].mxu1 }
 0x369   : > { %v6089_v13 = vpop.f32.mrb[13].mxu1 }
 0x36a   : > { %v6090_v16 = vadd.f32 %v6089_v13, %v6088_v11  ;;  %v6091_v23 = vpop.f32.mrb[14].mxu1 }
 0x36b   : > { %v6092_v60 = vpop.f32.mrb[15].mxu1 }
 0x36c   : > { %v4024_v56 = vadd.f32 %v6090_v16, %v3983_v57  ;;  %v6093_v61 = vadd.f32 %v6092_v60, %v6091_v23  ;;  %v7183_v57 = vld [vmem:[%s7779_s20] sm:$0xff]  ;;  %v7184_v16 = vld [vmem:[%s7779_s20 + $0x8] sm:$0xff] }
 0x36e   : > { %v4027_v62 = vadd.f32 %v6093_v61, %v3986_v59  ;;  %v4065_v44 = vadd.f32 %v6112_v27, %v4024_v56 }
 0x370   : > { %v4068_v63 = vadd.f32 %v6115_v35, %v4027_v62 }
 0x388   : > { %v4105_v1 = vpop.f32.mrb[16].mxu1 }
 0x389   : > { %v4106_v58 = vadd.f32 %v4105_v1, %v4065_v44  ;;  %v6196_v2 = vpop.f32.mrb[17].mxu1 }
 0x38a   : > { %v4108_v3 = vpop.f32.mrb[18].mxu1 }
 0x38b   : > { %v4116_v4 = vmul.f32 0.01, %v4106_v58  ;;  %v4109_v51 = vadd.f32 %v4108_v3, %v4068_v63  ;;  %v6197_v5 = vpop.f32.mrb[19].mxu1 }
 0x38d   : > { %v4121_v50 = vmul.f32 0.01, %v4109_v51  ;;  %v4126_v7 = vmax.f32 %v4106_v58, %v4116_v4 }
 0x38f   : > { %v4131_v8 = vmax.f32 %v4109_v51, %v4121_v50 }
 0x391   : > { %v4136_v6 = vpack.c.bf16 %v4131_v8, %v4126_v7  ;;  %v5997_v8 = vld [vmem:[#allocation13] ss:$0 sm:$0xff] }
 0x393   : > { %5056 = vmatmul.mubr.bf16.vlgmr.msra.gmra.mrb[16].mxu0 %v4136_v6  ;;  %6215 = vmatmul.mubr.bf16.vlgmr.msra.gmra.mrb[28].mxu1 %v4136_v6 }
 0x3c4   : > { %v6141_v9 = vpop.f32.mrb[20].mxu1 }
 0x3c5   : > { %v6142_v12 = vpop.f32.mrb[21].mxu1 }
 0x3c6   : > { %v6143_v14 = vadd.f32 %v6142_v12, %v6141_v9  ;;  %v6144_v15 = vpop.f32.mrb[22].mxu1  ;;  %v5998_v9 = vld [vmem:[#allocation15] ss:$0 sm:$0xff] }
 0x3c7   : > { %v6145_v17 = vpop.f32.mrb[23].mxu1 }
 0x3c8   : > { %v6146_v19 = vadd.f32 %v6145_v17, %v6144_v15 }
 0x408   : > { %v6163_v45 = vpop.f32.mrb[24].mxu1 }
 0x409   : > { %v6164_v20 = vpop.f32.mrb[25].mxu1 }
 0x40a   : > { %v6165_v21 = vadd.f32 %v6164_v20, %v6163_v45  ;;  %v6166_v24 = vpop.f32.mrb[26].mxu1 }
 0x40b   : > { %v6167_v26 = vpop.f32.mrb[27].mxu1 }
 0x40c   : > { %v6168_v27 = vadd.f32 %v6167_v26, %v6166_v24  ;;  %v5142_v28 = vadd.f32 %v6165_v21, %v6143_v14 }
 0x40e   : > { %v5145_v34 = vadd.f32 %v6168_v27, %v6146_v19 }
 0x466   : > { %v5057_v35 = vpop.f32.mrb[16].mxu0  ;;  %v5182_v0 = vpop.f32.mrb[28].mxu1 }
 0x467   : > { %v5183_v30 = vadd.f32 %v5182_v0, %v5142_v28  ;;  %v5059_v31 = vpop.f32.mrb[17].mxu0  ;;  %v6216_v32 = vpop.f32.mrb[29].mxu1 }
 0x468   : > { %5189 = vst [vmem:[#allocation3] sm:$0xff] %v5059_v31  ;;  %v5061_v33 = vpop.f32.mrb[18].mxu0  ;;  %v5185_v36 = vpop.f32.mrb[30].mxu1 }
 0x469   : > { %v5186_v37 = vadd.f32 %v5185_v36, %v5145_v34  ;;  %v5063_v39 = vpop.f32.mrb[19].mxu0  ;;  %v6217_v40 = vpop.f32.mrb[31].mxu1  ;;  %v5202_v41 = vrot.slane %v5183_v30, 1 }
 0x46a   : > { %5190 = vst [vmem:[#allocation3 + $0x8] sm:$0xff] %v5063_v39 }
 0x46b   : > { %v5203_v42 = vrot.slane %v5186_v37, 1 }
 0x46d   : > { %v5204_v43 = vsel %vm464_vm13, %v5202_v41, %v5203_v42 }
 0x471   : > { %v5191_v25 = vld [vmem:[#allocation3 + $0x1] sm:$0xff]  ;;  %v5192_v38 = vld [vmem:[#allocation3 + $0x9] sm:$0x7f] }
 0x472   : > { %v5193_v46 = vadd.f32 %v5191_v25, %v5057_v35  ;;  %v5194_v47 = vadd.f32 %v5192_v38, %v5061_v33 }
 0x474   : > { %5195 = vst [vmem:[#allocation3 + $0x1] sm:$0xff] %v5193_v46  ;;  %5196 = vst [vmem:[#allocation3 + $0x9] sm:$0x7f] %v5194_v47 }
 0x47b   : > { %v5197_v48 = vld [vmem:[#allocation3] sm:$0xff]  ;;  %v5198_v49 = vld [vmem:[#allocation3 + $0x8] sm:$0x7f] }
 0x47c   : > { %v5207_v22 = vadd.f32 %v5204_v43, %v5197_v48  ;;  %v5208_v53 = vadd.f32 %v5203_v42, %v5198_v49 }
 0x47e   : > { %5209 = vst [vmem:[#allocation3] sm:$0xff] %v5207_v22  ;;  %5210 = vst [vmem:[#allocation3 + $0x8] sm:$0x7f] %v5208_v53  ;;  %v5220_v54 = vadd.f32 %v5996_v52, %v5207_v22 }
 0x480   : > { %v5222_v55 = vmul.f32 0.01, %v5220_v54 }
 0x482   : > { %v5224_v10 = vmax.f32 %v5220_v54, %v5222_v55 }
 0x484   : > { %v5226_v18 = vadd.f32 %v7183_v57, %v5224_v10 }
 0x485   : > { %v5212_v29 = vld [vmem:[#allocation3 + $0x8] sm:$0xff] }
 0x486   : > { %5228 = vadd.xlane.f32.xlu0 %v5226_v18  ;;  %v5221_v59 = vadd.f32 %v5996_v52, %v5212_v29 }
 0x488   : > { %v5223_v11 = vmul.f32 0.01, %v5221_v59 }
 0x48a   : > { %v5225_v13 = vmax.f32 %v5221_v59, %v5223_v11 }
 0x48c   : > { %v5227_v23 = vadd.f32 %v7184_v16, %v5225_v13 }
 0x48e   : > { %5230 = vadd.xlane.f32.xlu0 %v5227_v23 }
 0x513   : > { %v5229_v60 = vpop.xlane.xlu0 %5228 }
 0x514   : > { %v5233_v56 = vmul.f32 0.0078125, %v5229_v60 }
 0x516   : > { %v5235_v61 = vsub.f32 %v5226_v18, %v5233_v56 }
 0x518   : > { %v5237_v62 = vmul.f32 %v5235_v61, %v5235_v61 }
 0x51a   : > { %5239 = vadd.xlane.f32.xlu1 %v5237_v62 }
 0x51b   : > { %v5231_v44 = vpop.xlane.xlu0 %5230 }
 0x51c   : > { %v5234_v63 = vmul.f32 0.0078125, %v5231_v44 }
 0x51e   : > { %v5236_v1 = vsub.f32 %v5227_v23, %v5234_v63 }
 0x520   : > { %v5238_v58 = vmul.f32 %v5236_v1, %v5236_v1 }
 0x522   : > { %5241 = vadd.xlane.f32.xlu1 %v5238_v58 }
 0x5a7   : > { %v5240_v2 = vpop.xlane.xlu1 %5239 }
 0x5a8   : > { %v5243_v3 = vmul.f32 0.0078125, %v5240_v2 }
 0x5aa   : > { %v5245_v4 = vadd.f32 1e-05, %v5243_v3 }
 0x5ac   : > { %7168 = vrsqrt.f32 %v5245_v4 }
 0x5af   : > { %v5242_v51 = vpop.xlane.xlu1 %5241 }
 0x5b0   : > { %v5244_v5 = vmul.f32 0.0078125, %v5242_v51 }
 0x5b2   : > { %v5246_v50 = vadd.f32 1e-05, %v5244_v5 }
 0x5b4   : > { %7170 = vrsqrt.f32 %v5246_v50 }
 0x5b6   : > { %v7169_v7 = vpop.eup %7168 }
 0x5b7   : > { %v5249_v6 = vmul.f32 %v7169_v7, %v5235_v61 }
 0x5b9   : > { %v5258_v12 = vmul.f32 %v5997_v8, %v5249_v6 }
 0x5bb   : > { %v5267_v14 = vadd.f32 %v5998_v9, %v5258_v12 }
 0x5bd   : > { %5269 = vst [vmem:[%s375_s8] sm:$0xff] %v5267_v14 }
 0x5be   : > { %v7171_v15 = vpop.eup %7170 }
 0x5bf   : > { %v5250_v17 = vmul.f32 %v7171_v15, %v5236_v1 }
 0x5c1   : > { %v5259_v19 = vmul.f32 %v5997_v8, %v5250_v17 }
 0x5c3   : > { %v5268_v45 = vadd.f32 %v5998_v9, %v5259_v19 }
 0x5c5   : > { %5270 = vst [vmem:[%s375_s8 + $0x8] sm:$0xff] %v5268_v45 }
 0x5c6   : > { %7396 = shalt.err (!%p7393_p8)
}
 0x5c7   : > { %s7397_s12 = scalar_lea.hbm %s7943_s21, 256  ;;  %s7401_s8 = scalar_lea.hbm %s7996_s7, 512 }
 0x5c8   : > { %p7398_p7 = scmp.ne.s32.totalorder %s7943_s21, %s7397_s12  ;;  %p7402_p3 = scmp.lt.u32.totalorder %s7943_s21, %s7996_s7 }
 0x5c9   : > { %p7403_p0 = scmp.lt.u32.totalorder %s7401_s8, %s7397_s12  ;;  %p7405_p6 = scmp.lt.u32.totalorder %s7397_s12, %s7943_s21 }
 0x5ca   : > { %p7399_p9 = pnand %p7398_p7, %p8016_p5 }
 0x5cb   : > { %p7404_p2 = por %p7403_p0, %p7402_p3 }
 0x5cc   : > { %p7400_p4 = pneg %p7399_p9 }
 0x5cd   : > { %p7406_p10 = por %p7405_p6, %p7404_p2 }
 0x5cf   : > { %p7407_p1 = pnand %p7406_p10, %p7400_p4 }
 0x5d1   : > { %7410 = shalt.err (!%p7407_p1)
}
 0x5d2   : > { %s7480_s19 = smov 128   ;;  %s7481_s16 = smov 8  }
 0x5d3   : > { %6300 = dma.vmem_to_hbm [thread:$0]  (%p8016_p5), %s7945_s18, 256, %s7943_s21, %s5272_s15, %s7480_s19, %s7480_s19, %s7481_s16  }
 0x5d4 PF: > { %s5300_s30 = sand.u32 1, %s7449_s24   ;;  %p8017_p11 = scmp.ne.s32.totalorder %s8007_s14, 0 }
 0x5d5   : > { %p8018_p12 = scmp.ge.s32.totalorder %s7461_s27, 2  ;;  %s5301_s13 = scalar_lea.sflag [#allocation6], %s5300_s30 }
 0x5d7   : > { %p6326_p13 = pnand %p8018_p12, %p8017_p11 }
 0x5d9   : > { %7444 = dma.done.wait (!%p6326_p13), %s5301_s13, 256  }
 0x5da   : > { %7446 = vsyncadd (!%p6326_p13), %s5301_s13, 4294967040  ;;  %p23_p8 = scmp.ge.s32.totalorder %s7694_s11, 4   ;;  %s8019_s24 = smov %s7453_s25 }
 0x5db   : > { %s8020_s25 = smov %s7457_s26  ;;  %s8021_s26 = smov %s7705_s10 }
 0x5dc   : > { %s8022_s27 = smov %s7694_s11  ;;  %25 = sbr.rel (!%p23_p8) target bundleno = 8 (0x8), region = 117 }
 0x5e3   :  { %5306 = vsyncpa [#allocation5], 1 }
 0x5e4   :  { %5308 = vsyncpa [#allocation5 + $0x1], 1 }
 0x5e5   :  { %5309 = vsyncpa [#allocation8], 1 }
 0x5e6   :  { %5310 = vsyncpa [#allocation11], 1 }
 0x5e7   :  { %5311 = vsyncpa [#allocation14], 1 }
 0x5e8   :  { %5312 = vsyncpa [#allocation6], 1 }
 0x5e9   :  { %5314 = vsyncpa [#allocation6 + $0x1], 1 }

</bundles_post_ra>
